<compile_context>
chip_gen: v6e
topology: v6e:2x2x1
jax: 0.10.0
libtpu: 0.0.40
codegen_flags: <defaults>
</compile_context>

<pallas_src>
import jax
import jax.numpy as jnp
from jax.experimental import pallas as pl
from jax.experimental.pallas import tpu as pltpu


def conv2d_kernel(x_ref, w_ref, b_ref, o_ref):
    # x_ref: (N, Cin, H, W)           VMEM, NCHW exactly as PyTorch lays it out
    # w_ref: (Cout*Cin*KH*KW,)        SMEM scalars (contiguous reshape of OIHW)
    # b_ref: (Cout,)                  SMEM scalars
    # o_ref: (N, Cout, OH, OW)        VMEM, NCHW
    N, Cin, H, W = x_ref.shape
    _, Cout, OH, OW = o_ref.shape
    KH = H - OH + 1
    KW = W - OW + 1
    taps = Cin * KH * KW

    # Bias broadcast hoisted: one (N, OH, OW) f32 accumulator per output channel,
    # initialized once (not per batch element).
    accs = [jnp.full((N, OH, OW), b_ref[co], dtype=jnp.float32) for co in range(Cout)]

    for ci in range(Cin):
        for kh in range(KH):
            for kw in range(KW):
                # Shifted window read straight from the ref -> offset vector load
                # (vld slot), batch dim carried along: (N, OH, OW).
                patch = x_ref[:, ci, kh:kh + OH, kw:kw + OW].astype(jnp.float32)
                base = ci * KH * KW + kh * KW + kw
                for co in range(Cout):
                    # scalar (SMEM) * slab broadcast-FMA on the VPU
                    accs[co] = accs[co] + w_ref[co * taps + base] * patch

    for co in range(Cout):
        o_ref[:, co, :, :] = accs[co].astype(o_ref.dtype)


def conv2d_pallas(x_nchw, w_oihw, bias):
    """PyTorch-semantics Conv2d forward (stride=1, padding=0). NCHW in / NCHW out."""
    N, Cin, H, W = x_nchw.shape
    Cout, Cin_w, KH, KW = w_oihw.shape
    assert Cin == Cin_w
    OH, OW = H - KH + 1, W - KW + 1

    # Free (contiguous) flatten of OIHW weights; index = ((co*Cin + ci)*KH + kh)*KW + kw.
    w1d = w_oihw.reshape(Cout * Cin * KH * KW)

    itemsize = jnp.dtype(x_nchw.dtype).itemsize
    cost = pl.CostEstimate(
        flops=2 * N * OH * OW * Cout * Cin * KH * KW,
        transcendentals=0,
        bytes_accessed=(x_nchw.size + w1d.size + bias.size + N * Cout * OH * OW) * itemsize,
    )

    return pl.pallas_call(
        conv2d_kernel,
        out_shape=jax.ShapeDtypeStruct((N, Cout, OH, OW), x_nchw.dtype),
        in_specs=[
            pl.BlockSpec(memory_space=pltpu.MemorySpace.VMEM),   # x: whole array in VMEM
            pl.BlockSpec(memory_space=pltpu.MemorySpace.SMEM),   # weights as SMEM scalars
            pl.BlockSpec(memory_space=pltpu.MemorySpace.SMEM),   # bias as SMEM scalars
        ],
        out_specs=pl.BlockSpec(memory_space=pltpu.MemorySpace.VMEM),
        cost_estimate=cost,
    )(x_nchw, w1d, bias)


if __name__ == "__main__":
    key = jax.random.PRNGKey(0)
    k_x, k_w, k_b = jax.random.split(key, 3)

    # MyNetwork: Conv2d(3, 6, kernel_size=3, stride=1, padding=0)
    N, Cin, H, W = 2, 3, 16, 16
    Cout, KH, KW = 6, 3, 3

    x = jax.random.normal(k_x, (N, Cin, H, W), dtype=jnp.float32)

    # Deterministic PyTorch-style init: U(-1/sqrt(fan_in), 1/sqrt(fan_in))
    fan_in = Cin * KH * KW
    bound = 1.0 / (fan_in ** 0.5)
    w = jax.random.uniform(k_w, (Cout, Cin, KH, KW), jnp.float32, -bound, bound)
    b = jax.random.uniform(k_b, (Cout,), jnp.float32, -bound, bound)

    out = jax.block_until_ready(conv2d_pallas(x, w, b))
    assert out.shape == (N, Cout, H - KH + 1, W - KW + 1), out.shape

    # Reference check against XLA's conv (pure JAX, not part of the kernel path).
    ref = jax.lax.conv_general_dilated(
        x, w, window_strides=(1, 1), padding="VALID",
        dimension_numbers=("NCHW", "OIHW", "NCHW"),
    ) + b.reshape(1, Cout, 1, 1)
    assert jnp.allclose(out, ref, atol=1e-4, rtol=1e-4), float(jnp.max(jnp.abs(out - ref)))

    print("KERNEL_OK")
</pallas_src>

<mosaic_0001>
module attributes {stable_mosaic.version = 11 : i64} {
  func.func @conv2d_kernel(%arg0: memref<2x3x16x16xf32, #tpu.memory_space<vmem>>, %arg1: memref<162xf32, #tpu.memory_space<smem>>, %arg2: memref<6xf32, #tpu.memory_space<smem>>, %arg3: memref<2x6x14x14xf32, #tpu.memory_space<vmem>>) attributes {dimension_semantics = [], scalar_prefetch = 0 : i64, scratch_operands = 0 : i64, tpu.core_type = #tpu.core_type<tc>} {
    %c0 = arith.constant 0 : index
    %0 = memref.load %arg2[%c0] : memref<6xf32, #tpu.memory_space<smem>>
    %1 = vector.broadcast %0 : f32 to vector<2x14x14xf32>
    %c1 = arith.constant 1 : index
    %2 = memref.load %arg2[%c1] : memref<6xf32, #tpu.memory_space<smem>>
    %3 = vector.broadcast %2 : f32 to vector<2x14x14xf32>
    %c2 = arith.constant 2 : index
    %4 = memref.load %arg2[%c2] : memref<6xf32, #tpu.memory_space<smem>>
    %5 = vector.broadcast %4 : f32 to vector<2x14x14xf32>
    %c3 = arith.constant 3 : index
    %6 = memref.load %arg2[%c3] : memref<6xf32, #tpu.memory_space<smem>>
    %7 = vector.broadcast %6 : f32 to vector<2x14x14xf32>
    %c4 = arith.constant 4 : index
    %8 = memref.load %arg2[%c4] : memref<6xf32, #tpu.memory_space<smem>>
    %9 = vector.broadcast %8 : f32 to vector<2x14x14xf32>
    %c5 = arith.constant 5 : index
    %10 = memref.load %arg2[%c5] : memref<6xf32, #tpu.memory_space<smem>>
    %11 = vector.broadcast %10 : f32 to vector<2x14x14xf32>
    %c0_0 = arith.constant 0 : index
    %c0_1 = arith.constant 0 : index
    %c0_2 = arith.constant 0 : index
    %c0_3 = arith.constant 0 : index
    %12 = vector.load %arg0[%c0_0, %c0_1, %c0_2, %c0_3] : memref<2x3x16x16xf32, #tpu.memory_space<vmem>>, vector<2x1x14x14xf32>
    %13 = vector.shape_cast %12 : vector<2x1x14x14xf32> to vector<2x14x14xf32>
    %c0_4 = arith.constant 0 : index
    %14 = memref.load %arg1[%c0_4] : memref<162xf32, #tpu.memory_space<smem>>
    %15 = vector.broadcast %14 : f32 to vector<2x14x14xf32>
    %16 = arith.mulf %15, %13 : vector<2x14x14xf32>
    %17 = arith.addf %1, %16 : vector<2x14x14xf32>
    %c27 = arith.constant 27 : index
    %18 = memref.load %arg1[%c27] : memref<162xf32, #tpu.memory_space<smem>>
    %19 = vector.broadcast %18 : f32 to vector<2x14x14xf32>
    %20 = arith.mulf %19, %13 : vector<2x14x14xf32>
    %21 = arith.addf %3, %20 : vector<2x14x14xf32>
    %c54 = arith.constant 54 : index
    %22 = memref.load %arg1[%c54] : memref<162xf32, #tpu.memory_space<smem>>
    %23 = vector.broadcast %22 : f32 to vector<2x14x14xf32>
    %24 = arith.mulf %23, %13 : vector<2x14x14xf32>
    %25 = arith.addf %5, %24 : vector<2x14x14xf32>
    %c81 = arith.constant 81 : index
    %26 = memref.load %arg1[%c81] : memref<162xf32, #tpu.memory_space<smem>>
    %27 = vector.broadcast %26 : f32 to vector<2x14x14xf32>
    %28 = arith.mulf %27, %13 : vector<2x14x14xf32>
    %29 = arith.addf %7, %28 : vector<2x14x14xf32>
    %c108 = arith.constant 108 : index
    %30 = memref.load %arg1[%c108] : memref<162xf32, #tpu.memory_space<smem>>
    %31 = vector.broadcast %30 : f32 to vector<2x14x14xf32>
    %32 = arith.mulf %31, %13 : vector<2x14x14xf32>
    %33 = arith.addf %9, %32 : vector<2x14x14xf32>
    %c135 = arith.constant 135 : index
    %34 = memref.load %arg1[%c135] : memref<162xf32, #tpu.memory_space<smem>>
    %35 = vector.broadcast %34 : f32 to vector<2x14x14xf32>
    %36 = arith.mulf %35, %13 : vector<2x14x14xf32>
    %37 = arith.addf %11, %36 : vector<2x14x14xf32>
    %c0_5 = arith.constant 0 : index
    %c0_6 = arith.constant 0 : index
    %c0_7 = arith.constant 0 : index
    %c1_8 = arith.constant 1 : index
    %38 = vector.load %arg0[%c0_5, %c0_6, %c0_7, %c1_8] : memref<2x3x16x16xf32, #tpu.memory_space<vmem>>, vector<2x1x14x14xf32>
    %39 = vector.shape_cast %38 : vector<2x1x14x14xf32> to vector<2x14x14xf32>
    %c1_9 = arith.constant 1 : index
    %40 = memref.load %arg1[%c1_9] : memref<162xf32, #tpu.memory_space<smem>>
    %41 = vector.broadcast %40 : f32 to vector<2x14x14xf32>
    %42 = arith.mulf %41, %39 : vector<2x14x14xf32>
    %43 = arith.addf %17, %42 : vector<2x14x14xf32>
    %c28 = arith.constant 28 : index
    %44 = memref.load %arg1[%c28] : memref<162xf32, #tpu.memory_space<smem>>
    %45 = vector.broadcast %44 : f32 to vector<2x14x14xf32>
    %46 = arith.mulf %45, %39 : vector<2x14x14xf32>
    %47 = arith.addf %21, %46 : vector<2x14x14xf32>
    %c55 = arith.constant 55 : index
    %48 = memref.load %arg1[%c55] : memref<162xf32, #tpu.memory_space<smem>>
    %49 = vector.broadcast %48 : f32 to vector<2x14x14xf32>
    %50 = arith.mulf %49, %39 : vector<2x14x14xf32>
    %51 = arith.addf %25, %50 : vector<2x14x14xf32>
    %c82 = arith.constant 82 : index
    %52 = memref.load %arg1[%c82] : memref<162xf32, #tpu.memory_space<smem>>
    %53 = vector.broadcast %52 : f32 to vector<2x14x14xf32>
    %54 = arith.mulf %53, %39 : vector<2x14x14xf32>
    %55 = arith.addf %29, %54 : vector<2x14x14xf32>
    %c109 = arith.constant 109 : index
    %56 = memref.load %arg1[%c109] : memref<162xf32, #tpu.memory_space<smem>>
    %57 = vector.broadcast %56 : f32 to vector<2x14x14xf32>
    %58 = arith.mulf %57, %39 : vector<2x14x14xf32>
    %59 = arith.addf %33, %58 : vector<2x14x14xf32>
    %c136 = arith.constant 136 : index
    %60 = memref.load %arg1[%c136] : memref<162xf32, #tpu.memory_space<smem>>
    %61 = vector.broadcast %60 : f32 to vector<2x14x14xf32>
    %62 = arith.mulf %61, %39 : vector<2x14x14xf32>
    %63 = arith.addf %37, %62 : vector<2x14x14xf32>
    %c0_10 = arith.constant 0 : index
    %c0_11 = arith.constant 0 : index
    %c0_12 = arith.constant 0 : index
    %c2_13 = arith.constant 2 : index
    %64 = vector.load %arg0[%c0_10, %c0_11, %c0_12, %c2_13] : memref<2x3x16x16xf32, #tpu.memory_space<vmem>>, vector<2x1x14x14xf32>
    %65 = vector.shape_cast %64 : vector<2x1x14x14xf32> to vector<2x14x14xf32>
    %c2_14 = arith.constant 2 : index
    %66 = memref.load %arg1[%c2_14] : memref<162xf32, #tpu.memory_space<smem>>
    %67 = vector.broadcast %66 : f32 to vector<2x14x14xf32>
    %68 = arith.mulf %67, %65 : vector<2x14x14xf32>
    %69 = arith.addf %43, %68 : vector<2x14x14xf32>
    %c29 = arith.constant 29 : index
    %70 = memref.load %arg1[%c29] : memref<162xf32, #tpu.memory_space<smem>>
    %71 = vector.broadcast %70 : f32 to vector<2x14x14xf32>
    %72 = arith.mulf %71, %65 : vector<2x14x14xf32>
    %73 = arith.addf %47, %72 : vector<2x14x14xf32>
    %c56 = arith.constant 56 : index
    %74 = memref.load %arg1[%c56] : memref<162xf32, #tpu.memory_space<smem>>
    %75 = vector.broadcast %74 : f32 to vector<2x14x14xf32>
    %76 = arith.mulf %75, %65 : vector<2x14x14xf32>
    %77 = arith.addf %51, %76 : vector<2x14x14xf32>
    %c83 = arith.constant 83 : index
    %78 = memref.load %arg1[%c83] : memref<162xf32, #tpu.memory_space<smem>>
    %79 = vector.broadcast %78 : f32 to vector<2x14x14xf32>
    %80 = arith.mulf %79, %65 : vector<2x14x14xf32>
    %81 = arith.addf %55, %80 : vector<2x14x14xf32>
    %c110 = arith.constant 110 : index
    %82 = memref.load %arg1[%c110] : memref<162xf32, #tpu.memory_space<smem>>
    %83 = vector.broadcast %82 : f32 to vector<2x14x14xf32>
    %84 = arith.mulf %83, %65 : vector<2x14x14xf32>
    %85 = arith.addf %59, %84 : vector<2x14x14xf32>
    %c137 = arith.constant 137 : index
    %86 = memref.load %arg1[%c137] : memref<162xf32, #tpu.memory_space<smem>>
    %87 = vector.broadcast %86 : f32 to vector<2x14x14xf32>
    %88 = arith.mulf %87, %65 : vector<2x14x14xf32>
    %89 = arith.addf %63, %88 : vector<2x14x14xf32>
    %c0_15 = arith.constant 0 : index
    %c0_16 = arith.constant 0 : index
    %c1_17 = arith.constant 1 : index
    %c0_18 = arith.constant 0 : index
    %90 = vector.load %arg0[%c0_15, %c0_16, %c1_17, %c0_18] : memref<2x3x16x16xf32, #tpu.memory_space<vmem>>, vector<2x1x14x14xf32>
    %91 = vector.shape_cast %90 : vector<2x1x14x14xf32> to vector<2x14x14xf32>
    %c3_19 = arith.constant 3 : index
    %92 = memref.load %arg1[%c3_19] : memref<162xf32, #tpu.memory_space<smem>>
    %93 = vector.broadcast %92 : f32 to vector<2x14x14xf32>
    %94 = arith.mulf %93, %91 : vector<2x14x14xf32>
    %95 = arith.addf %69, %94 : vector<2x14x14xf32>
    %c30 = arith.constant 30 : index
    %96 = memref.load %arg1[%c30] : memref<162xf32, #tpu.memory_space<smem>>
    %97 = vector.broadcast %96 : f32 to vector<2x14x14xf32>
    %98 = arith.mulf %97, %91 : vector<2x14x14xf32>
    %99 = arith.addf %73, %98 : vector<2x14x14xf32>
    %c57 = arith.constant 57 : index
    %100 = memref.load %arg1[%c57] : memref<162xf32, #tpu.memory_space<smem>>
    %101 = vector.broadcast %100 : f32 to vector<2x14x14xf32>
    %102 = arith.mulf %101, %91 : vector<2x14x14xf32>
    %103 = arith.addf %77, %102 : vector<2x14x14xf32>
    %c84 = arith.constant 84 : index
    %104 = memref.load %arg1[%c84] : memref<162xf32, #tpu.memory_space<smem>>
    %105 = vector.broadcast %104 : f32 to vector<2x14x14xf32>
    %106 = arith.mulf %105, %91 : vector<2x14x14xf32>
    %107 = arith.addf %81, %106 : vector<2x14x14xf32>
    %c111 = arith.constant 111 : index
    %108 = memref.load %arg1[%c111] : memref<162xf32, #tpu.memory_space<smem>>
    %109 = vector.broadcast %108 : f32 to vector<2x14x14xf32>
    %110 = arith.mulf %109, %91 : vector<2x14x14xf32>
    %111 = arith.addf %85, %110 : vector<2x14x14xf32>
    %c138 = arith.constant 138 : index
    %112 = memref.load %arg1[%c138] : memref<162xf32, #tpu.memory_space<smem>>
    %113 = vector.broadcast %112 : f32 to vector<2x14x14xf32>
    %114 = arith.mulf %113, %91 : vector<2x14x14xf32>
    %115 = arith.addf %89, %114 : vector<2x14x14xf32>
    %c0_20 = arith.constant 0 : index
    %c0_21 = arith.constant 0 : index
    %c1_22 = arith.constant 1 : index
    %c1_23 = arith.constant 1 : index
    %116 = vector.load %arg0[%c0_20, %c0_21, %c1_22, %c1_23] : memref<2x3x16x16xf32, #tpu.memory_space<vmem>>, vector<2x1x14x14xf32>
    %117 = vector.shape_cast %116 : vector<2x1x14x14xf32> to vector<2x14x14xf32>
    %c4_24 = arith.constant 4 : index
    %118 = memref.load %arg1[%c4_24] : memref<162xf32, #tpu.memory_space<smem>>
    %119 = vector.broadcast %118 : f32 to vector<2x14x14xf32>
    %120 = arith.mulf %119, %117 : vector<2x14x14xf32>
    %121 = arith.addf %95, %120 : vector<2x14x14xf32>
    %c31 = arith.constant 31 : index
    %122 = memref.load %arg1[%c31] : memref<162xf32, #tpu.memory_space<smem>>
    %123 = vector.broadcast %122 : f32 to vector<2x14x14xf32>
    %124 = arith.mulf %123, %117 : vector<2x14x14xf32>
    %125 = arith.addf %99, %124 : vector<2x14x14xf32>
    %c58 = arith.constant 58 : index
    %126 = memref.load %arg1[%c58] : memref<162xf32, #tpu.memory_space<smem>>
    %127 = vector.broadcast %126 : f32 to vector<2x14x14xf32>
    %128 = arith.mulf %127, %117 : vector<2x14x14xf32>
    %129 = arith.addf %103, %128 : vector<2x14x14xf32>
    %c85 = arith.constant 85 : index
    %130 = memref.load %arg1[%c85] : memref<162xf32, #tpu.memory_space<smem>>
    %131 = vector.broadcast %130 : f32 to vector<2x14x14xf32>
    %132 = arith.mulf %131, %117 : vector<2x14x14xf32>
    %133 = arith.addf %107, %132 : vector<2x14x14xf32>
    %c112 = arith.constant 112 : index
    %134 = memref.load %arg1[%c112] : memref<162xf32, #tpu.memory_space<smem>>
    %135 = vector.broadcast %134 : f32 to vector<2x14x14xf32>
    %136 = arith.mulf %135, %117 : vector<2x14x14xf32>
    %137 = arith.addf %111, %136 : vector<2x14x14xf32>
    %c139 = arith.constant 139 : index
    %138 = memref.load %arg1[%c139] : memref<162xf32, #tpu.memory_space<smem>>
    %139 = vector.broadcast %138 : f32 to vector<2x14x14xf32>
    %140 = arith.mulf %139, %117 : vector<2x14x14xf32>
    %141 = arith.addf %115, %140 : vector<2x14x14xf32>
    %c0_25 = arith.constant 0 : index
    %c0_26 = arith.constant 0 : index
    %c1_27 = arith.constant 1 : index
    %c2_28 = arith.constant 2 : index
    %142 = vector.load %arg0[%c0_25, %c0_26, %c1_27, %c2_28] : memref<2x3x16x16xf32, #tpu.memory_space<vmem>>, vector<2x1x14x14xf32>
    %143 = vector.shape_cast %142 : vector<2x1x14x14xf32> to vector<2x14x14xf32>
    %c5_29 = arith.constant 5 : index
    %144 = memref.load %arg1[%c5_29] : memref<162xf32, #tpu.memory_space<smem>>
    %145 = vector.broadcast %144 : f32 to vector<2x14x14xf32>
    %146 = arith.mulf %145, %143 : vector<2x14x14xf32>
    %147 = arith.addf %121, %146 : vector<2x14x14xf32>
    %c32 = arith.constant 32 : index
    %148 = memref.load %arg1[%c32] : memref<162xf32, #tpu.memory_space<smem>>
    %149 = vector.broadcast %148 : f32 to vector<2x14x14xf32>
    %150 = arith.mulf %149, %143 : vector<2x14x14xf32>
    %151 = arith.addf %125, %150 : vector<2x14x14xf32>
    %c59 = arith.constant 59 : index
    %152 = memref.load %arg1[%c59] : memref<162xf32, #tpu.memory_space<smem>>
    %153 = vector.broadcast %152 : f32 to vector<2x14x14xf32>
    %154 = arith.mulf %153, %143 : vector<2x14x14xf32>
    %155 = arith.addf %129, %154 : vector<2x14x14xf32>
    %c86 = arith.constant 86 : index
    %156 = memref.load %arg1[%c86] : memref<162xf32, #tpu.memory_space<smem>>
    %157 = vector.broadcast %156 : f32 to vector<2x14x14xf32>
    %158 = arith.mulf %157, %143 : vector<2x14x14xf32>
    %159 = arith.addf %133, %158 : vector<2x14x14xf32>
    %c113 = arith.constant 113 : index
    %160 = memref.load %arg1[%c113] : memref<162xf32, #tpu.memory_space<smem>>
    %161 = vector.broadcast %160 : f32 to vector<2x14x14xf32>
    %162 = arith.mulf %161, %143 : vector<2x14x14xf32>
    %163 = arith.addf %137, %162 : vector<2x14x14xf32>
    %c140 = arith.constant 140 : index
    %164 = memref.load %arg1[%c140] : memref<162xf32, #tpu.memory_space<smem>>
    %165 = vector.broadcast %164 : f32 to vector<2x14x14xf32>
    %166 = arith.mulf %165, %143 : vector<2x14x14xf32>
    %167 = arith.addf %141, %166 : vector<2x14x14xf32>
    %c0_30 = arith.constant 0 : index
    %c0_31 = arith.constant 0 : index
    %c2_32 = arith.constant 2 : index
    %c0_33 = arith.constant 0 : index
    %168 = vector.load %arg0[%c0_30, %c0_31, %c2_32, %c0_33] : memref<2x3x16x16xf32, #tpu.memory_space<vmem>>, vector<2x1x14x14xf32>
    %169 = vector.shape_cast %168 : vector<2x1x14x14xf32> to vector<2x14x14xf32>
    %c6 = arith.constant 6 : index
    %170 = memref.load %arg1[%c6] : memref<162xf32, #tpu.memory_space<smem>>
    %171 = vector.broadcast %170 : f32 to vector<2x14x14xf32>
    %172 = arith.mulf %171, %169 : vector<2x14x14xf32>
    %173 = arith.addf %147, %172 : vector<2x14x14xf32>
    %c33 = arith.constant 33 : index
    %174 = memref.load %arg1[%c33] : memref<162xf32, #tpu.memory_space<smem>>
    %175 = vector.broadcast %174 : f32 to vector<2x14x14xf32>
    %176 = arith.mulf %175, %169 : vector<2x14x14xf32>
    %177 = arith.addf %151, %176 : vector<2x14x14xf32>
    %c60 = arith.constant 60 : index
    %178 = memref.load %arg1[%c60] : memref<162xf32, #tpu.memory_space<smem>>
    %179 = vector.broadcast %178 : f32 to vector<2x14x14xf32>
    %180 = arith.mulf %179, %169 : vector<2x14x14xf32>
    %181 = arith.addf %155, %180 : vector<2x14x14xf32>
    %c87 = arith.constant 87 : index
    %182 = memref.load %arg1[%c87] : memref<162xf32, #tpu.memory_space<smem>>
    %183 = vector.broadcast %182 : f32 to vector<2x14x14xf32>
    %184 = arith.mulf %183, %169 : vector<2x14x14xf32>
    %185 = arith.addf %159, %184 : vector<2x14x14xf32>
    %c114 = arith.constant 114 : index
    %186 = memref.load %arg1[%c114] : memref<162xf32, #tpu.memory_space<smem>>
    %187 = vector.broadcast %186 : f32 to vector<2x14x14xf32>
    %188 = arith.mulf %187, %169 : vector<2x14x14xf32>
    %189 = arith.addf %163, %188 : vector<2x14x14xf32>
    %c141 = arith.constant 141 : index
    %190 = memref.load %arg1[%c141] : memref<162xf32, #tpu.memory_space<smem>>
    %191 = vector.broadcast %190 : f32 to vector<2x14x14xf32>
    %192 = arith.mulf %191, %169 : vector<2x14x14xf32>
    %193 = arith.addf %167, %192 : vector<2x14x14xf32>
    %c0_34 = arith.constant 0 : index
    %c0_35 = arith.constant 0 : index
    %c2_36 = arith.constant 2 : index
    %c1_37 = arith.constant 1 : index
    %194 = vector.load %arg0[%c0_34, %c0_35, %c2_36, %c1_37] : memref<2x3x16x16xf32, #tpu.memory_space<vmem>>, vector<2x1x14x14xf32>
    %195 = vector.shape_cast %194 : vector<2x1x14x14xf32> to vector<2x14x14xf32>
    %c7 = arith.constant 7 : index
    %196 = memref.load %arg1[%c7] : memref<162xf32, #tpu.memory_space<smem>>
    %197 = vector.broadcast %196 : f32 to vector<2x14x14xf32>
    %198 = arith.mulf %197, %195 : vector<2x14x14xf32>
    %199 = arith.addf %173, %198 : vector<2x14x14xf32>
    %c34 = arith.constant 34 : index
    %200 = memref.load %arg1[%c34] : memref<162xf32, #tpu.memory_space<smem>>
    %201 = vector.broadcast %200 : f32 to vector<2x14x14xf32>
    %202 = arith.mulf %201, %195 : vector<2x14x14xf32>
    %203 = arith.addf %177, %202 : vector<2x14x14xf32>
    %c61 = arith.constant 61 : index
    %204 = memref.load %arg1[%c61] : memref<162xf32, #tpu.memory_space<smem>>
    %205 = vector.broadcast %204 : f32 to vector<2x14x14xf32>
    %206 = arith.mulf %205, %195 : vector<2x14x14xf32>
    %207 = arith.addf %181, %206 : vector<2x14x14xf32>
    %c88 = arith.constant 88 : index
    %208 = memref.load %arg1[%c88] : memref<162xf32, #tpu.memory_space<smem>>
    %209 = vector.broadcast %208 : f32 to vector<2x14x14xf32>
    %210 = arith.mulf %209, %195 : vector<2x14x14xf32>
    %211 = arith.addf %185, %210 : vector<2x14x14xf32>
    %c115 = arith.constant 115 : index
    %212 = memref.load %arg1[%c115] : memref<162xf32, #tpu.memory_space<smem>>
    %213 = vector.broadcast %212 : f32 to vector<2x14x14xf32>
    %214 = arith.mulf %213, %195 : vector<2x14x14xf32>
    %215 = arith.addf %189, %214 : vector<2x14x14xf32>
    %c142 = arith.constant 142 : index
    %216 = memref.load %arg1[%c142] : memref<162xf32, #tpu.memory_space<smem>>
    %217 = vector.broadcast %216 : f32 to vector<2x14x14xf32>
    %218 = arith.mulf %217, %195 : vector<2x14x14xf32>
    %219 = arith.addf %193, %218 : vector<2x14x14xf32>
    %c0_38 = arith.constant 0 : index
    %c0_39 = arith.constant 0 : index
    %c2_40 = arith.constant 2 : index
    %c2_41 = arith.constant 2 : index
    %220 = vector.load %arg0[%c0_38, %c0_39, %c2_40, %c2_41] : memref<2x3x16x16xf32, #tpu.memory_space<vmem>>, vector<2x1x14x14xf32>
    %221 = vector.shape_cast %220 : vector<2x1x14x14xf32> to vector<2x14x14xf32>
    %c8 = arith.constant 8 : index
    %222 = memref.load %arg1[%c8] : memref<162xf32, #tpu.memory_space<smem>>
    %223 = vector.broadcast %222 : f32 to vector<2x14x14xf32>
    %224 = arith.mulf %223, %221 : vector<2x14x14xf32>
    %225 = arith.addf %199, %224 : vector<2x14x14xf32>
    %c35 = arith.constant 35 : index
    %226 = memref.load %arg1[%c35] : memref<162xf32, #tpu.memory_space<smem>>
    %227 = vector.broadcast %226 : f32 to vector<2x14x14xf32>
    %228 = arith.mulf %227, %221 : vector<2x14x14xf32>
    %229 = arith.addf %203, %228 : vector<2x14x14xf32>
    %c62 = arith.constant 62 : index
    %230 = memref.load %arg1[%c62] : memref<162xf32, #tpu.memory_space<smem>>
    %231 = vector.broadcast %230 : f32 to vector<2x14x14xf32>
    %232 = arith.mulf %231, %221 : vector<2x14x14xf32>
    %233 = arith.addf %207, %232 : vector<2x14x14xf32>
    %c89 = arith.constant 89 : index
    %234 = memref.load %arg1[%c89] : memref<162xf32, #tpu.memory_space<smem>>
    %235 = vector.broadcast %234 : f32 to vector<2x14x14xf32>
    %236 = arith.mulf %235, %221 : vector<2x14x14xf32>
    %237 = arith.addf %211, %236 : vector<2x14x14xf32>
    %c116 = arith.constant 116 : index
    %238 = memref.load %arg1[%c116] : memref<162xf32, #tpu.memory_space<smem>>
    %239 = vector.broadcast %238 : f32 to vector<2x14x14xf32>
    %240 = arith.mulf %239, %221 : vector<2x14x14xf32>
    %241 = arith.addf %215, %240 : vector<2x14x14xf32>
    %c143 = arith.constant 143 : index
    %242 = memref.load %arg1[%c143] : memref<162xf32, #tpu.memory_space<smem>>
    %243 = vector.broadcast %242 : f32 to vector<2x14x14xf32>
    %244 = arith.mulf %243, %221 : vector<2x14x14xf32>
    %245 = arith.addf %219, %244 : vector<2x14x14xf32>
    %c0_42 = arith.constant 0 : index
    %c1_43 = arith.constant 1 : index
    %c0_44 = arith.constant 0 : index
    %c0_45 = arith.constant 0 : index
    %246 = vector.load %arg0[%c0_42, %c1_43, %c0_44, %c0_45] : memref<2x3x16x16xf32, #tpu.memory_space<vmem>>, vector<2x1x14x14xf32>
    %247 = vector.shape_cast %246 : vector<2x1x14x14xf32> to vector<2x14x14xf32>
    %c9 = arith.constant 9 : index
    %248 = memref.load %arg1[%c9] : memref<162xf32, #tpu.memory_space<smem>>
    %249 = vector.broadcast %248 : f32 to vector<2x14x14xf32>
    %250 = arith.mulf %249, %247 : vector<2x14x14xf32>
    %251 = arith.addf %225, %250 : vector<2x14x14xf32>
    %c36 = arith.constant 36 : index
    %252 = memref.load %arg1[%c36] : memref<162xf32, #tpu.memory_space<smem>>
    %253 = vector.broadcast %252 : f32 to vector<2x14x14xf32>
    %254 = arith.mulf %253, %247 : vector<2x14x14xf32>
    %255 = arith.addf %229, %254 : vector<2x14x14xf32>
    %c63 = arith.constant 63 : index
    %256 = memref.load %arg1[%c63] : memref<162xf32, #tpu.memory_space<smem>>
    %257 = vector.broadcast %256 : f32 to vector<2x14x14xf32>
    %258 = arith.mulf %257, %247 : vector<2x14x14xf32>
    %259 = arith.addf %233, %258 : vector<2x14x14xf32>
    %c90 = arith.constant 90 : index
    %260 = memref.load %arg1[%c90] : memref<162xf32, #tpu.memory_space<smem>>
    %261 = vector.broadcast %260 : f32 to vector<2x14x14xf32>
    %262 = arith.mulf %261, %247 : vector<2x14x14xf32>
    %263 = arith.addf %237, %262 : vector<2x14x14xf32>
    %c117 = arith.constant 117 : index
    %264 = memref.load %arg1[%c117] : memref<162xf32, #tpu.memory_space<smem>>
    %265 = vector.broadcast %264 : f32 to vector<2x14x14xf32>
    %266 = arith.mulf %265, %247 : vector<2x14x14xf32>
    %267 = arith.addf %241, %266 : vector<2x14x14xf32>
    %c144 = arith.constant 144 : index
    %268 = memref.load %arg1[%c144] : memref<162xf32, #tpu.memory_space<smem>>
    %269 = vector.broadcast %268 : f32 to vector<2x14x14xf32>
    %270 = arith.mulf %269, %247 : vector<2x14x14xf32>
    %271 = arith.addf %245, %270 : vector<2x14x14xf32>
    %c0_46 = arith.constant 0 : index
    %c1_47 = arith.constant 1 : index
    %c0_48 = arith.constant 0 : index
    %c1_49 = arith.constant 1 : index
    %272 = vector.load %arg0[%c0_46, %c1_47, %c0_48, %c1_49] : memref<2x3x16x16xf32, #tpu.memory_space<vmem>>, vector<2x1x14x14xf32>
    %273 = vector.shape_cast %272 : vector<2x1x14x14xf32> to vector<2x14x14xf32>
    %c10 = arith.constant 10 : index
    %274 = memref.load %arg1[%c10] : memref<162xf32, #tpu.memory_space<smem>>
    %275 = vector.broadcast %274 : f32 to vector<2x14x14xf32>
    %276 = arith.mulf %275, %273 : vector<2x14x14xf32>
    %277 = arith.addf %251, %276 : vector<2x14x14xf32>
    %c37 = arith.constant 37 : index
    %278 = memref.load %arg1[%c37] : memref<162xf32, #tpu.memory_space<smem>>
    %279 = vector.broadcast %278 : f32 to vector<2x14x14xf32>
    %280 = arith.mulf %279, %273 : vector<2x14x14xf32>
    %281 = arith.addf %255, %280 : vector<2x14x14xf32>
    %c64 = arith.constant 64 : index
    %282 = memref.load %arg1[%c64] : memref<162xf32, #tpu.memory_space<smem>>
    %283 = vector.broadcast %282 : f32 to vector<2x14x14xf32>
    %284 = arith.mulf %283, %273 : vector<2x14x14xf32>
    %285 = arith.addf %259, %284 : vector<2x14x14xf32>
    %c91 = arith.constant 91 : index
    %286 = memref.load %arg1[%c91] : memref<162xf32, #tpu.memory_space<smem>>
    %287 = vector.broadcast %286 : f32 to vector<2x14x14xf32>
    %288 = arith.mulf %287, %273 : vector<2x14x14xf32>
    %289 = arith.addf %263, %288 : vector<2x14x14xf32>
    %c118 = arith.constant 118 : index
    %290 = memref.load %arg1[%c118] : memref<162xf32, #tpu.memory_space<smem>>
    %291 = vector.broadcast %290 : f32 to vector<2x14x14xf32>
    %292 = arith.mulf %291, %273 : vector<2x14x14xf32>
    %293 = arith.addf %267, %292 : vector<2x14x14xf32>
    %c145 = arith.constant 145 : index
    %294 = memref.load %arg1[%c145] : memref<162xf32, #tpu.memory_space<smem>>
    %295 = vector.broadcast %294 : f32 to vector<2x14x14xf32>
    %296 = arith.mulf %295, %273 : vector<2x14x14xf32>
    %297 = arith.addf %271, %296 : vector<2x14x14xf32>
    %c0_50 = arith.constant 0 : index
    %c1_51 = arith.constant 1 : index
    %c0_52 = arith.constant 0 : index
    %c2_53 = arith.constant 2 : index
    %298 = vector.load %arg0[%c0_50, %c1_51, %c0_52, %c2_53] : memref<2x3x16x16xf32, #tpu.memory_space<vmem>>, vector<2x1x14x14xf32>
    %299 = vector.shape_cast %298 : vector<2x1x14x14xf32> to vector<2x14x14xf32>
    %c11 = arith.constant 11 : index
    %300 = memref.load %arg1[%c11] : memref<162xf32, #tpu.memory_space<smem>>
    %301 = vector.broadcast %300 : f32 to vector<2x14x14xf32>
    %302 = arith.mulf %301, %299 : vector<2x14x14xf32>
    %303 = arith.addf %277, %302 : vector<2x14x14xf32>
    %c38 = arith.constant 38 : index
    %304 = memref.load %arg1[%c38] : memref<162xf32, #tpu.memory_space<smem>>
    %305 = vector.broadcast %304 : f32 to vector<2x14x14xf32>
    %306 = arith.mulf %305, %299 : vector<2x14x14xf32>
    %307 = arith.addf %281, %306 : vector<2x14x14xf32>
    %c65 = arith.constant 65 : index
    %308 = memref.load %arg1[%c65] : memref<162xf32, #tpu.memory_space<smem>>
    %309 = vector.broadcast %308 : f32 to vector<2x14x14xf32>
    %310 = arith.mulf %309, %299 : vector<2x14x14xf32>
    %311 = arith.addf %285, %310 : vector<2x14x14xf32>
    %c92 = arith.constant 92 : index
    %312 = memref.load %arg1[%c92] : memref<162xf32, #tpu.memory_space<smem>>
    %313 = vector.broadcast %312 : f32 to vector<2x14x14xf32>
    %314 = arith.mulf %313, %299 : vector<2x14x14xf32>
    %315 = arith.addf %289, %314 : vector<2x14x14xf32>
    %c119 = arith.constant 119 : index
    %316 = memref.load %arg1[%c119] : memref<162xf32, #tpu.memory_space<smem>>
    %317 = vector.broadcast %316 : f32 to vector<2x14x14xf32>
    %318 = arith.mulf %317, %299 : vector<2x14x14xf32>
    %319 = arith.addf %293, %318 : vector<2x14x14xf32>
    %c146 = arith.constant 146 : index
    %320 = memref.load %arg1[%c146] : memref<162xf32, #tpu.memory_space<smem>>
    %321 = vector.broadcast %320 : f32 to vector<2x14x14xf32>
    %322 = arith.mulf %321, %299 : vector<2x14x14xf32>
    %323 = arith.addf %297, %322 : vector<2x14x14xf32>
    %c0_54 = arith.constant 0 : index
    %c1_55 = arith.constant 1 : index
    %c1_56 = arith.constant 1 : index
    %c0_57 = arith.constant 0 : index
    %324 = vector.load %arg0[%c0_54, %c1_55, %c1_56, %c0_57] : memref<2x3x16x16xf32, #tpu.memory_space<vmem>>, vector<2x1x14x14xf32>
    %325 = vector.shape_cast %324 : vector<2x1x14x14xf32> to vector<2x14x14xf32>
    %c12 = arith.constant 12 : index
    %326 = memref.load %arg1[%c12] : memref<162xf32, #tpu.memory_space<smem>>
    %327 = vector.broadcast %326 : f32 to vector<2x14x14xf32>
    %328 = arith.mulf %327, %325 : vector<2x14x14xf32>
    %329 = arith.addf %303, %328 : vector<2x14x14xf32>
    %c39 = arith.constant 39 : index
    %330 = memref.load %arg1[%c39] : memref<162xf32, #tpu.memory_space<smem>>
    %331 = vector.broadcast %330 : f32 to vector<2x14x14xf32>
    %332 = arith.mulf %331, %325 : vector<2x14x14xf32>
    %333 = arith.addf %307, %332 : vector<2x14x14xf32>
    %c66 = arith.constant 66 : index
    %334 = memref.load %arg1[%c66] : memref<162xf32, #tpu.memory_space<smem>>
    %335 = vector.broadcast %334 : f32 to vector<2x14x14xf32>
    %336 = arith.mulf %335, %325 : vector<2x14x14xf32>
    %337 = arith.addf %311, %336 : vector<2x14x14xf32>
    %c93 = arith.constant 93 : index
    %338 = memref.load %arg1[%c93] : memref<162xf32, #tpu.memory_space<smem>>
    %339 = vector.broadcast %338 : f32 to vector<2x14x14xf32>
    %340 = arith.mulf %339, %325 : vector<2x14x14xf32>
    %341 = arith.addf %315, %340 : vector<2x14x14xf32>
    %c120 = arith.constant 120 : index
    %342 = memref.load %arg1[%c120] : memref<162xf32, #tpu.memory_space<smem>>
    %343 = vector.broadcast %342 : f32 to vector<2x14x14xf32>
    %344 = arith.mulf %343, %325 : vector<2x14x14xf32>
    %345 = arith.addf %319, %344 : vector<2x14x14xf32>
    %c147 = arith.constant 147 : index
    %346 = memref.load %arg1[%c147] : memref<162xf32, #tpu.memory_space<smem>>
    %347 = vector.broadcast %346 : f32 to vector<2x14x14xf32>
    %348 = arith.mulf %347, %325 : vector<2x14x14xf32>
    %349 = arith.addf %323, %348 : vector<2x14x14xf32>
    %c0_58 = arith.constant 0 : index
    %c1_59 = arith.constant 1 : index
    %c1_60 = arith.constant 1 : index
    %c1_61 = arith.constant 1 : index
    %350 = vector.load %arg0[%c0_58, %c1_59, %c1_60, %c1_61] : memref<2x3x16x16xf32, #tpu.memory_space<vmem>>, vector<2x1x14x14xf32>
    %351 = vector.shape_cast %350 : vector<2x1x14x14xf32> to vector<2x14x14xf32>
    %c13 = arith.constant 13 : index
    %352 = memref.load %arg1[%c13] : memref<162xf32, #tpu.memory_space<smem>>
    %353 = vector.broadcast %352 : f32 to vector<2x14x14xf32>
    %354 = arith.mulf %353, %351 : vector<2x14x14xf32>
    %355 = arith.addf %329, %354 : vector<2x14x14xf32>
    %c40 = arith.constant 40 : index
    %356 = memref.load %arg1[%c40] : memref<162xf32, #tpu.memory_space<smem>>
    %357 = vector.broadcast %356 : f32 to vector<2x14x14xf32>
    %358 = arith.mulf %357, %351 : vector<2x14x14xf32>
    %359 = arith.addf %333, %358 : vector<2x14x14xf32>
    %c67 = arith.constant 67 : index
    %360 = memref.load %arg1[%c67] : memref<162xf32, #tpu.memory_space<smem>>
    %361 = vector.broadcast %360 : f32 to vector<2x14x14xf32>
    %362 = arith.mulf %361, %351 : vector<2x14x14xf32>
    %363 = arith.addf %337, %362 : vector<2x14x14xf32>
    %c94 = arith.constant 94 : index
    %364 = memref.load %arg1[%c94] : memref<162xf32, #tpu.memory_space<smem>>
    %365 = vector.broadcast %364 : f32 to vector<2x14x14xf32>
    %366 = arith.mulf %365, %351 : vector<2x14x14xf32>
    %367 = arith.addf %341, %366 : vector<2x14x14xf32>
    %c121 = arith.constant 121 : index
    %368 = memref.load %arg1[%c121] : memref<162xf32, #tpu.memory_space<smem>>
    %369 = vector.broadcast %368 : f32 to vector<2x14x14xf32>
    %370 = arith.mulf %369, %351 : vector<2x14x14xf32>
    %371 = arith.addf %345, %370 : vector<2x14x14xf32>
    %c148 = arith.constant 148 : index
    %372 = memref.load %arg1[%c148] : memref<162xf32, #tpu.memory_space<smem>>
    %373 = vector.broadcast %372 : f32 to vector<2x14x14xf32>
    %374 = arith.mulf %373, %351 : vector<2x14x14xf32>
    %375 = arith.addf %349, %374 : vector<2x14x14xf32>
    %c0_62 = arith.constant 0 : index
    %c1_63 = arith.constant 1 : index
    %c1_64 = arith.constant 1 : index
    %c2_65 = arith.constant 2 : index
    %376 = vector.load %arg0[%c0_62, %c1_63, %c1_64, %c2_65] : memref<2x3x16x16xf32, #tpu.memory_space<vmem>>, vector<2x1x14x14xf32>
    %377 = vector.shape_cast %376 : vector<2x1x14x14xf32> to vector<2x14x14xf32>
    %c14 = arith.constant 14 : index
    %378 = memref.load %arg1[%c14] : memref<162xf32, #tpu.memory_space<smem>>
    %379 = vector.broadcast %378 : f32 to vector<2x14x14xf32>
    %380 = arith.mulf %379, %377 : vector<2x14x14xf32>
    %381 = arith.addf %355, %380 : vector<2x14x14xf32>
    %c41 = arith.constant 41 : index
    %382 = memref.load %arg1[%c41] : memref<162xf32, #tpu.memory_space<smem>>
    %383 = vector.broadcast %382 : f32 to vector<2x14x14xf32>
    %384 = arith.mulf %383, %377 : vector<2x14x14xf32>
    %385 = arith.addf %359, %384 : vector<2x14x14xf32>
    %c68 = arith.constant 68 : index
    %386 = memref.load %arg1[%c68] : memref<162xf32, #tpu.memory_space<smem>>
    %387 = vector.broadcast %386 : f32 to vector<2x14x14xf32>
    %388 = arith.mulf %387, %377 : vector<2x14x14xf32>
    %389 = arith.addf %363, %388 : vector<2x14x14xf32>
    %c95 = arith.constant 95 : index
    %390 = memref.load %arg1[%c95] : memref<162xf32, #tpu.memory_space<smem>>
    %391 = vector.broadcast %390 : f32 to vector<2x14x14xf32>
    %392 = arith.mulf %391, %377 : vector<2x14x14xf32>
    %393 = arith.addf %367, %392 : vector<2x14x14xf32>
    %c122 = arith.constant 122 : index
    %394 = memref.load %arg1[%c122] : memref<162xf32, #tpu.memory_space<smem>>
    %395 = vector.broadcast %394 : f32 to vector<2x14x14xf32>
    %396 = arith.mulf %395, %377 : vector<2x14x14xf32>
    %397 = arith.addf %371, %396 : vector<2x14x14xf32>
    %c149 = arith.constant 149 : index
    %398 = memref.load %arg1[%c149] : memref<162xf32, #tpu.memory_space<smem>>
    %399 = vector.broadcast %398 : f32 to vector<2x14x14xf32>
    %400 = arith.mulf %399, %377 : vector<2x14x14xf32>
    %401 = arith.addf %375, %400 : vector<2x14x14xf32>
    %c0_66 = arith.constant 0 : index
    %c1_67 = arith.constant 1 : index
    %c2_68 = arith.constant 2 : index
    %c0_69 = arith.constant 0 : index
    %402 = vector.load %arg0[%c0_66, %c1_67, %c2_68, %c0_69] : memref<2x3x16x16xf32, #tpu.memory_space<vmem>>, vector<2x1x14x14xf32>
    %403 = vector.shape_cast %402 : vector<2x1x14x14xf32> to vector<2x14x14xf32>
    %c15 = arith.constant 15 : index
    %404 = memref.load %arg1[%c15] : memref<162xf32, #tpu.memory_space<smem>>
    %405 = vector.broadcast %404 : f32 to vector<2x14x14xf32>
    %406 = arith.mulf %405, %403 : vector<2x14x14xf32>
    %407 = arith.addf %381, %406 : vector<2x14x14xf32>
    %c42 = arith.constant 42 : index
    %408 = memref.load %arg1[%c42] : memref<162xf32, #tpu.memory_space<smem>>
    %409 = vector.broadcast %408 : f32 to vector<2x14x14xf32>
    %410 = arith.mulf %409, %403 : vector<2x14x14xf32>
    %411 = arith.addf %385, %410 : vector<2x14x14xf32>
    %c69 = arith.constant 69 : index
    %412 = memref.load %arg1[%c69] : memref<162xf32, #tpu.memory_space<smem>>
    %413 = vector.broadcast %412 : f32 to vector<2x14x14xf32>
    %414 = arith.mulf %413, %403 : vector<2x14x14xf32>
    %415 = arith.addf %389, %414 : vector<2x14x14xf32>
    %c96 = arith.constant 96 : index
    %416 = memref.load %arg1[%c96] : memref<162xf32, #tpu.memory_space<smem>>
    %417 = vector.broadcast %416 : f32 to vector<2x14x14xf32>
    %418 = arith.mulf %417, %403 : vector<2x14x14xf32>
    %419 = arith.addf %393, %418 : vector<2x14x14xf32>
    %c123 = arith.constant 123 : index
    %420 = memref.load %arg1[%c123] : memref<162xf32, #tpu.memory_space<smem>>
    %421 = vector.broadcast %420 : f32 to vector<2x14x14xf32>
    %422 = arith.mulf %421, %403 : vector<2x14x14xf32>
    %423 = arith.addf %397, %422 : vector<2x14x14xf32>
    %c150 = arith.constant 150 : index
    %424 = memref.load %arg1[%c150] : memref<162xf32, #tpu.memory_space<smem>>
    %425 = vector.broadcast %424 : f32 to vector<2x14x14xf32>
    %426 = arith.mulf %425, %403 : vector<2x14x14xf32>
    %427 = arith.addf %401, %426 : vector<2x14x14xf32>
    %c0_70 = arith.constant 0 : index
    %c1_71 = arith.constant 1 : index
    %c2_72 = arith.constant 2 : index
    %c1_73 = arith.constant 1 : index
    %428 = vector.load %arg0[%c0_70, %c1_71, %c2_72, %c1_73] : memref<2x3x16x16xf32, #tpu.memory_space<vmem>>, vector<2x1x14x14xf32>
    %429 = vector.shape_cast %428 : vector<2x1x14x14xf32> to vector<2x14x14xf32>
    %c16 = arith.constant 16 : index
    %430 = memref.load %arg1[%c16] : memref<162xf32, #tpu.memory_space<smem>>
    %431 = vector.broadcast %430 : f32 to vector<2x14x14xf32>
    %432 = arith.mulf %431, %429 : vector<2x14x14xf32>
    %433 = arith.addf %407, %432 : vector<2x14x14xf32>
    %c43 = arith.constant 43 : index
    %434 = memref.load %arg1[%c43] : memref<162xf32, #tpu.memory_space<smem>>
    %435 = vector.broadcast %434 : f32 to vector<2x14x14xf32>
    %436 = arith.mulf %435, %429 : vector<2x14x14xf32>
    %437 = arith.addf %411, %436 : vector<2x14x14xf32>
    %c70 = arith.constant 70 : index
    %438 = memref.load %arg1[%c70] : memref<162xf32, #tpu.memory_space<smem>>
    %439 = vector.broadcast %438 : f32 to vector<2x14x14xf32>
    %440 = arith.mulf %439, %429 : vector<2x14x14xf32>
    %441 = arith.addf %415, %440 : vector<2x14x14xf32>
    %c97 = arith.constant 97 : index
    %442 = memref.load %arg1[%c97] : memref<162xf32, #tpu.memory_space<smem>>
    %443 = vector.broadcast %442 : f32 to vector<2x14x14xf32>
    %444 = arith.mulf %443, %429 : vector<2x14x14xf32>
    %445 = arith.addf %419, %444 : vector<2x14x14xf32>
    %c124 = arith.constant 124 : index
    %446 = memref.load %arg1[%c124] : memref<162xf32, #tpu.memory_space<smem>>
    %447 = vector.broadcast %446 : f32 to vector<2x14x14xf32>
    %448 = arith.mulf %447, %429 : vector<2x14x14xf32>
    %449 = arith.addf %423, %448 : vector<2x14x14xf32>
    %c151 = arith.constant 151 : index
    %450 = memref.load %arg1[%c151] : memref<162xf32, #tpu.memory_space<smem>>
    %451 = vector.broadcast %450 : f32 to vector<2x14x14xf32>
    %452 = arith.mulf %451, %429 : vector<2x14x14xf32>
    %453 = arith.addf %427, %452 : vector<2x14x14xf32>
    %c0_74 = arith.constant 0 : index
    %c1_75 = arith.constant 1 : index
    %c2_76 = arith.constant 2 : index
    %c2_77 = arith.constant 2 : index
    %454 = vector.load %arg0[%c0_74, %c1_75, %c2_76, %c2_77] : memref<2x3x16x16xf32, #tpu.memory_space<vmem>>, vector<2x1x14x14xf32>
    %455 = vector.shape_cast %454 : vector<2x1x14x14xf32> to vector<2x14x14xf32>
    %c17 = arith.constant 17 : index
    %456 = memref.load %arg1[%c17] : memref<162xf32, #tpu.memory_space<smem>>
    %457 = vector.broadcast %456 : f32 to vector<2x14x14xf32>
    %458 = arith.mulf %457, %455 : vector<2x14x14xf32>
    %459 = arith.addf %433, %458 : vector<2x14x14xf32>
    %c44 = arith.constant 44 : index
    %460 = memref.load %arg1[%c44] : memref<162xf32, #tpu.memory_space<smem>>
    %461 = vector.broadcast %460 : f32 to vector<2x14x14xf32>
    %462 = arith.mulf %461, %455 : vector<2x14x14xf32>
    %463 = arith.addf %437, %462 : vector<2x14x14xf32>
    %c71 = arith.constant 71 : index
    %464 = memref.load %arg1[%c71] : memref<162xf32, #tpu.memory_space<smem>>
    %465 = vector.broadcast %464 : f32 to vector<2x14x14xf32>
    %466 = arith.mulf %465, %455 : vector<2x14x14xf32>
    %467 = arith.addf %441, %466 : vector<2x14x14xf32>
    %c98 = arith.constant 98 : index
    %468 = memref.load %arg1[%c98] : memref<162xf32, #tpu.memory_space<smem>>
    %469 = vector.broadcast %468 : f32 to vector<2x14x14xf32>
    %470 = arith.mulf %469, %455 : vector<2x14x14xf32>
    %471 = arith.addf %445, %470 : vector<2x14x14xf32>
    %c125 = arith.constant 125 : index
    %472 = memref.load %arg1[%c125] : memref<162xf32, #tpu.memory_space<smem>>
    %473 = vector.broadcast %472 : f32 to vector<2x14x14xf32>
    %474 = arith.mulf %473, %455 : vector<2x14x14xf32>
    %475 = arith.addf %449, %474 : vector<2x14x14xf32>
    %c152 = arith.constant 152 : index
    %476 = memref.load %arg1[%c152] : memref<162xf32, #tpu.memory_space<smem>>
    %477 = vector.broadcast %476 : f32 to vector<2x14x14xf32>
    %478 = arith.mulf %477, %455 : vector<2x14x14xf32>
    %479 = arith.addf %453, %478 : vector<2x14x14xf32>
    %c0_78 = arith.constant 0 : index
    %c2_79 = arith.constant 2 : index
    %c0_80 = arith.constant 0 : index
    %c0_81 = arith.constant 0 : index
    %480 = vector.load %arg0[%c0_78, %c2_79, %c0_80, %c0_81] : memref<2x3x16x16xf32, #tpu.memory_space<vmem>>, vector<2x1x14x14xf32>
    %481 = vector.shape_cast %480 : vector<2x1x14x14xf32> to vector<2x14x14xf32>
    %c18 = arith.constant 18 : index
    %482 = memref.load %arg1[%c18] : memref<162xf32, #tpu.memory_space<smem>>
    %483 = vector.broadcast %482 : f32 to vector<2x14x14xf32>
    %484 = arith.mulf %483, %481 : vector<2x14x14xf32>
    %485 = arith.addf %459, %484 : vector<2x14x14xf32>
    %c45 = arith.constant 45 : index
    %486 = memref.load %arg1[%c45] : memref<162xf32, #tpu.memory_space<smem>>
    %487 = vector.broadcast %486 : f32 to vector<2x14x14xf32>
    %488 = arith.mulf %487, %481 : vector<2x14x14xf32>
    %489 = arith.addf %463, %488 : vector<2x14x14xf32>
    %c72 = arith.constant 72 : index
    %490 = memref.load %arg1[%c72] : memref<162xf32, #tpu.memory_space<smem>>
    %491 = vector.broadcast %490 : f32 to vector<2x14x14xf32>
    %492 = arith.mulf %491, %481 : vector<2x14x14xf32>
    %493 = arith.addf %467, %492 : vector<2x14x14xf32>
    %c99 = arith.constant 99 : index
    %494 = memref.load %arg1[%c99] : memref<162xf32, #tpu.memory_space<smem>>
    %495 = vector.broadcast %494 : f32 to vector<2x14x14xf32>
    %496 = arith.mulf %495, %481 : vector<2x14x14xf32>
    %497 = arith.addf %471, %496 : vector<2x14x14xf32>
    %c126 = arith.constant 126 : index
    %498 = memref.load %arg1[%c126] : memref<162xf32, #tpu.memory_space<smem>>
    %499 = vector.broadcast %498 : f32 to vector<2x14x14xf32>
    %500 = arith.mulf %499, %481 : vector<2x14x14xf32>
    %501 = arith.addf %475, %500 : vector<2x14x14xf32>
    %c153 = arith.constant 153 : index
    %502 = memref.load %arg1[%c153] : memref<162xf32, #tpu.memory_space<smem>>
    %503 = vector.broadcast %502 : f32 to vector<2x14x14xf32>
    %504 = arith.mulf %503, %481 : vector<2x14x14xf32>
    %505 = arith.addf %479, %504 : vector<2x14x14xf32>
    %c0_82 = arith.constant 0 : index
    %c2_83 = arith.constant 2 : index
    %c0_84 = arith.constant 0 : index
    %c1_85 = arith.constant 1 : index
    %506 = vector.load %arg0[%c0_82, %c2_83, %c0_84, %c1_85] : memref<2x3x16x16xf32, #tpu.memory_space<vmem>>, vector<2x1x14x14xf32>
    %507 = vector.shape_cast %506 : vector<2x1x14x14xf32> to vector<2x14x14xf32>
    %c19 = arith.constant 19 : index
    %508 = memref.load %arg1[%c19] : memref<162xf32, #tpu.memory_space<smem>>
    %509 = vector.broadcast %508 : f32 to vector<2x14x14xf32>
    %510 = arith.mulf %509, %507 : vector<2x14x14xf32>
    %511 = arith.addf %485, %510 : vector<2x14x14xf32>
    %c46 = arith.constant 46 : index
    %512 = memref.load %arg1[%c46] : memref<162xf32, #tpu.memory_space<smem>>
    %513 = vector.broadcast %512 : f32 to vector<2x14x14xf32>
    %514 = arith.mulf %513, %507 : vector<2x14x14xf32>
    %515 = arith.addf %489, %514 : vector<2x14x14xf32>
    %c73 = arith.constant 73 : index
    %516 = memref.load %arg1[%c73] : memref<162xf32, #tpu.memory_space<smem>>
    %517 = vector.broadcast %516 : f32 to vector<2x14x14xf32>
    %518 = arith.mulf %517, %507 : vector<2x14x14xf32>
    %519 = arith.addf %493, %518 : vector<2x14x14xf32>
    %c100 = arith.constant 100 : index
    %520 = memref.load %arg1[%c100] : memref<162xf32, #tpu.memory_space<smem>>
    %521 = vector.broadcast %520 : f32 to vector<2x14x14xf32>
    %522 = arith.mulf %521, %507 : vector<2x14x14xf32>
    %523 = arith.addf %497, %522 : vector<2x14x14xf32>
    %c127 = arith.constant 127 : index
    %524 = memref.load %arg1[%c127] : memref<162xf32, #tpu.memory_space<smem>>
    %525 = vector.broadcast %524 : f32 to vector<2x14x14xf32>
    %526 = arith.mulf %525, %507 : vector<2x14x14xf32>
    %527 = arith.addf %501, %526 : vector<2x14x14xf32>
    %c154 = arith.constant 154 : index
    %528 = memref.load %arg1[%c154] : memref<162xf32, #tpu.memory_space<smem>>
    %529 = vector.broadcast %528 : f32 to vector<2x14x14xf32>
    %530 = arith.mulf %529, %507 : vector<2x14x14xf32>
    %531 = arith.addf %505, %530 : vector<2x14x14xf32>
    %c0_86 = arith.constant 0 : index
    %c2_87 = arith.constant 2 : index
    %c0_88 = arith.constant 0 : index
    %c2_89 = arith.constant 2 : index
    %532 = vector.load %arg0[%c0_86, %c2_87, %c0_88, %c2_89] : memref<2x3x16x16xf32, #tpu.memory_space<vmem>>, vector<2x1x14x14xf32>
    %533 = vector.shape_cast %532 : vector<2x1x14x14xf32> to vector<2x14x14xf32>
    %c20 = arith.constant 20 : index
    %534 = memref.load %arg1[%c20] : memref<162xf32, #tpu.memory_space<smem>>
    %535 = vector.broadcast %534 : f32 to vector<2x14x14xf32>
    %536 = arith.mulf %535, %533 : vector<2x14x14xf32>
    %537 = arith.addf %511, %536 : vector<2x14x14xf32>
    %c47 = arith.constant 47 : index
    %538 = memref.load %arg1[%c47] : memref<162xf32, #tpu.memory_space<smem>>
    %539 = vector.broadcast %538 : f32 to vector<2x14x14xf32>
    %540 = arith.mulf %539, %533 : vector<2x14x14xf32>
    %541 = arith.addf %515, %540 : vector<2x14x14xf32>
    %c74 = arith.constant 74 : index
    %542 = memref.load %arg1[%c74] : memref<162xf32, #tpu.memory_space<smem>>
    %543 = vector.broadcast %542 : f32 to vector<2x14x14xf32>
    %544 = arith.mulf %543, %533 : vector<2x14x14xf32>
    %545 = arith.addf %519, %544 : vector<2x14x14xf32>
    %c101 = arith.constant 101 : index
    %546 = memref.load %arg1[%c101] : memref<162xf32, #tpu.memory_space<smem>>
    %547 = vector.broadcast %546 : f32 to vector<2x14x14xf32>
    %548 = arith.mulf %547, %533 : vector<2x14x14xf32>
    %549 = arith.addf %523, %548 : vector<2x14x14xf32>
    %c128 = arith.constant 128 : index
    %550 = memref.load %arg1[%c128] : memref<162xf32, #tpu.memory_space<smem>>
    %551 = vector.broadcast %550 : f32 to vector<2x14x14xf32>
    %552 = arith.mulf %551, %533 : vector<2x14x14xf32>
    %553 = arith.addf %527, %552 : vector<2x14x14xf32>
    %c155 = arith.constant 155 : index
    %554 = memref.load %arg1[%c155] : memref<162xf32, #tpu.memory_space<smem>>
    %555 = vector.broadcast %554 : f32 to vector<2x14x14xf32>
    %556 = arith.mulf %555, %533 : vector<2x14x14xf32>
    %557 = arith.addf %531, %556 : vector<2x14x14xf32>
    %c0_90 = arith.constant 0 : index
    %c2_91 = arith.constant 2 : index
    %c1_92 = arith.constant 1 : index
    %c0_93 = arith.constant 0 : index
    %558 = vector.load %arg0[%c0_90, %c2_91, %c1_92, %c0_93] : memref<2x3x16x16xf32, #tpu.memory_space<vmem>>, vector<2x1x14x14xf32>
    %559 = vector.shape_cast %558 : vector<2x1x14x14xf32> to vector<2x14x14xf32>
    %c21 = arith.constant 21 : index
    %560 = memref.load %arg1[%c21] : memref<162xf32, #tpu.memory_space<smem>>
    %561 = vector.broadcast %560 : f32 to vector<2x14x14xf32>
    %562 = arith.mulf %561, %559 : vector<2x14x14xf32>
    %563 = arith.addf %537, %562 : vector<2x14x14xf32>
    %c48 = arith.constant 48 : index
    %564 = memref.load %arg1[%c48] : memref<162xf32, #tpu.memory_space<smem>>
    %565 = vector.broadcast %564 : f32 to vector<2x14x14xf32>
    %566 = arith.mulf %565, %559 : vector<2x14x14xf32>
    %567 = arith.addf %541, %566 : vector<2x14x14xf32>
    %c75 = arith.constant 75 : index
    %568 = memref.load %arg1[%c75] : memref<162xf32, #tpu.memory_space<smem>>
    %569 = vector.broadcast %568 : f32 to vector<2x14x14xf32>
    %570 = arith.mulf %569, %559 : vector<2x14x14xf32>
    %571 = arith.addf %545, %570 : vector<2x14x14xf32>
    %c102 = arith.constant 102 : index
    %572 = memref.load %arg1[%c102] : memref<162xf32, #tpu.memory_space<smem>>
    %573 = vector.broadcast %572 : f32 to vector<2x14x14xf32>
    %574 = arith.mulf %573, %559 : vector<2x14x14xf32>
    %575 = arith.addf %549, %574 : vector<2x14x14xf32>
    %c129 = arith.constant 129 : index
    %576 = memref.load %arg1[%c129] : memref<162xf32, #tpu.memory_space<smem>>
    %577 = vector.broadcast %576 : f32 to vector<2x14x14xf32>
    %578 = arith.mulf %577, %559 : vector<2x14x14xf32>
    %579 = arith.addf %553, %578 : vector<2x14x14xf32>
    %c156 = arith.constant 156 : index
    %580 = memref.load %arg1[%c156] : memref<162xf32, #tpu.memory_space<smem>>
    %581 = vector.broadcast %580 : f32 to vector<2x14x14xf32>
    %582 = arith.mulf %581, %559 : vector<2x14x14xf32>
    %583 = arith.addf %557, %582 : vector<2x14x14xf32>
    %c0_94 = arith.constant 0 : index
    %c2_95 = arith.constant 2 : index
    %c1_96 = arith.constant 1 : index
    %c1_97 = arith.constant 1 : index
    %584 = vector.load %arg0[%c0_94, %c2_95, %c1_96, %c1_97] : memref<2x3x16x16xf32, #tpu.memory_space<vmem>>, vector<2x1x14x14xf32>
    %585 = vector.shape_cast %584 : vector<2x1x14x14xf32> to vector<2x14x14xf32>
    %c22 = arith.constant 22 : index
    %586 = memref.load %arg1[%c22] : memref<162xf32, #tpu.memory_space<smem>>
    %587 = vector.broadcast %586 : f32 to vector<2x14x14xf32>
    %588 = arith.mulf %587, %585 : vector<2x14x14xf32>
    %589 = arith.addf %563, %588 : vector<2x14x14xf32>
    %c49 = arith.constant 49 : index
    %590 = memref.load %arg1[%c49] : memref<162xf32, #tpu.memory_space<smem>>
    %591 = vector.broadcast %590 : f32 to vector<2x14x14xf32>
    %592 = arith.mulf %591, %585 : vector<2x14x14xf32>
    %593 = arith.addf %567, %592 : vector<2x14x14xf32>
    %c76 = arith.constant 76 : index
    %594 = memref.load %arg1[%c76] : memref<162xf32, #tpu.memory_space<smem>>
    %595 = vector.broadcast %594 : f32 to vector<2x14x14xf32>
    %596 = arith.mulf %595, %585 : vector<2x14x14xf32>
    %597 = arith.addf %571, %596 : vector<2x14x14xf32>
    %c103 = arith.constant 103 : index
    %598 = memref.load %arg1[%c103] : memref<162xf32, #tpu.memory_space<smem>>
    %599 = vector.broadcast %598 : f32 to vector<2x14x14xf32>
    %600 = arith.mulf %599, %585 : vector<2x14x14xf32>
    %601 = arith.addf %575, %600 : vector<2x14x14xf32>
    %c130 = arith.constant 130 : index
    %602 = memref.load %arg1[%c130] : memref<162xf32, #tpu.memory_space<smem>>
    %603 = vector.broadcast %602 : f32 to vector<2x14x14xf32>
    %604 = arith.mulf %603, %585 : vector<2x14x14xf32>
    %605 = arith.addf %579, %604 : vector<2x14x14xf32>
    %c157 = arith.constant 157 : index
    %606 = memref.load %arg1[%c157] : memref<162xf32, #tpu.memory_space<smem>>
    %607 = vector.broadcast %606 : f32 to vector<2x14x14xf32>
    %608 = arith.mulf %607, %585 : vector<2x14x14xf32>
    %609 = arith.addf %583, %608 : vector<2x14x14xf32>
    %c0_98 = arith.constant 0 : index
    %c2_99 = arith.constant 2 : index
    %c1_100 = arith.constant 1 : index
    %c2_101 = arith.constant 2 : index
    %610 = vector.load %arg0[%c0_98, %c2_99, %c1_100, %c2_101] : memref<2x3x16x16xf32, #tpu.memory_space<vmem>>, vector<2x1x14x14xf32>
    %611 = vector.shape_cast %610 : vector<2x1x14x14xf32> to vector<2x14x14xf32>
    %c23 = arith.constant 23 : index
    %612 = memref.load %arg1[%c23] : memref<162xf32, #tpu.memory_space<smem>>
    %613 = vector.broadcast %612 : f32 to vector<2x14x14xf32>
    %614 = arith.mulf %613, %611 : vector<2x14x14xf32>
    %615 = arith.addf %589, %614 : vector<2x14x14xf32>
    %c50 = arith.constant 50 : index
    %616 = memref.load %arg1[%c50] : memref<162xf32, #tpu.memory_space<smem>>
    %617 = vector.broadcast %616 : f32 to vector<2x14x14xf32>
    %618 = arith.mulf %617, %611 : vector<2x14x14xf32>
    %619 = arith.addf %593, %618 : vector<2x14x14xf32>
    %c77 = arith.constant 77 : index
    %620 = memref.load %arg1[%c77] : memref<162xf32, #tpu.memory_space<smem>>
    %621 = vector.broadcast %620 : f32 to vector<2x14x14xf32>
    %622 = arith.mulf %621, %611 : vector<2x14x14xf32>
    %623 = arith.addf %597, %622 : vector<2x14x14xf32>
    %c104 = arith.constant 104 : index
    %624 = memref.load %arg1[%c104] : memref<162xf32, #tpu.memory_space<smem>>
    %625 = vector.broadcast %624 : f32 to vector<2x14x14xf32>
    %626 = arith.mulf %625, %611 : vector<2x14x14xf32>
    %627 = arith.addf %601, %626 : vector<2x14x14xf32>
    %c131 = arith.constant 131 : index
    %628 = memref.load %arg1[%c131] : memref<162xf32, #tpu.memory_space<smem>>
    %629 = vector.broadcast %628 : f32 to vector<2x14x14xf32>
    %630 = arith.mulf %629, %611 : vector<2x14x14xf32>
    %631 = arith.addf %605, %630 : vector<2x14x14xf32>
    %c158 = arith.constant 158 : index
    %632 = memref.load %arg1[%c158] : memref<162xf32, #tpu.memory_space<smem>>
    %633 = vector.broadcast %632 : f32 to vector<2x14x14xf32>
    %634 = arith.mulf %633, %611 : vector<2x14x14xf32>
    %635 = arith.addf %609, %634 : vector<2x14x14xf32>
    %c0_102 = arith.constant 0 : index
    %c2_103 = arith.constant 2 : index
    %c2_104 = arith.constant 2 : index
    %c0_105 = arith.constant 0 : index
    %636 = vector.load %arg0[%c0_102, %c2_103, %c2_104, %c0_105] : memref<2x3x16x16xf32, #tpu.memory_space<vmem>>, vector<2x1x14x14xf32>
    %637 = vector.shape_cast %636 : vector<2x1x14x14xf32> to vector<2x14x14xf32>
    %c24 = arith.constant 24 : index
    %638 = memref.load %arg1[%c24] : memref<162xf32, #tpu.memory_space<smem>>
    %639 = vector.broadcast %638 : f32 to vector<2x14x14xf32>
    %640 = arith.mulf %639, %637 : vector<2x14x14xf32>
    %641 = arith.addf %615, %640 : vector<2x14x14xf32>
    %c51 = arith.constant 51 : index
    %642 = memref.load %arg1[%c51] : memref<162xf32, #tpu.memory_space<smem>>
    %643 = vector.broadcast %642 : f32 to vector<2x14x14xf32>
    %644 = arith.mulf %643, %637 : vector<2x14x14xf32>
    %645 = arith.addf %619, %644 : vector<2x14x14xf32>
    %c78 = arith.constant 78 : index
    %646 = memref.load %arg1[%c78] : memref<162xf32, #tpu.memory_space<smem>>
    %647 = vector.broadcast %646 : f32 to vector<2x14x14xf32>
    %648 = arith.mulf %647, %637 : vector<2x14x14xf32>
    %649 = arith.addf %623, %648 : vector<2x14x14xf32>
    %c105 = arith.constant 105 : index
    %650 = memref.load %arg1[%c105] : memref<162xf32, #tpu.memory_space<smem>>
    %651 = vector.broadcast %650 : f32 to vector<2x14x14xf32>
    %652 = arith.mulf %651, %637 : vector<2x14x14xf32>
    %653 = arith.addf %627, %652 : vector<2x14x14xf32>
    %c132 = arith.constant 132 : index
    %654 = memref.load %arg1[%c132] : memref<162xf32, #tpu.memory_space<smem>>
    %655 = vector.broadcast %654 : f32 to vector<2x14x14xf32>
    %656 = arith.mulf %655, %637 : vector<2x14x14xf32>
    %657 = arith.addf %631, %656 : vector<2x14x14xf32>
    %c159 = arith.constant 159 : index
    %658 = memref.load %arg1[%c159] : memref<162xf32, #tpu.memory_space<smem>>
    %659 = vector.broadcast %658 : f32 to vector<2x14x14xf32>
    %660 = arith.mulf %659, %637 : vector<2x14x14xf32>
    %661 = arith.addf %635, %660 : vector<2x14x14xf32>
    %c0_106 = arith.constant 0 : index
    %c2_107 = arith.constant 2 : index
    %c2_108 = arith.constant 2 : index
    %c1_109 = arith.constant 1 : index
    %662 = vector.load %arg0[%c0_106, %c2_107, %c2_108, %c1_109] : memref<2x3x16x16xf32, #tpu.memory_space<vmem>>, vector<2x1x14x14xf32>
    %663 = vector.shape_cast %662 : vector<2x1x14x14xf32> to vector<2x14x14xf32>
    %c25 = arith.constant 25 : index
    %664 = memref.load %arg1[%c25] : memref<162xf32, #tpu.memory_space<smem>>
    %665 = vector.broadcast %664 : f32 to vector<2x14x14xf32>
    %666 = arith.mulf %665, %663 : vector<2x14x14xf32>
    %667 = arith.addf %641, %666 : vector<2x14x14xf32>
    %c52 = arith.constant 52 : index
    %668 = memref.load %arg1[%c52] : memref<162xf32, #tpu.memory_space<smem>>
    %669 = vector.broadcast %668 : f32 to vector<2x14x14xf32>
    %670 = arith.mulf %669, %663 : vector<2x14x14xf32>
    %671 = arith.addf %645, %670 : vector<2x14x14xf32>
    %c79 = arith.constant 79 : index
    %672 = memref.load %arg1[%c79] : memref<162xf32, #tpu.memory_space<smem>>
    %673 = vector.broadcast %672 : f32 to vector<2x14x14xf32>
    %674 = arith.mulf %673, %663 : vector<2x14x14xf32>
    %675 = arith.addf %649, %674 : vector<2x14x14xf32>
    %c106 = arith.constant 106 : index
    %676 = memref.load %arg1[%c106] : memref<162xf32, #tpu.memory_space<smem>>
    %677 = vector.broadcast %676 : f32 to vector<2x14x14xf32>
    %678 = arith.mulf %677, %663 : vector<2x14x14xf32>
    %679 = arith.addf %653, %678 : vector<2x14x14xf32>
    %c133 = arith.constant 133 : index
    %680 = memref.load %arg1[%c133] : memref<162xf32, #tpu.memory_space<smem>>
    %681 = vector.broadcast %680 : f32 to vector<2x14x14xf32>
    %682 = arith.mulf %681, %663 : vector<2x14x14xf32>
    %683 = arith.addf %657, %682 : vector<2x14x14xf32>
    %c160 = arith.constant 160 : index
    %684 = memref.load %arg1[%c160] : memref<162xf32, #tpu.memory_space<smem>>
    %685 = vector.broadcast %684 : f32 to vector<2x14x14xf32>
    %686 = arith.mulf %685, %663 : vector<2x14x14xf32>
    %687 = arith.addf %661, %686 : vector<2x14x14xf32>
    %c0_110 = arith.constant 0 : index
    %c2_111 = arith.constant 2 : index
    %c2_112 = arith.constant 2 : index
    %c2_113 = arith.constant 2 : index
    %688 = vector.load %arg0[%c0_110, %c2_111, %c2_112, %c2_113] : memref<2x3x16x16xf32, #tpu.memory_space<vmem>>, vector<2x1x14x14xf32>
    %689 = vector.shape_cast %688 : vector<2x1x14x14xf32> to vector<2x14x14xf32>
    %c26 = arith.constant 26 : index
    %690 = memref.load %arg1[%c26] : memref<162xf32, #tpu.memory_space<smem>>
    %691 = vector.broadcast %690 : f32 to vector<2x14x14xf32>
    %692 = arith.mulf %691, %689 : vector<2x14x14xf32>
    %693 = arith.addf %667, %692 : vector<2x14x14xf32>
    %c53 = arith.constant 53 : index
    %694 = memref.load %arg1[%c53] : memref<162xf32, #tpu.memory_space<smem>>
    %695 = vector.broadcast %694 : f32 to vector<2x14x14xf32>
    %696 = arith.mulf %695, %689 : vector<2x14x14xf32>
    %697 = arith.addf %671, %696 : vector<2x14x14xf32>
    %c80 = arith.constant 80 : index
    %698 = memref.load %arg1[%c80] : memref<162xf32, #tpu.memory_space<smem>>
    %699 = vector.broadcast %698 : f32 to vector<2x14x14xf32>
    %700 = arith.mulf %699, %689 : vector<2x14x14xf32>
    %701 = arith.addf %675, %700 : vector<2x14x14xf32>
    %c107 = arith.constant 107 : index
    %702 = memref.load %arg1[%c107] : memref<162xf32, #tpu.memory_space<smem>>
    %703 = vector.broadcast %702 : f32 to vector<2x14x14xf32>
    %704 = arith.mulf %703, %689 : vector<2x14x14xf32>
    %705 = arith.addf %679, %704 : vector<2x14x14xf32>
    %c134 = arith.constant 134 : index
    %706 = memref.load %arg1[%c134] : memref<162xf32, #tpu.memory_space<smem>>
    %707 = vector.broadcast %706 : f32 to vector<2x14x14xf32>
    %708 = arith.mulf %707, %689 : vector<2x14x14xf32>
    %709 = arith.addf %683, %708 : vector<2x14x14xf32>
    %c161 = arith.constant 161 : index
    %710 = memref.load %arg1[%c161] : memref<162xf32, #tpu.memory_space<smem>>
    %711 = vector.broadcast %710 : f32 to vector<2x14x14xf32>
    %712 = arith.mulf %711, %689 : vector<2x14x14xf32>
    %713 = arith.addf %687, %712 : vector<2x14x14xf32>
    %c0_114 = arith.constant 0 : index
    %c0_115 = arith.constant 0 : index
    %c0_116 = arith.constant 0 : index
    %c0_117 = arith.constant 0 : index
    %714 = vector.load %arg3[%c0_114, %c0_115, %c0_116, %c0_117] : memref<2x6x14x14xf32, #tpu.memory_space<vmem>>, vector<2x1x14x14xf32>
    %715 = vector.shape_cast %714 : vector<2x1x14x14xf32> to vector<2x14x14xf32>
    %716 = vector.shape_cast %693 : vector<2x14x14xf32> to vector<2x1x14x14xf32>
    tpu.vector_store %arg3[%c0_114, %c0_115, %c0_116, %c0_117], %716 {strides = array<i32>} : memref<2x6x14x14xf32, #tpu.memory_space<vmem>>, vector<2x1x14x14xf32>,
    %c0_118 = arith.constant 0 : index
    %c1_119 = arith.constant 1 : index
    %c0_120 = arith.constant 0 : index
    %c0_121 = arith.constant 0 : index
    %717 = vector.load %arg3[%c0_118, %c1_119, %c0_120, %c0_121] : memref<2x6x14x14xf32, #tpu.memory_space<vmem>>, vector<2x1x14x14xf32>
    %718 = vector.shape_cast %717 : vector<2x1x14x14xf32> to vector<2x14x14xf32>
    %719 = vector.shape_cast %697 : vector<2x14x14xf32> to vector<2x1x14x14xf32>
    tpu.vector_store %arg3[%c0_118, %c1_119, %c0_120, %c0_121], %719 {strides = array<i32>} : memref<2x6x14x14xf32, #tpu.memory_space<vmem>>, vector<2x1x14x14xf32>,
    %c0_122 = arith.constant 0 : index
    %c2_123 = arith.constant 2 : index
    %c0_124 = arith.constant 0 : index
    %c0_125 = arith.constant 0 : index
    %720 = vector.load %arg3[%c0_122, %c2_123, %c0_124, %c0_125] : memref<2x6x14x14xf32, #tpu.memory_space<vmem>>, vector<2x1x14x14xf32>
    %721 = vector.shape_cast %720 : vector<2x1x14x14xf32> to vector<2x14x14xf32>
    %722 = vector.shape_cast %701 : vector<2x14x14xf32> to vector<2x1x14x14xf32>
    tpu.vector_store %arg3[%c0_122, %c2_123, %c0_124, %c0_125], %722 {strides = array<i32>} : memref<2x6x14x14xf32, #tpu.memory_space<vmem>>, vector<2x1x14x14xf32>,
    %c0_126 = arith.constant 0 : index
    %c3_127 = arith.constant 3 : index
    %c0_128 = arith.constant 0 : index
    %c0_129 = arith.constant 0 : index
    %723 = vector.load %arg3[%c0_126, %c3_127, %c0_128, %c0_129] : memref<2x6x14x14xf32, #tpu.memory_space<vmem>>, vector<2x1x14x14xf32>
    %724 = vector.shape_cast %723 : vector<2x1x14x14xf32> to vector<2x14x14xf32>
    %725 = vector.shape_cast %705 : vector<2x14x14xf32> to vector<2x1x14x14xf32>
    tpu.vector_store %arg3[%c0_126, %c3_127, %c0_128, %c0_129], %725 {strides = array<i32>} : memref<2x6x14x14xf32, #tpu.memory_space<vmem>>, vector<2x1x14x14xf32>,
    %c0_130 = arith.constant 0 : index
    %c4_131 = arith.constant 4 : index
    %c0_132 = arith.constant 0 : index
    %c0_133 = arith.constant 0 : index
    %726 = vector.load %arg3[%c0_130, %c4_131, %c0_132, %c0_133] : memref<2x6x14x14xf32, #tpu.memory_space<vmem>>, vector<2x1x14x14xf32>
    %727 = vector.shape_cast %726 : vector<2x1x14x14xf32> to vector<2x14x14xf32>
    %728 = vector.shape_cast %709 : vector<2x14x14xf32> to vector<2x1x14x14xf32>
    tpu.vector_store %arg3[%c0_130, %c4_131, %c0_132, %c0_133], %728 {strides = array<i32>} : memref<2x6x14x14xf32, #tpu.memory_space<vmem>>, vector<2x1x14x14xf32>,
    %c0_134 = arith.constant 0 : index
    %c5_135 = arith.constant 5 : index
    %c0_136 = arith.constant 0 : index
    %c0_137 = arith.constant 0 : index
    %729 = vector.load %arg3[%c0_134, %c5_135, %c0_136, %c0_137] : memref<2x6x14x14xf32, #tpu.memory_space<vmem>>, vector<2x1x14x14xf32>
    %730 = vector.shape_cast %729 : vector<2x1x14x14xf32> to vector<2x14x14xf32>
    %731 = vector.shape_cast %713 : vector<2x14x14xf32> to vector<2x1x14x14xf32>
    tpu.vector_store %arg3[%c0_134, %c5_135, %c0_136, %c0_137], %731 {strides = array<i32>} : memref<2x6x14x14xf32, #tpu.memory_space<vmem>>, vector<2x1x14x14xf32>,
    return
  }
}

</mosaic_0001>

<bundles_post_ra>
// kernel: tpu_custom_call.1
= control target key start
LH: loop header
LB: loop body
LE: loop exit
PB: predicated region body
PF: predicated region fallthrough
CT: control target
= control target key end

     0   :  { %8 = vsyncpa [#allocation3], 0  ;;  %s7532_s0 = inlined_call_operand.hbm [shape: f32[2,3,16,16], index: 0, kind: input, shape index: {}]   ;;  %s7533_s1 = inlined_call_operand.hbm [shape: f32[162], index: 1, kind: input, shape index: {}]   ;;  %s7534_s2 = inlined_call_operand.vmem [shape: f32[6], index: 2, kind: input, shape index: {}]   ;;  %s7535_s3 = inlined_call_operand.vmem [shape: f32[2,6,14,14], index: 3, kind: output, shape index: {}]  }
   0x1   :  { %9 = vsyncpa [#allocation4], 0 }
   0x2   :  { %10 = vsyncpa [#allocation5], 0  ;;  %s3756_s12 = smov [#allocation2]  }
   0x3   :  { %s16_s13 = sshll.u32 %s3756_s12, 4  ;;  %s17_s13 = int_to_ptr.vmem [resolvable:$true] %s16_s13 }
   0x4   :  { %s3718_s14 = scalar_lea.vmem %s17_s13, 1536  ;;  %p3723_p1 = scmp.lt.s32.totalorder %s17_s13, %s17_s13 }
   0x5   :  { %p3719_p0 = scmp.ne.s32.totalorder %s17_s13, %s3718_s14  ;;  %p3724_p2 = scmp.lt.s32.totalorder %s3718_s14, %s3718_s14 }
   0x7   :  { %p3725_p3 = por %p3724_p2, %p3723_p1 }
   0x9   :  { %p3726_p4 = pnand %p3725_p3, %p3719_p0 }
   0xb   :  { %3729 = shalt.err (!%p3726_p4)
}
   0xc   :  { %s3757_s15 = smov 128   ;;  %s3758_s16 = smov 8  }
   0xd   :  { %22 = dma.hbm_to_vmem [thread:$0]  %s7532_s0, 1536, %s17_s13, [#allocation3], %s3757_s15, %s3757_s15, %s3758_s16  }
   0xe   :  { %s3759_s19 = smov [#allocation6]   ;;  %s37_s24 = sshll.u32 %s7534_s2, 4  ;;  %s38_s24 = int_to_ptr.vmem [resolvable:$true] %s37_s24 }
   0xf   :  { %30 = dma.hbm_to_smem %s7533_s1, 32, %s3759_s19, [#allocation4]  }
  0x10   :  { %s3738_s25 = scalar_lea.vmem %s38_s24, 16  ;;  %p3743_p6 = scmp.lt.s32.totalorder %s38_s24, %s38_s24 }
  0x11   :  { %p3739_p5 = scmp.ne.s32.totalorder %s38_s24, %s3738_s25  ;;  %p3744_p7 = scmp.lt.s32.totalorder %s3738_s25, %s3738_s25 }
  0x13   :  { %p3745_p8 = por %p3744_p7, %p3743_p6 }
  0x15   :  { %p3746_p9 = pnand %p3745_p8, %p3739_p5 }
  0x17   :  { %3749 = shalt.err (!%p3746_p9)
}
  0x18   :  { %s3760_s26 = smov [#allocation7]  }
  0x19   :  { %40 = dma.vmem_to_smem %s38_s24, 16, %s3760_s26, [#allocation5]  }
  0x1a   :  { %3750 = dma.done.wait [#allocation3], 1536  }
  0x1b   :  { %3751 = vsyncadd [#allocation3], 4294965760 }
  0x1c   :  { %3752 = dma.done.wait [#allocation4], 32  }
  0x1d   :  { %3753 = vsyncadd [#allocation4], 4294967264 }
  0x1e   :  { %3754 = dma.done.wait [#allocation5], 16  }
  0x1f   :  { %3755 = vsyncadd [#allocation5], 4294967280 }
  0x20   :  { %50 = sfence }
  0x21   :  { %s3497_s0 = sld [smem:[#allocation6 + $0x1]]  ;;  %v3792_v0 = vld [vmem:[#allocation2 + $0x30] sm:$0xff]  ;;  %v3794_v1 = vld [vmem:[#allocation2] sm:$0xff]  ;;  %v3796_v3 = vld [vmem:[#allocation2 + $0x38] sm:$0x3f]  ;;  %s3761_s2 = smov 127  }
  0x22   :  { %s3498_s1 = sld [smem:[#allocation6 + $0x1c]]  ;;  %v3798_v4 = vld [vmem:[#allocation2 + $0x8] sm:$0x3f]  ;;  %s3762_s6 = smov 126   ;;  %vm3451_vm0 = vcmask 111616   ;;  %vm3449_vm1 = vcmask 113664  }
  0x23   :  { %s3499_s27 = sld [smem:[#allocation6 + $0x37]] }
  0x24   :  { %s3500_s28 = sld [smem:[#allocation6 + $0x52]] }
  0x25   :  { %s3501_s29 = sld [smem:[#allocation6 + $0x6d]] }
  0x26   :  { %s3502_s30 = sld [smem:[#allocation6 + $0x88]] }
  0x27   :  { %v128_v2 = vstv %s3497_s0  ;;  %s3503_s4 = sld [smem:[#allocation6 + $0x2]] }
  0x28   :  { %v131_v5 = vmul.f32 %v128_v2, %v3792_v0  ;;  %v129_v6 = vmul.f32 %v128_v2, %v3794_v1  ;;  %v132_v7 = vmul.f32 %v128_v2, %v3796_v3  ;;  %v130_v8 = vmul.f32 %v128_v2, %v3798_v4  ;;  %s3504_s5 = sld [smem:[#allocation6 + $0x1d]]  ;;  %v3894_v2 = vld [vmem:[#allocation2 + $0x9] sm:$0x3f] }
  0x29   :  { %v154_v9 = vstv %s3498_s1  ;;  %v180_v14 = vstv %s3499_s27  ;;  %s3505_s7 = sld [smem:[#allocation6 + $0x38]] }
  0x2a   :  { %141 = vrot.lane.b32.xlu1 %v131_v5, %s3761_s2  ;;  %137 = vrot.lane.b32.xlu0 %v129_v6, %s3761_s2  ;;  %v156_v10 = vmul.f32 %v154_v9, %v3798_v4  ;;  %v155_v11 = vmul.f32 %v154_v9, %v3794_v1  ;;  %v158_v12 = vmul.f32 %v154_v9, %v3796_v3  ;;  %v206_v19 = vstv %s3500_s28  ;;  %s3506_s8 = sld [smem:[#allocation6 + $0x53]]  ;;  %v3896_v6 = vld [vmem:[#allocation2 + $0x1] sm:$0xff] }
  0x2b   :  { %v157_v13 = vmul.f32 %v154_v9, %v3792_v0  ;;  %v182_v15 = vmul.f32 %v180_v14, %v3798_v4  ;;  %v181_v16 = vmul.f32 %v180_v14, %v3794_v1  ;;  %v184_v17 = vmul.f32 %v180_v14, %v3796_v3  ;;  %s3507_s9 = sld [smem:[#allocation6 + $0x6e]]  ;;  %v3902_v9 = vld [vmem:[#allocation2 + $0x39] sm:$0x3f] }
  0x2c   :  { %v183_v18 = vmul.f32 %v180_v14, %v3792_v0  ;;  %v208_v20 = vmul.f32 %v206_v19, %v3798_v4  ;;  %v207_v21 = vmul.f32 %v206_v19, %v3794_v1  ;;  %v210_v22 = vmul.f32 %v206_v19, %v3796_v3  ;;  %s3508_s10 = sld [smem:[#allocation6 + $0x89]] }
  0x2d   :  { %v209_v23 = vmul.f32 %v206_v19, %v3792_v0  ;;  %v232_v24 = vstv %s3501_s29  ;;  %v258_v29 = vstv %s3502_s30  ;;  %v284_v34 = vstv %s3503_s4  ;;  %s3515_s11 = sld [smem:[#allocation6 + $0x4]] }
  0x2e   :  { %143 = vrot.lane.b32.xlu1 %v132_v7, %s3761_s2  ;;  %139 = vrot.lane.b32.xlu0 %v130_v8, %s3761_s2  ;;  %v234_v25 = vmul.f32 %v232_v24, %v3798_v4  ;;  %v233_v26 = vmul.f32 %v232_v24, %v3794_v1  ;;  %v236_v27 = vmul.f32 %v232_v24, %v3796_v3  ;;  %v310_v39 = vstv %s3504_s5  ;;  %s3516_s12 = sld [smem:[#allocation6 + $0x1f]] }
  0x2f   :  { %v235_v28 = vmul.f32 %v232_v24, %v3792_v0  ;;  %v260_v30 = vmul.f32 %v258_v29, %v3798_v4  ;;  %v259_v31 = vmul.f32 %v258_v29, %v3794_v1  ;;  %v262_v32 = vmul.f32 %v258_v29, %v3796_v3  ;;  %s3517_s13 = sld [smem:[#allocation6 + $0x3a]] }
  0x30   :  { %v261_v33 = vmul.f32 %v258_v29, %v3792_v0  ;;  %v286_v35 = vmul.f32 %v284_v34, %v3798_v4  ;;  %v285_v36 = vmul.f32 %v284_v34, %v3794_v1  ;;  %v288_v37 = vmul.f32 %v284_v34, %v3796_v3  ;;  %s3518_s14 = sld [smem:[#allocation6 + $0x55]] }
  0x31   :  { %v287_v38 = vmul.f32 %v284_v34, %v3792_v0  ;;  %v312_v40 = vmul.f32 %v310_v39, %v3798_v4  ;;  %v311_v41 = vmul.f32 %v310_v39, %v3794_v1  ;;  %v314_v42 = vmul.f32 %v310_v39, %v3796_v3  ;;  %s3519_s15 = sld [smem:[#allocation6 + $0x70]] }
  0x32   :  { %165 = vrot.lane.b32.xlu1 %v156_v10, %s3761_s2  ;;  %163 = vrot.lane.b32.xlu0 %v155_v11, %s3761_s2  ;;  %v313_v43 = vmul.f32 %v310_v39, %v3792_v0  ;;  %v336_v44 = vstv %s3505_s7  ;;  %v362_v49 = vstv %s3506_s8  ;;  %v3904_v10 = vld [vmem:[#allocation2 + $0x31] sm:$0xff]  ;;  %s3520_s16 = sld [smem:[#allocation6 + $0x8b]] }
  0x33   :  { %v338_v45 = vmul.f32 %v336_v44, %v3798_v4  ;;  %v337_v46 = vmul.f32 %v336_v44, %v3794_v1  ;;  %v340_v47 = vmul.f32 %v336_v44, %v3796_v3  ;;  %v339_v48 = vmul.f32 %v336_v44, %v3792_v0  ;;  %s3521_s17 = sld [smem:[#allocation6 + $0x5]] }
  0x34   :  { %v364_v50 = vmul.f32 %v362_v49, %v3798_v4  ;;  %v363_v51 = vmul.f32 %v362_v49, %v3794_v1  ;;  %v366_v52 = vmul.f32 %v362_v49, %v3796_v3  ;;  %v365_v53 = vmul.f32 %v362_v49, %v3792_v0  ;;  %s3522_s18 = sld [smem:[#allocation6 + $0x20]] }
  0x35   :  { %v388_v54 = vstv %s3507_s9  ;;  %v414_v59 = vstv %s3508_s10  ;;  %v504_v5 = vstv %s3515_s11  ;;  %s67_s19 = sld [smem:[#allocation6]] }
  0x36   :  { %169 = vrot.lane.b32.xlu1 %v158_v12, %s3761_s2  ;;  %167 = vrot.lane.b32.xlu0 %v157_v13, %s3761_s2  ;;  %v390_v55 = vmul.f32 %v388_v54, %v3798_v4  ;;  %v389_v56 = vmul.f32 %v388_v54, %v3794_v1  ;;  %v392_v57 = vmul.f32 %v388_v54, %v3796_v3  ;;  %v530_v12 = vstv %s3516_s12  ;;  %s3523_s20 = sld [smem:[#allocation6 + $0x3b]] }
  0x37   :  { %v391_v58 = vmul.f32 %v388_v54, %v3792_v0  ;;  %v416_v60 = vmul.f32 %v414_v59, %v3798_v4  ;;  %v415_v61 = vmul.f32 %v414_v59, %v3794_v1  ;;  %v418_v62 = vmul.f32 %v414_v59, %v3796_v3  ;;  %s51_s21 = sld [smem:[#allocation7]] }
  0x38   :  { %v417_v63 = vmul.f32 %v414_v59, %v3792_v0  ;;  %v506_v7 = vmul.f32 %v504_v5, %v3894_v2  ;;  %v505_v8 = vmul.f32 %v504_v5, %v3896_v6  ;;  %v508_v3 = vmul.f32 %v504_v5, %v3902_v9  ;;  %s3492_s22 = sld [smem:[#allocation6 + $0x1b]] }
  0x39   :  { %v507_v11 = vmul.f32 %v504_v5, %v3904_v10  ;;  %v532_v13 = vmul.f32 %v530_v12, %v3894_v2  ;;  %v531_v14 = vmul.f32 %v530_v12, %v3896_v6  ;;  %v660_v49 = vstv %s3521_s17  ;;  %s3509_s23 = sld [smem:[#allocation6 + $0x3]] }
  0x3a   :  { %191 = vrot.lane.b32.xlu1 %v182_v15, %s3761_s2  ;;  %189 = vrot.lane.b32.xlu0 %v181_v16, %s3761_s2  ;;  %v534_v15 = vmul.f32 %v530_v12, %v3902_v9  ;;  %v533_v16 = vmul.f32 %v530_v12, %v3904_v10  ;;  %s3487_s24 = sld [smem:[#allocation7 + $0x1]] }
  0x3b   :  { %s3524_s25 = sld [smem:[#allocation6 + $0x56]] }
  0x3c   :  { %s4022_s26 = sld [smem:[#allocation6 + $0x36]] }
  0x3d   :  { %s4030_s0 = sld [smem:[#allocation6 + $0x1e]] }
  0x3e   :  { %195 = vrot.lane.b32.xlu1 %v184_v17, %s3761_s2  ;;  %193 = vrot.lane.b32.xlu0 %v183_v18, %s3761_s2  ;;  %v556_v17 = vstv %s3517_s13  ;;  %s4045_s1 = sld [smem:[#allocation7 + $0x2]] }
  0x3f   :  { %v558_v18 = vmul.f32 %v556_v17, %v3894_v2  ;;  %v557_v19 = vmul.f32 %v556_v17, %v3896_v6  ;;  %s4053_s27 = sld [smem:[#allocation6 + $0x71]] }
  0x40   :  { %s4066_s28 = sld [smem:[#allocation6 + $0x51]] }
  0x41   :  { %s4082_s29 = sld [smem:[#allocation6 + $0x39]] }
  0x42   :  { %217 = vrot.lane.b32.xlu1 %v208_v20, %s3761_s2  ;;  %215 = vrot.lane.b32.xlu0 %v207_v21, %s3761_s2  ;;  %v560_v20 = vmul.f32 %v556_v17, %v3902_v9  ;;  %v559_v21 = vmul.f32 %v556_v17, %v3904_v10  ;;  %s4095_s30 = sld [smem:[#allocation7 + $0x3]] }
  0x43   :  { %s4107_s4 = sld [smem:[#allocation6 + $0x8c]] }
  0x44   :  { %s4118_s5 = sld [smem:[#allocation6 + $0x6c]] }
  0x45   :  { %s4134_s7 = sld [smem:[#allocation6 + $0x54]] }
  0x46   :  { %221 = vrot.lane.b32.xlu1 %v210_v22, %s3761_s2  ;;  %219 = vrot.lane.b32.xlu0 %v209_v23, %s3761_s2  ;;  %v582_v22 = vstv %s3518_s14  ;;  %s4147_s8 = sld [smem:[#allocation7 + $0x4]] }
  0x47   :  { %v586_v29 = vmul.f32 %v582_v22, %v3902_v9  ;;  %s4159_s9 = sld [smem:[#allocation6 + $0x7]] }
  0x48   :  { %s4170_s10 = sld [smem:[#allocation6 + $0x87]] }
  0x49   :  { %s4186_s11 = sld [smem:[#allocation6 + $0x6f]] }
  0x4a   :  { %243 = vrot.lane.b32.xlu1 %v234_v25, %s3761_s2  ;;  %241 = vrot.lane.b32.xlu0 %v233_v26, %s3761_s2  ;;  %v584_v25 = vmul.f32 %v582_v22, %v3894_v2  ;;  %v583_v26 = vmul.f32 %v582_v22, %v3896_v6  ;;  %s4199_s12 = sld [smem:[#allocation7 + $0x5]] }
  0x4b   :  { %s4215_s13 = sld [smem:[#allocation6 + $0x22]] }
  0x4c   :  { %s4244_s14 = sld [smem:[#allocation6 + $0x8a]] }
  0x4d   :  { %s3537_s17 = sld [smem:[#allocation6 + $0x73]] }
  0x4e   :  { %247 = vrot.lane.b32.xlu1 %v236_v27, %s3761_s2  ;;  %245 = vrot.lane.b32.xlu0 %v235_v28, %s3761_s2 }
  0x52   :  { %269 = vrot.lane.b32.xlu1 %v260_v30, %s3761_s2  ;;  %267 = vrot.lane.b32.xlu0 %v259_v31, %s3761_s2  ;;  %v585_v30 = vmul.f32 %v582_v22, %v3904_v10  ;;  %v608_v31 = vstv %s3519_s15  ;;  %s3535_s15 = sld [smem:[#allocation6 + $0x3d]] }
  0x53   :  { %v610_v34 = vmul.f32 %v608_v31, %v3894_v2  ;;  %v611_v39 = vmul.f32 %v608_v31, %v3904_v10 }
  0x56   :  { %273 = vrot.lane.b32.xlu1 %v262_v32, %s3761_s2  ;;  %271 = vrot.lane.b32.xlu0 %v261_v33, %s3761_s2 }
  0x5a   :  { %295 = vrot.lane.b32.xlu1 %v286_v35, %s3762_s6  ;;  %293 = vrot.lane.b32.xlu0 %v285_v36, %s3762_s6  ;;  %v609_v35 = vmul.f32 %v608_v31, %v3896_v6 }
  0x5e   :  { %299 = vrot.lane.b32.xlu1 %v288_v37, %s3762_s6  ;;  %297 = vrot.lane.b32.xlu0 %v287_v38, %s3762_s6  ;;  %v612_v38 = vmul.f32 %v608_v31, %v3902_v9 }
  0x62   :  { %321 = vrot.lane.b32.xlu1 %v312_v40, %s3762_s6  ;;  %319 = vrot.lane.b32.xlu0 %v311_v41, %s3762_s6  ;;  %v634_v40 = vstv %s3520_s16  ;;  %s3536_s16 = sld [smem:[#allocation6 + $0x58]] }
  0x63   :  { %v635_v44 = vmul.f32 %v634_v40, %v3896_v6 }
  0x66   :  { %325 = vrot.lane.b32.xlu1 %v314_v42, %s3762_s6  ;;  %323 = vrot.lane.b32.xlu0 %v313_v43, %s3762_s6  ;;  %v636_v43 = vmul.f32 %v634_v40, %v3894_v2 }
  0x6a   :  { %347 = vrot.lane.b32.xlu1 %v338_v45, %s3762_s6  ;;  %345 = vrot.lane.b32.xlu0 %v337_v46, %s3762_s6 }
  0x6e   :  { %351 = vrot.lane.b32.xlu1 %v340_v47, %s3762_s6  ;;  %349 = vrot.lane.b32.xlu0 %v339_v48, %s3762_s6  ;;  %v638_v47 = vmul.f32 %v634_v40, %v3902_v9  ;;  %v637_v48 = vmul.f32 %v634_v40, %v3904_v10  ;;  %v738_v40 = vstv %s3524_s25  ;;  %s3551_s25 = sld [smem:[#allocation6 + $0xa]] }
  0x72   :  { %373 = vrot.lane.b32.xlu1 %v364_v50, %s3762_s6  ;;  %371 = vrot.lane.b32.xlu0 %v363_v51, %s3762_s6 }
  0x76   :  { %377 = vrot.lane.b32.xlu1 %v366_v52, %s3762_s6  ;;  %375 = vrot.lane.b32.xlu0 %v365_v53, %s3762_s6  ;;  %v662_v52 = vmul.f32 %v660_v49, %v3894_v2  ;;  %v661_v53 = vmul.f32 %v660_v49, %v3896_v6 }
  0x7a   :  { %399 = vrot.lane.b32.xlu1 %v390_v55, %s3762_s6  ;;  %397 = vrot.lane.b32.xlu0 %v389_v56, %s3762_s6  ;;  %v664_v56 = vmul.f32 %v660_v49, %v3902_v9 }
  0x7e   :  { %403 = vrot.lane.b32.xlu1 %v392_v57, %s3762_s6  ;;  %401 = vrot.lane.b32.xlu0 %v391_v58, %s3762_s6  ;;  %v663_v57 = vmul.f32 %v660_v49, %v3904_v10  ;;  %v686_v58 = vstv %s3522_s18  ;;  %s3538_s18 = sld [smem:[#allocation6 + $0x8e]] }
  0x82   :  { %425 = vrot.lane.b32.xlu1 %v416_v60, %s3762_s6  ;;  %423 = vrot.lane.b32.xlu0 %v415_v61, %s3762_s6  ;;  %v688_v61 = vmul.f32 %v686_v58, %v3894_v2 }
  0x86   :  { %429 = vrot.lane.b32.xlu1 %v418_v62, %s3762_s6  ;;  %427 = vrot.lane.b32.xlu0 %v417_v63, %s3762_s6  ;;  %v687_v62 = vmul.f32 %v686_v58, %v3896_v6  ;;  %v3998_v63 = vstv %s67_s19  ;;  %s3539_s19 = sld [smem:[#allocation6 + $0x8]] }
  0x87   :  { %v70_v12 = vmul.f32 %v3998_v63, %v3798_v4  ;;  %v71_v17 = vmul.f32 %v3998_v63, %v3792_v0 }
  0x8a   :  { %515 = vrot.lane.b32.xlu1 %v506_v7, %s3761_s2  ;;  %513 = vrot.lane.b32.xlu0 %v505_v8, %s3761_s2  ;;  %v690_v8 = vmul.f32 %v686_v58, %v3902_v9 }
  0x8e   :  { %519 = vrot.lane.b32.xlu1 %v508_v3, %s3761_s2  ;;  %517 = vrot.lane.b32.xlu0 %v507_v11, %s3761_s2  ;;  %v689_v3 = vmul.f32 %v686_v58, %v3904_v10  ;;  %v69_v11 = vmul.f32 %v3998_v63, %v3794_v1  ;;  %v4064_v58 = vstv %s4022_s26  ;;  %s3552_s26 = sld [smem:[#allocation6 + $0x25]] }
  0x92   :  { %541 = vrot.lane.b32.xlu1 %v532_v13, %s3761_s2  ;;  %539 = vrot.lane.b32.xlu0 %v531_v14, %s3761_s2  ;;  %v712_v13 = vstv %s3523_s20  ;;  %v4012_v14 = vstv %s51_s21  ;;  %s3540_s20 = sld [smem:[#allocation6 + $0x23]] }
  0x93   :  { %v74_v22 = vadd.f32 %v70_v12, %v4012_v14  ;;  %s3541_s21 = sld [smem:[#allocation6 + $0x3e]] }
  0x96   :  { %545 = vrot.lane.b32.xlu1 %v534_v15, %s3761_s2  ;;  %543 = vrot.lane.b32.xlu0 %v533_v16, %s3761_s2 }
  0x9a   :  { %567 = vrot.lane.b32.xlu1 %v558_v18, %s3761_s2  ;;  %565 = vrot.lane.b32.xlu0 %v557_v19, %s3761_s2  ;;  %v4020_v18 = vstv %s3492_s22  ;;  %v714_v19 = vmul.f32 %v712_v13, %v3894_v2  ;;  %s3542_s22 = sld [smem:[#allocation6 + $0x59]] }
  0x9b   :  { %v80_v31 = vmul.f32 %v4020_v18, %v3798_v4  ;;  %v81_v49 = vmul.f32 %v4020_v18, %v3792_v0 }
  0x9c   :  { %v3926_v23 = vpop.permute.xlu1 %141  ;;  %v3928_v24 = vpop.permute.xlu0 %137 }
  0x9e   :  { %571 = vrot.lane.b32.xlu1 %v560_v20, %s3761_s2  ;;  %569 = vrot.lane.b32.xlu0 %v559_v21, %s3761_s2  ;;  %v713_v20 = vmul.f32 %v712_v13, %v3896_v6  ;;  %v73_v21 = vadd.f32 %v69_v11, %v4012_v14 }
  0xa0   :  { %v3934_v27 = vpop.permute.xlu1 %143  ;;  %v3936_v28 = vpop.permute.xlu0 %139 }
  0xa2   :  { %593 = vrot.lane.b32.xlu1 %v584_v25, %s3761_s2  ;;  %591 = vrot.lane.b32.xlu0 %v583_v26, %s3761_s2 }
  0xa4   :  { %v3942_v32 = vpop.permute.xlu1 %165  ;;  %v3944_v33 = vpop.permute.xlu0 %163 }
  0xa6   :  { %597 = vrot.lane.b32.xlu1 %v586_v29, %s3761_s2  ;;  %595 = vrot.lane.b32.xlu0 %v585_v30, %s3761_s2  ;;  %v4036_v29 = vstv %s3509_s23  ;;  %v75_v30 = vadd.f32 %v71_v17, %v4012_v14  ;;  %s3543_s23 = sld [smem:[#allocation6 + $0x74]] }
  0xa8   :  { %v3950_v36 = vpop.permute.xlu1 %169  ;;  %v3952_v37 = vpop.permute.xlu0 %167 }
  0xaa   :  { %619 = vrot.lane.b32.xlu1 %v610_v34, %s3761_s2  ;;  %617 = vrot.lane.b32.xlu0 %v609_v35, %s3761_s2  ;;  %v79_v34 = vmul.f32 %v4020_v18, %v3794_v1  ;;  %v4043_v35 = vstv %s3487_s24  ;;  %s3544_s24 = sld [smem:[#allocation6 + $0x8f]] }
  0xab   :  { %v85_v17 = vadd.f32 %v81_v49, %v4043_v35  ;;  %v91_v49 = vmul.f32 %v4064_v58, %v3792_v0 }
  0xac   :  { %v3958_v41 = vpop.permute.xlu1 %191  ;;  %v3960_v42 = vpop.permute.xlu0 %189 }
  0xae   :  { %623 = vrot.lane.b32.xlu1 %v612_v38, %s3761_s2  ;;  %621 = vrot.lane.b32.xlu0 %v611_v39, %s3761_s2  ;;  %v716_v38 = vmul.f32 %v712_v13, %v3902_v9  ;;  %v715_v39 = vmul.f32 %v712_v13, %v3904_v10  ;;  %v4080_v13 = vstv %s4030_s0  ;;  %s3553_s0 = sld [smem:[#allocation6 + $0x40]] }
  0xb0   :  { %v3966_v45 = vpop.permute.xlu1 %195  ;;  %v3968_v46 = vpop.permute.xlu0 %193 }
  0xb2   :  { %645 = vrot.lane.b32.xlu1 %v636_v43, %s3761_s2  ;;  %643 = vrot.lane.b32.xlu0 %v635_v44, %s3761_s2  ;;  %v149_v43 = vadd.f32 %v3928_v24, %v73_v21  ;;  %v150_v44 = vadd.f32 %v3936_v28, %v74_v22  ;;  %v83_v24 = vadd.f32 %v79_v34, %v4043_v35 }
  0xb3   :  { %v90_v21 = vmul.f32 %v4064_v58, %v3798_v4  ;;  %v741_v34 = vmul.f32 %v738_v40, %v3904_v10 }
  0xb4   :  { %v3974_v50 = vpop.permute.xlu1 %217  ;;  %v3976_v51 = vpop.permute.xlu0 %215 }
  0xb6   :  { %649 = vrot.lane.b32.xlu1 %v638_v47, %s3761_s2  ;;  %647 = vrot.lane.b32.xlu0 %v637_v48, %s3761_s2  ;;  %v446_v47 = vmul.f32 %v4036_v29, %v3894_v2  ;;  %v445_v48 = vmul.f32 %v4036_v29, %v3896_v6 }
  0xb8   :  { %v3982_v54 = vpop.permute.xlu1 %221  ;;  %v3984_v55 = vpop.permute.xlu0 %219 }
  0xba   :  { %671 = vrot.lane.b32.xlu1 %v662_v52, %s3762_s6  ;;  %669 = vrot.lane.b32.xlu0 %v661_v53, %s3762_s6 }
  0xbc   :  { %v3990_v59 = vpop.permute.xlu1 %243  ;;  %v3992_v60 = vpop.permute.xlu0 %241 }
  0xbe   :  { %675 = vrot.lane.b32.xlu1 %v664_v56, %s3762_s6  ;;  %673 = vrot.lane.b32.xlu0 %v663_v57, %s3762_s6  ;;  %v84_v56 = vadd.f32 %v80_v31, %v4043_v35  ;;  %v4093_v31 = vstv %s4045_s1  ;;  %s3554_s1 = sld [smem:[#allocation6 + $0x5b]] }
  0xc0   :  { %v4000_v5 = vpop.permute.xlu1 %247  ;;  %v4002_v7 = vpop.permute.xlu0 %245 }
  0xc2   :  { %697 = vrot.lane.b32.xlu1 %v688_v61, %s3762_s6  ;;  %695 = vrot.lane.b32.xlu0 %v687_v62, %s3762_s6  ;;  %v740_v61 = vmul.f32 %v738_v40, %v3894_v2  ;;  %v739_v62 = vmul.f32 %v738_v40, %v3896_v6 }
  0xc4   :  { %v4014_v15 = vpop.permute.xlu1 %269  ;;  %v4016_v16 = vpop.permute.xlu0 %267 }
  0xc6   :  { %701 = vrot.lane.b32.xlu1 %v690_v8, %s3762_s6  ;;  %699 = vrot.lane.b32.xlu0 %v689_v3, %s3762_s6  ;;  %v447_v8 = vmul.f32 %v4036_v29, %v3904_v10  ;;  %v151_v3 = vadd.f32 %v3926_v23, %v75_v30  ;;  %v89_v23 = vmul.f32 %v4064_v58, %v3794_v1 }
  0xc7   :  { %v742_v30 = vmul.f32 %v738_v40, %v3902_v9 }
  0xc8   :  { %v4032_v25 = vpop.permute.xlu1 %273  ;;  %v4034_v26 = vpop.permute.xlu0 %271 }
  0xca   :  { %723 = vrot.lane.b32.xlu1 %v714_v19, %s3762_s6  ;;  %721 = vrot.lane.b32.xlu0 %v713_v20, %s3762_s6 }
  0xcc   :  { %v296_v52 = vpop.permute.xlu1 %295  ;;  %v294_v53 = vpop.permute.xlu0 %293 }
  0xcd   :  { %v306_v57 = vadd.f32 %v296_v52, %v150_v44  ;;  %v305_v28 = vadd.f32 %v294_v53, %v149_v43  ;;  %v176_v43 = vadd.f32 %v3942_v32, %v84_v56  ;;  %v175_v44 = vadd.f32 %v3944_v33, %v83_v24 }
  0xce   :  { %727 = vrot.lane.b32.xlu1 %v716_v38, %s3762_s6  ;;  %725 = vrot.lane.b32.xlu0 %v715_v39, %s3762_s6  ;;  %v456_v38 = vmul.f32 %v4080_v13, %v3894_v2  ;;  %v455_v39 = vmul.f32 %v4080_v13, %v3896_v6  ;;  %v94_v53 = vadd.f32 %v90_v21, %v4093_v31  ;;  %v4116_v32 = vstv %s4066_s28  ;;  %s3556_s28 = sld [smem:[#allocation6 + $0x91]] }
  0xcf   :  { %v4075_v11 = vadd.f32 %v446_v47, %v306_v57  ;;  %v4077_v12 = vadd.f32 %v445_v48, %v305_v28  ;;  %v764_v47 = vstv %s4053_s27  ;;  %v93_v57 = vadd.f32 %v89_v23, %v4093_v31  ;;  %s3555_s27 = sld [smem:[#allocation6 + $0x76]] }
  0xd0   :  { %v4085_v19 = vpop.permute.xlu1 %299  ;;  %v298_v20 = vpop.permute.xlu0 %297  ;;  %v766_v33 = vmul.f32 %v764_v47, %v3894_v2  ;;  %v765_v56 = vmul.f32 %v764_v47, %v3896_v6  ;;  %v457_v24 = vmul.f32 %v4080_v13, %v3904_v10  ;;  %v95_v21 = vadd.f32 %v91_v49, %v4093_v31 }
  0xd1   :  { %7536 = vst [vmem:[#allocation11_spill] sm:$0xff] %v4077_v12  ;;  %v307_v22 = vadd.f32 %v298_v20, %v151_v3  ;;  %v4132_v20 = vstv %s4082_s29  ;;  %v202_v49 = vadd.f32 %v3958_v41, %v94_v53  ;;  %v4168_v41 = vstv %s4118_s5  ;;  %s3557_s29 = sld [smem:[#allocation6 + $0xb]] }
  0xd2   :  { %749 = vrot.lane.b32.xlu1 %v740_v61, %s3762_s6  ;;  %747 = vrot.lane.b32.xlu0 %v739_v62, %s3762_s6  ;;  %v177_v62 = vadd.f32 %v3952_v37, %v85_v17  ;;  %v99_v37 = vmul.f32 %v4116_v32, %v3794_v1  ;;  %s3560_s5 = sld [smem:[#allocation6 + $0x5c]] }
  0xd3   :  { %v4109_v48 = vadd.f32 %v447_v8, %v307_v22 }
  0xd4   :  { %v322_v52 = vpop.permute.xlu1 %321  ;;  %v320_v40 = vpop.permute.xlu0 %319 }
  0xd5   :  { %7537 = vst [vmem:[#allocation12_spill] sm:$0xff] %v4109_v48  ;;  %v332_v28 = vadd.f32 %v322_v52, %v176_v43  ;;  %v331_v61 = vadd.f32 %v320_v40, %v175_v44  ;;  %v466_v43 = vmul.f32 %v4132_v20, %v3894_v2  ;;  %v465_v44 = vmul.f32 %v4132_v20, %v3896_v6 }
  0xd6   :  { %753 = vrot.lane.b32.xlu1 %v742_v30, %s3762_s6  ;;  %751 = vrot.lane.b32.xlu0 %v741_v34, %s3762_s6  ;;  %v100_v30 = vmul.f32 %v4116_v32, %v3798_v4  ;;  %v768_v34 = vmul.f32 %v764_v47, %v3902_v9  ;;  %v201_v52 = vadd.f32 %v3960_v42, %v93_v57  ;;  %v790_v40 = vstv %s4107_s4  ;;  %s3559_s4 = sld [smem:[#allocation6 + $0x41]] }
  0xd7   :  { %v4127_v8 = vadd.f32 %v456_v38, %v332_v28  ;;  %v4129_v3 = vadd.f32 %v455_v39, %v331_v61  ;;  %v4145_v38 = vstv %s4095_s30  ;;  %v767_v39 = vmul.f32 %v764_v47, %v3904_v10  ;;  %s3558_s30 = sld [smem:[#allocation6 + $0x26]] }
  0xd8   :  { %v4137_v23 = vpop.permute.xlu1 %325  ;;  %v324_v22 = vpop.permute.xlu0 %323  ;;  %v101_v61 = vmul.f32 %v4116_v32, %v3792_v0  ;;  %v792_v42 = vmul.f32 %v790_v40, %v3894_v2  ;;  %v791_v53 = vmul.f32 %v790_v40, %v3896_v6  ;;  %v467_v57 = vmul.f32 %v4132_v20, %v3904_v10 }
  0xd9   :  { %7538 = vst [vmem:[#allocation13_spill] sm:$0xff] %v4127_v8  ;;  %7539 = vst [vmem:[#allocation14_spill] sm:$0xff] %v4129_v3  ;;  %v333_v17 = vadd.f32 %v324_v22, %v177_v62  ;;  %v103_v62 = vadd.f32 %v99_v37, %v4145_v38 }
  0xda   :  { %775 = vrot.lane.b32.xlu1 %v766_v33, %s3762_s6  ;;  %773 = vrot.lane.b32.xlu0 %v765_v56, %s3762_s6  ;;  %v104_v56 = vadd.f32 %v100_v30, %v4145_v38 }
  0xdb   :  { %v4161_v28 = vadd.f32 %v457_v24, %v333_v17  ;;  %v203_v24 = vadd.f32 %v3968_v46, %v95_v21  ;;  %v4184_v17 = vstv %s4134_s7  ;;  %v109_v46 = vmul.f32 %v4168_v41, %v3794_v1  ;;  %s3561_s7 = sld [smem:[#allocation6 + $0x77]] }
  0xdc   :  { %v348_v33 = vpop.permute.xlu1 %347  ;;  %v346_v47 = vpop.permute.xlu0 %345 }
  0xdd   :  { %7540 = vst [vmem:[#allocation15_spill] sm:$0xff] %v4161_v28  ;;  %v358_v22 = vadd.f32 %v348_v33, %v202_v49  ;;  %v357_v3 = vadd.f32 %v346_v47, %v201_v52  ;;  %v110_v52 = vmul.f32 %v4168_v41, %v3798_v4  ;;  %v475_v33 = vmul.f32 %v4184_v17, %v3896_v6 }
  0xde   :  { %779 = vrot.lane.b32.xlu1 %v768_v34, %s3762_s6  ;;  %777 = vrot.lane.b32.xlu0 %v767_v39, %s3762_s6  ;;  %v105_v34 = vadd.f32 %v101_v61, %v4145_v38  ;;  %v476_v61 = vmul.f32 %v4184_v17, %v3894_v2  ;;  %v228_v47 = vadd.f32 %v3974_v50, %v104_v56 }
  0xdf   :  { %v4179_v30 = vadd.f32 %v466_v43, %v358_v22  ;;  %v4181_v37 = vadd.f32 %v465_v44, %v357_v3  ;;  %v794_v3 = vmul.f32 %v790_v40, %v3902_v9  ;;  %v4197_v43 = vstv %s4147_s8  ;;  %v4210_v22 = vld [vmem:[#allocation2 + $0xa] sm:$0x3f]  ;;  %s3562_s8 = sld [smem:[#allocation6 + $0x92]] }
  0xe0   :  { %v4189_v39 = vpop.permute.xlu1 %351  ;;  %v350_v49 = vpop.permute.xlu0 %349  ;;  %v793_v44 = vmul.f32 %v790_v40, %v3904_v10  ;;  %v227_v9 = vadd.f32 %v3976_v51, %v103_v62  ;;  %v111_v40 = vmul.f32 %v4168_v41, %v3792_v0  ;;  %v113_v50 = vadd.f32 %v109_v46, %v4197_v43 }
  0xe1   :  { %7541 = vst [vmem:[#allocation16_spill] sm:$0xff] %v4179_v30  ;;  %7542 = vst [vmem:[#allocation17_spill] sm:$0xff] %v4181_v37  ;;  %v359_v21 = vadd.f32 %v350_v49, %v203_v24  ;;  %v880_v24 = vstv %s4159_s9  ;;  %v4213_v49 = vld [vmem:[#allocation2 + $0x2] sm:$0xff]  ;;  %v114_v30 = vadd.f32 %v110_v52, %v4197_v43  ;;  %v4224_v62 = vstv %s4170_s10  ;;  %s3569_s9 = sld [smem:[#allocation6 + $0xd]] }
  0xe2   :  { %801 = vrot.lane.b32.xlu1 %v792_v42, %s3762_s6  ;;  %799 = vrot.lane.b32.xlu0 %v791_v53, %s3762_s6  ;;  %v477_v52 = vmul.f32 %v4184_v17, %v3904_v10  ;;  %v229_v46 = vadd.f32 %v3984_v55, %v105_v34  ;;  %v120_v8 = vmul.f32 %v4224_v62, %v3798_v4  ;;  %s3570_s10 = sld [smem:[#allocation6 + $0x28]] }
  0xe3   :  { %v4217_v42 = vadd.f32 %v467_v57, %v359_v21  ;;  %v882_v57 = vmul.f32 %v880_v24, %v4210_v22  ;;  %v881_v21 = vmul.f32 %v880_v24, %v4213_v49  ;;  %v119_v55 = vmul.f32 %v4224_v62, %v3794_v1 }
  0xe4   :  { %v374_v53 = vpop.permute.xlu1 %373  ;;  %v372_v37 = vpop.permute.xlu0 %371  ;;  %v253_v1 = vadd.f32 %v3992_v60, %v113_v50 }
  0xe5   :  { %7543 = vst [vmem:[#allocation18_spill] sm:$0xff] %v4217_v42  ;;  %v384_v51 = vadd.f32 %v374_v53, %v228_v47  ;;  %v383_v56 = vadd.f32 %v372_v37, %v227_v9  ;;  %v4230_v42 = vld [vmem:[#allocation2 + $0x3a] sm:$0x3f]  ;;  %v4235_v47 = vld [vmem:[#allocation2 + $0x32] sm:$0xff] }
  0xe6   :  { %805 = vrot.lane.b32.xlu1 %v794_v3, %s3762_s6  ;;  %803 = vrot.lane.b32.xlu0 %v793_v44, %s3762_s6  ;;  %v4242_v3 = vstv %s4186_s11  ;;  %v115_v44 = vadd.f32 %v111_v40, %v4197_v43  ;;  %v883_v40 = vmul.f32 %v880_v24, %v4235_v47  ;;  %s3571_s11 = sld [smem:[#allocation6 + $0x43]] }
  0xe7   :  { %v4237_v37 = vadd.f32 %v476_v61, %v384_v51  ;;  %v4239_v9 = vadd.f32 %v475_v33, %v383_v56  ;;  %v884_v61 = vmul.f32 %v880_v24, %v4230_v42  ;;  %v4255_v33 = vstv %s4199_s12  ;;  %s3572_s12 = sld [smem:[#allocation6 + $0x5e]] }
  0xe8   :  { %v4247_v53 = vpop.permute.xlu1 %377  ;;  %v376_v28 = vpop.permute.xlu0 %375  ;;  %v486_v51 = vmul.f32 %v4242_v3, %v3894_v2  ;;  %v485_v4 = vmul.f32 %v4242_v3, %v3896_v6  ;;  %v254_v56 = vadd.f32 %v3990_v59, %v114_v30  ;;  %v487_v30 = vmul.f32 %v4242_v3, %v3904_v10 }
  0xe9   :  { %7544 = vst [vmem:[#allocation19_spill] sm:$0xff] %v4237_v37  ;;  %7545 = vst [vmem:[#allocation20_spill] sm:$0xff] %v4239_v9  ;;  %v385_v34 = vadd.f32 %v376_v28, %v229_v46  ;;  %v906_v28 = vstv %s4215_s13  ;;  %v124_v9 = vadd.f32 %v120_v8, %v4255_v33  ;;  %v123_v37 = vadd.f32 %v119_v55, %v4255_v33  ;;  %s3573_s13 = sld [smem:[#allocation6 + $0x79]] }
  0xea   :  { %891 = vrot.lane.b32.xlu1 %v882_v57, %s3761_s2  ;;  %889 = vrot.lane.b32.xlu0 %v881_v21, %s3761_s2  ;;  %v121_v57 = vmul.f32 %v4224_v62, %v3792_v0  ;;  %v908_v59 = vmul.f32 %v906_v28, %v4210_v22  ;;  %v907_v60 = vmul.f32 %v906_v28, %v4213_v49 }
  0xeb   :  { %v4267_v46 = vadd.f32 %v477_v52, %v385_v34  ;;  %v255_v0 = vadd.f32 %v4002_v7, %v115_v44  ;;  %v4285_v52 = vstv %s4244_s14  ;;  %v909_v7 = vmul.f32 %v906_v28, %v4235_v47  ;;  %s3574_s14 = sld [smem:[#allocation6 + $0x94]] }
  0xec   :  { %v400_v21 = vpop.permute.xlu1 %399  ;;  %v398_v24 = vpop.permute.xlu0 %397  ;;  %v280_v44 = vadd.f32 %v4014_v15, %v124_v9 }
  0xed   :  { %v410_v48 = vadd.f32 %v400_v21, %v254_v56  ;;  %v409_v12 = vadd.f32 %v398_v24, %v253_v1  ;;  %v910_v56 = vmul.f32 %v906_v28, %v4230_v42 }
  0xee   :  { %895 = vrot.lane.b32.xlu1 %v884_v61, %s3761_s2  ;;  %893 = vrot.lane.b32.xlu0 %v883_v40, %s3761_s2  ;;  %v125_v61 = vadd.f32 %v121_v57, %v4255_v33 }
  0xef   :  { %v4280_v50 = vadd.f32 %v486_v51, %v410_v48  ;;  %v4282_v8 = vadd.f32 %v485_v4, %v409_v12  ;;  %v496_v12 = vmul.f32 %v4285_v52, %v3894_v2  ;;  %v495_v48 = vmul.f32 %v4285_v52, %v3896_v6 }
  0xf0   :  { %v4287_v55 = vpop.permute.xlu1 %403  ;;  %v402_v34 = vpop.permute.xlu0 %401  ;;  %v279_v51 = vadd.f32 %v4016_v16, %v123_v37  ;;  %v932_v4 = vstv %s3535_s15  ;;  %v281_v15 = vadd.f32 %v4034_v26, %v125_v61  ;;  %v497_v37 = vmul.f32 %v4285_v52, %v3904_v10  ;;  %s3575_s15 = sld [smem:[#allocation6 + $0xe]] }
  0xf1   :  { %7546 = vst [vmem:[#allocation21_spill] sm:$0xff] %v4280_v50  ;;  %7547 = vst [vmem:[#allocation22_spill] sm:$0xff] %v4282_v8  ;;  %v411_v40 = vadd.f32 %v402_v34, %v255_v0  ;;  %v934_v2 = vmul.f32 %v932_v4, %v4210_v22  ;;  %v933_v6 = vmul.f32 %v932_v4, %v4213_v49  ;;  %v958_v26 = vstv %s3536_s16  ;;  %s3576_s16 = sld [smem:[#allocation6 + $0x29]] }
  0xf2   :  { %917 = vrot.lane.b32.xlu1 %v908_v59, %s3761_s2  ;;  %915 = vrot.lane.b32.xlu0 %v907_v60, %s3761_s2  ;;  %v936_v0 = vmul.f32 %v932_v4, %v4230_v42  ;;  %v935_v34 = vmul.f32 %v932_v4, %v4235_v47  ;;  %v960_v10 = vmul.f32 %v958_v26, %v4210_v22  ;;  %v984_v4 = vstv %s3537_s17  ;;  %s3577_s17 = sld [smem:[#allocation6 + $0x44]] }
  0xf3   :  { %v4300_v1 = vadd.f32 %v487_v30, %v411_v40  ;;  %v1088_v8 = vstv %s3541_s21  ;;  %s3587_s21 = sld [smem:[#allocation6 + $0x10]] }
  0xf4   :  { %v426_v57 = vpop.permute.xlu1 %425  ;;  %v424_v21 = vpop.permute.xlu0 %423 }
  0xf5   :  { %7548 = vst [vmem:[#allocation23_spill] sm:$0xff] %v4300_v1  ;;  %v436_v24 = vadd.f32 %v426_v57, %v280_v44  ;;  %v435_v59 = vadd.f32 %v424_v21, %v279_v51  ;;  %v962_v44 = vmul.f32 %v958_v26, %v4230_v42  ;;  %v961_v51 = vmul.f32 %v958_v26, %v4235_v47 }
  0xf6   :  { %921 = vrot.lane.b32.xlu1 %v910_v56, %s3761_s2  ;;  %919 = vrot.lane.b32.xlu0 %v909_v7, %s3761_s2  ;;  %v959_v7 = vmul.f32 %v958_v26, %v4213_v49 }
  0xf7   :  { %v4307_v9 = vadd.f32 %v496_v12, %v436_v24  ;;  %v4309_v16 = vadd.f32 %v495_v48, %v435_v59  ;;  %v986_v24 = vmul.f32 %v984_v4, %v4210_v22  ;;  %v985_v59 = vmul.f32 %v984_v4, %v4213_v49 }
  0xf8   :  { %v4313_v28 = vpop.permute.xlu1 %429  ;;  %v428_v60 = vpop.permute.xlu0 %427 }
  0xf9   :  { %7549 = vst [vmem:[#allocation24_spill] sm:$0xff] %v4307_v9  ;;  %7550 = vst [vmem:[#allocation25_spill] sm:$0xff] %v4309_v16  ;;  %v437_v30 = vadd.f32 %v428_v60, %v281_v15  ;;  %v988_v15 = vmul.f32 %v984_v4, %v4230_v42  ;;  %v1010_v60 = vstv %s3538_s18  ;;  %v1062_v16 = vstv %s3540_s20  ;;  %s3578_s18 = sld [smem:[#allocation6 + $0x5f]] }
  0xfa   :  { %943 = vrot.lane.b32.xlu1 %v934_v2, %s3761_s2  ;;  %941 = vrot.lane.b32.xlu0 %v933_v6, %s3761_s2  ;;  %v1011_v26 = vmul.f32 %v1010_v60, %v4213_v49  ;;  %v1064_v9 = vmul.f32 %v1062_v16, %v4210_v22  ;;  %s3580_s20 = sld [smem:[#allocation6 + $0x95]] }
  0xfb   :  { %v4319_v61 = vadd.f32 %v497_v37, %v437_v30  ;;  %v987_v37 = vmul.f32 %v984_v4, %v4235_v47  ;;  %v1036_v4 = vstv %s3539_s19  ;;  %s3579_s19 = sld [smem:[#allocation6 + $0x7a]] }
  0xfc   :  { %v4321_v40 = vpop.permute.xlu1 %515  ;;  %v4323_v56 = vpop.permute.xlu0 %513 }
  0xfd   :  { %7551 = vst [vmem:[#allocation26_spill] sm:$0xff] %v4319_v61  ;;  %v1039_v61 = vmul.f32 %v1036_v4, %v4235_v47 }
  0xfe   :  { %947 = vrot.lane.b32.xlu1 %v936_v0, %s3761_s2  ;;  %945 = vrot.lane.b32.xlu0 %v935_v34, %s3761_s2  ;;  %v1012_v34 = vmul.f32 %v1010_v60, %v4210_v22 }
 0x100   :  { %v4329_v12 = vpop.permute.xlu1 %519  ;;  %v4331_v48 = vpop.permute.xlu0 %517 }
 0x102   :  { %969 = vrot.lane.b32.xlu1 %v960_v10, %s3761_s2  ;;  %967 = vrot.lane.b32.xlu0 %v959_v7, %s3761_s2 }
 0x104   :  { %v4337_v57 = vpop.permute.xlu1 %541  ;;  %v4339_v21 = vpop.permute.xlu0 %539 }
 0x106   :  { %973 = vrot.lane.b32.xlu1 %v962_v44, %s3761_s2  ;;  %971 = vrot.lane.b32.xlu0 %v961_v51, %s3761_s2  ;;  %v1014_v44 = vmul.f32 %v1010_v60, %v4230_v42  ;;  %v1013_v51 = vmul.f32 %v1010_v60, %v4235_v47  ;;  %v1040_v60 = vmul.f32 %v1036_v4, %v4230_v42 }
 0x108   :  { %v4345_v2 = vpop.permute.xlu1 %545  ;;  %v4347_v6 = vpop.permute.xlu0 %543 }
 0x10a   :  { %995 = vrot.lane.b32.xlu1 %v986_v24, %s3761_s2  ;;  %993 = vrot.lane.b32.xlu0 %v985_v59, %s3761_s2 }
 0x10c   :  { %v4353_v30 = vpop.permute.xlu1 %567  ;;  %v4355_v0 = vpop.permute.xlu0 %565 }
 0x10e   :  { %999 = vrot.lane.b32.xlu1 %v988_v15, %s3761_s2  ;;  %997 = vrot.lane.b32.xlu0 %v987_v37, %s3761_s2  ;;  %v1038_v15 = vmul.f32 %v1036_v4, %v4210_v22  ;;  %v1037_v37 = vmul.f32 %v1036_v4, %v4213_v49  ;;  %v1066_v4 = vmul.f32 %v1062_v16, %v4230_v42 }
 0x110   :  { %v4361_v10 = vpop.permute.xlu1 %571  ;;  %v4363_v7 = vpop.permute.xlu0 %569 }
 0x112   :  { %1021 = vrot.lane.b32.xlu1 %v1012_v34, %s3761_s2  ;;  %1019 = vrot.lane.b32.xlu0 %v1011_v26, %s3761_s2 }
 0x114   :  { %v4369_v24 = vpop.permute.xlu1 %593  ;;  %v4371_v59 = vpop.permute.xlu0 %591 }
 0x116   :  { %1025 = vrot.lane.b32.xlu1 %v1014_v44, %s3761_s2  ;;  %1023 = vrot.lane.b32.xlu0 %v1013_v51, %s3761_s2 }
 0x118   :  { %v4377_v34 = vpop.permute.xlu1 %597  ;;  %v4379_v26 = vpop.permute.xlu0 %595 }
 0x11a   :  { %1047 = vrot.lane.b32.xlu1 %v1038_v15, %s3762_s6  ;;  %1045 = vrot.lane.b32.xlu0 %v1037_v37, %s3762_s6  ;;  %v1063_v15 = vmul.f32 %v1062_v16, %v4213_v49 }
 0x11c   :  { %v4385_v44 = vpop.permute.xlu1 %619  ;;  %v4387_v51 = vpop.permute.xlu0 %617 }
 0x11d   :  { %7552 = vst [vmem:[#allocation27_spill] sm:$0xff] %v4385_v44  ;;  %7553 = vst [vmem:[#allocation28_spill] sm:$0xff] %v4387_v51  ;;  %v1065_v51 = vmul.f32 %v1062_v16, %v4235_v47  ;;  %v1092_v16 = vmul.f32 %v1088_v8, %v4230_v42 }
 0x11e   :  { %1051 = vrot.lane.b32.xlu1 %v1040_v60, %s3762_s6  ;;  %1049 = vrot.lane.b32.xlu0 %v1039_v61, %s3762_s6 }
 0x120   :  { %v4393_v1 = vpop.permute.xlu1 %623  ;;  %v4395_v37 = vpop.permute.xlu0 %621 }
 0x121   :  { %7554 = vst [vmem:[#allocation29_spill] sm:$0xff] %v4393_v1  ;;  %7555 = vst [vmem:[#allocation30_spill] sm:$0xff] %v4395_v37  ;;  %v1090_v37 = vmul.f32 %v1088_v8, %v4210_v22 }
 0x122   :  { %1073 = vrot.lane.b32.xlu1 %v1064_v9, %s3762_s6  ;;  %1071 = vrot.lane.b32.xlu0 %v1063_v15, %s3762_s6  ;;  %v1089_v9 = vmul.f32 %v1088_v8, %v4213_v49 }
 0x124   :  { %v4401_v60 = vpop.permute.xlu1 %645  ;;  %v4403_v61 = vpop.permute.xlu0 %643 }
 0x125   :  { %7556 = vst [vmem:[#allocation31_spill] sm:$0xff] %v4401_v60  ;;  %7557 = vst [vmem:[#allocation32_spill] sm:$0xff] %v4403_v61  ;;  %v1091_v61 = vmul.f32 %v1088_v8, %v4235_v47  ;;  %v1114_v60 = vstv %s3542_s22  ;;  %s3588_s22 = sld [smem:[#allocation6 + $0x2b]] }
 0x126   :  { %1077 = vrot.lane.b32.xlu1 %v1066_v4, %s3762_s6  ;;  %1075 = vrot.lane.b32.xlu0 %v1065_v51, %s3762_s6  ;;  %v1118_v8 = vmul.f32 %v1114_v60, %v4230_v42 }
 0x128   :  { %v4409_v1 = vpop.permute.xlu1 %649  ;;  %v4411_v15 = vpop.permute.xlu0 %647 }
 0x129   :  { %7558 = vst [vmem:[#allocation33_spill] sm:$0xff] %v4409_v1  ;;  %7559 = vst [vmem:[#allocation34_spill] sm:$0xff] %v4411_v15  ;;  %v1116_v15 = vmul.f32 %v1114_v60, %v4210_v22 }
 0x12a   :  { %1099 = vrot.lane.b32.xlu1 %v1090_v37, %s3762_s6  ;;  %1097 = vrot.lane.b32.xlu0 %v1089_v9, %s3762_s6  ;;  %v1115_v37 = vmul.f32 %v1114_v60, %v4213_v49 }
 0x12c   :  { %v4417_v4 = vpop.permute.xlu1 %671  ;;  %v4419_v51 = vpop.permute.xlu0 %669 }
 0x12d   :  { %7560 = vst [vmem:[#allocation35_spill] sm:$0xff] %v4417_v4  ;;  %7561 = vst [vmem:[#allocation36_spill] sm:$0xff] %v4419_v51  ;;  %v1117_v51 = vmul.f32 %v1114_v60, %v4235_v47  ;;  %v1140_v4 = vstv %s3543_s23  ;;  %s3589_s23 = sld [smem:[#allocation6 + $0x46]] }
 0x12e   :  { %1103 = vrot.lane.b32.xlu1 %v1092_v16, %s3762_s6  ;;  %1101 = vrot.lane.b32.xlu0 %v1091_v61, %s3762_s6  ;;  %v1144_v60 = vmul.f32 %v1140_v4, %v4230_v42 }
 0x130   :  { %v4425_v1 = vpop.permute.xlu1 %675  ;;  %v4427_v9 = vpop.permute.xlu0 %673 }
 0x131   :  { %7562 = vst [vmem:[#allocation37_spill] sm:$0xff] %v4425_v1  ;;  %7563 = vst [vmem:[#allocation38_spill] sm:$0xff] %v4427_v9  ;;  %v1142_v9 = vmul.f32 %v1140_v4, %v4210_v22 }
 0x132   :  { %1125 = vrot.lane.b32.xlu1 %v1116_v15, %s3762_s6  ;;  %1123 = vrot.lane.b32.xlu0 %v1115_v37, %s3762_s6  ;;  %v1141_v15 = vmul.f32 %v1140_v4, %v4213_v49 }
 0x134   :  { %v4433_v16 = vpop.permute.xlu1 %697  ;;  %v4435_v61 = vpop.permute.xlu0 %695 }
 0x135   :  { %7564 = vst [vmem:[#allocation39_spill] sm:$0xff] %v4433_v16  ;;  %7565 = vst [vmem:[#allocation40_spill] sm:$0xff] %v4435_v61  ;;  %v1143_v61 = vmul.f32 %v1140_v4, %v4235_v47  ;;  %v1166_v16 = vstv %s3544_s24  ;;  %s3590_s24 = sld [smem:[#allocation6 + $0x61]] }
 0x136   :  { %1129 = vrot.lane.b32.xlu1 %v1118_v8, %s3762_s6  ;;  %1127 = vrot.lane.b32.xlu0 %v1117_v51, %s3762_s6  ;;  %v1170_v4 = vmul.f32 %v1166_v16, %v4230_v42 }
 0x138   :  { %v4441_v1 = vpop.permute.xlu1 %701  ;;  %v4443_v37 = vpop.permute.xlu0 %699 }
 0x139   :  { %7566 = vst [vmem:[#allocation41_spill] sm:$0xff] %v4441_v1  ;;  %7567 = vst [vmem:[#allocation42_spill] sm:$0xff] %v4443_v37  ;;  %v1168_v37 = vmul.f32 %v1166_v16, %v4210_v22 }
 0x13a   :  { %1151 = vrot.lane.b32.xlu1 %v1142_v9, %s3762_s6  ;;  %1149 = vrot.lane.b32.xlu0 %v1141_v15, %s3762_s6  ;;  %v1167_v9 = vmul.f32 %v1166_v16, %v4213_v49 }
 0x13c   :  { %v4449_v8 = vpop.permute.xlu1 %723  ;;  %v4451_v51 = vpop.permute.xlu0 %721 }
 0x13d   :  { %7568 = vst [vmem:[#allocation43_spill] sm:$0xff] %v4449_v8  ;;  %7569 = vst [vmem:[#allocation44_spill] sm:$0xff] %v4451_v51  ;;  %v1169_v51 = vmul.f32 %v1166_v16, %v4235_v47  ;;  %v4465_v8 = vld [vmem:[#allocation2 + $0x18] sm:$0x3f]  ;;  %v4479_v47 = vld [vmem:[#allocation2 + $0x40] sm:$0xff] }
 0x13e   :  { %1155 = vrot.lane.b32.xlu1 %v1144_v60, %s3762_s6  ;;  %1153 = vrot.lane.b32.xlu0 %v1143_v61, %s3762_s6  ;;  %v1257_v60 = vstv %s3551_s25  ;;  %v4467_v61 = vld [vmem:[#allocation2 + $0x10] sm:$0xff]  ;;  %s3591_s25 = sld [smem:[#allocation6 + $0x7c]] }
 0x13f   :  { %v1258_v42 = vmul.f32 %v1257_v60, %v4467_v61 }
 0x140   :  { %v4457_v1 = vpop.permute.xlu1 %727  ;;  %v4459_v15 = vpop.permute.xlu0 %725 }
 0x141   :  { %7570 = vst [vmem:[#allocation45_spill] sm:$0xff] %v4457_v1  ;;  %7571 = vst [vmem:[#allocation46_spill] sm:$0xff] %v4459_v15 }
 0x142   :  { %1177 = vrot.lane.b32.xlu1 %v1168_v37, %s3762_s6  ;;  %1175 = vrot.lane.b32.xlu0 %v1167_v9, %s3762_s6  ;;  %v1259_v37 = vmul.f32 %v1257_v60, %v4465_v8  ;;  %v4477_v9 = vld [vmem:[#allocation2 + $0x48] sm:$0x3f] }
 0x144   :  { %v4469_v22 = vpop.permute.xlu1 %749  ;;  %v4471_v49 = vpop.permute.xlu0 %747 }
 0x145   :  { %7572 = vst [vmem:[#allocation47_spill] sm:$0xff] %v4469_v22  ;;  %7573 = vst [vmem:[#allocation48_spill] sm:$0xff] %v4471_v49  ;;  %v1283_v49 = vstv %s3552_s26  ;;  %s3592_s26 = sld [smem:[#allocation6 + $0x97]] }
 0x146   :  { %1181 = vrot.lane.b32.xlu1 %v1170_v4, %s3762_s6  ;;  %1179 = vrot.lane.b32.xlu0 %v1169_v51, %s3762_s6  ;;  %v1261_v4 = vmul.f32 %v1257_v60, %v4477_v9  ;;  %v1260_v51 = vmul.f32 %v1257_v60, %v4479_v47  ;;  %v1287_v60 = vmul.f32 %v1283_v49, %v4477_v9 }
 0x148   :  { %v4481_v16 = vpop.permute.xlu1 %753  ;;  %v4483_v15 = vpop.permute.xlu0 %751 }
 0x149   :  { %7574 = vst [vmem:[#allocation49_spill] sm:$0xff] %v4481_v16  ;;  %7575 = vst [vmem:[#allocation50_spill] sm:$0xff] %v4483_v15  ;;  %v1285_v15 = vmul.f32 %v1283_v49, %v4465_v8 }
 0x14a   :  { %1268 = vrot.lane.b32.xlu1 %v1259_v37, %s3761_s2  ;;  %1266 = vrot.lane.b32.xlu0 %v1258_v42, %s3761_s2  ;;  %v1284_v37 = vmul.f32 %v1283_v49, %v4467_v61 }
 0x14c   :  { %v4489_v22 = vpop.permute.xlu1 %775  ;;  %v4491_v1 = vpop.permute.xlu0 %773 }
 0x14d   :  { %7576 = vst [vmem:[#allocation51_spill] sm:$0xff] %v4489_v22  ;;  %7577 = vst [vmem:[#allocation52_spill] sm:$0xff] %v4491_v1  ;;  %v1286_v1 = vmul.f32 %v1283_v49, %v4479_v47  ;;  %v1309_v22 = vstv %s3553_s0  ;;  %s3593_s0 = sld [smem:[#allocation6 + $0x11]] }
 0x14e   :  { %1272 = vrot.lane.b32.xlu1 %v1261_v4, %s3761_s2  ;;  %1270 = vrot.lane.b32.xlu0 %v1260_v51, %s3761_s2  ;;  %v1313_v49 = vmul.f32 %v1309_v22, %v4477_v9 }
 0x150   :  { %v4497_v16 = vpop.permute.xlu1 %779  ;;  %v4499_v42 = vpop.permute.xlu0 %777 }
 0x151   :  { %7578 = vst [vmem:[#allocation53_spill] sm:$0xff] %v4497_v16  ;;  %7579 = vst [vmem:[#allocation54_spill] sm:$0xff] %v4499_v42  ;;  %v1311_v42 = vmul.f32 %v1309_v22, %v4465_v8 }
 0x152   :  { %1294 = vrot.lane.b32.xlu1 %v1285_v15, %s3761_s2  ;;  %1292 = vrot.lane.b32.xlu0 %v1284_v37, %s3761_s2  ;;  %v1310_v15 = vmul.f32 %v1309_v22, %v4467_v61 }
 0x154   :  { %v4505_v4 = vpop.permute.xlu1 %801  ;;  %v4507_v51 = vpop.permute.xlu0 %799 }
 0x155   :  { %7580 = vst [vmem:[#allocation55_spill] sm:$0xff] %v4505_v4  ;;  %7581 = vst [vmem:[#allocation56_spill] sm:$0xff] %v4507_v51  ;;  %v1312_v51 = vmul.f32 %v1309_v22, %v4479_v47  ;;  %v1335_v4 = vstv %s3554_s1  ;;  %s3594_s1 = sld [smem:[#allocation6 + $0x2c]] }
 0x156   :  { %1298 = vrot.lane.b32.xlu1 %v1287_v60, %s3761_s2  ;;  %1296 = vrot.lane.b32.xlu0 %v1286_v1, %s3761_s2  ;;  %v1339_v22 = vmul.f32 %v1335_v4, %v4477_v9 }
 0x158   :  { %v4513_v16 = vpop.permute.xlu1 %805  ;;  %v4515_v37 = vpop.permute.xlu0 %803 }
 0x159   :  { %7582 = vst [vmem:[#allocation57_spill] sm:$0xff] %v4513_v16  ;;  %7583 = vst [vmem:[#allocation58_spill] sm:$0xff] %v4515_v37  ;;  %v1337_v37 = vmul.f32 %v1335_v4, %v4465_v8 }
 0x15a   :  { %1320 = vrot.lane.b32.xlu1 %v1311_v42, %s3761_s2  ;;  %1318 = vrot.lane.b32.xlu0 %v1310_v15, %s3761_s2  ;;  %v1336_v42 = vmul.f32 %v1335_v4, %v4467_v61 }
 0x15c   :  { %v4521_v60 = vpop.permute.xlu1 %891  ;;  %v4523_v1 = vpop.permute.xlu0 %889 }
 0x15d   :  { %7584 = vst [vmem:[#allocation59_spill] sm:$0xff] %v4521_v60  ;;  %7585 = vst [vmem:[#allocation60_spill] sm:$0xff] %v4523_v1  ;;  %v1338_v1 = vmul.f32 %v1335_v4, %v4479_v47  ;;  %v1361_v60 = vstv %s3555_s27  ;;  %s3595_s27 = sld [smem:[#allocation6 + $0x47]] }
 0x15e   :  { %1324 = vrot.lane.b32.xlu1 %v1313_v49, %s3761_s2  ;;  %1322 = vrot.lane.b32.xlu0 %v1312_v51, %s3761_s2  ;;  %v1365_v4 = vmul.f32 %v1361_v60, %v4477_v9 }
 0x160   :  { %v4529_v16 = vpop.permute.xlu1 %895  ;;  %v4531_v15 = vpop.permute.xlu0 %893 }
 0x161   :  { %7586 = vst [vmem:[#allocation61_spill] sm:$0xff] %v4529_v16  ;;  %7587 = vst [vmem:[#allocation62_spill] sm:$0xff] %v4531_v15  ;;  %v1363_v15 = vmul.f32 %v1361_v60, %v4465_v8 }
 0x162   :  { %1346 = vrot.lane.b32.xlu1 %v1337_v37, %s3761_s2  ;;  %1344 = vrot.lane.b32.xlu0 %v1336_v42, %s3761_s2  ;;  %v1362_v37 = vmul.f32 %v1361_v60, %v4467_v61 }
 0x164   :  { %v4537_v49 = vpop.permute.xlu1 %917  ;;  %v4539_v51 = vpop.permute.xlu0 %915 }
 0x165   :  { %7588 = vst [vmem:[#allocation63_spill] sm:$0xff] %v4537_v49  ;;  %7589 = vst [vmem:[#allocation64_spill] sm:$0xff] %v4539_v51  ;;  %v1364_v51 = vmul.f32 %v1361_v60, %v4479_v47  ;;  %v1387_v49 = vstv %s3556_s28  ;;  %s3596_s28 = sld [smem:[#allocation6 + $0x62]] }
 0x166   :  { %1350 = vrot.lane.b32.xlu1 %v1339_v22, %s3761_s2  ;;  %1348 = vrot.lane.b32.xlu0 %v1338_v1, %s3761_s2  ;;  %v1391_v60 = vmul.f32 %v1387_v49, %v4477_v9 }
 0x168   :  { %v4545_v16 = vpop.permute.xlu1 %921  ;;  %v4547_v42 = vpop.permute.xlu0 %919 }
 0x169   :  { %7590 = vst [vmem:[#allocation65_spill] sm:$0xff] %v4545_v16  ;;  %7591 = vst [vmem:[#allocation66_spill] sm:$0xff] %v4547_v42  ;;  %v1389_v42 = vmul.f32 %v1387_v49, %v4465_v8 }
 0x16a   :  { %1372 = vrot.lane.b32.xlu1 %v1363_v15, %s3761_s2  ;;  %1370 = vrot.lane.b32.xlu0 %v1362_v37, %s3761_s2  ;;  %v1388_v15 = vmul.f32 %v1387_v49, %v4467_v61 }
 0x16c   :  { %v4553_v22 = vpop.permute.xlu1 %943  ;;  %v4555_v1 = vpop.permute.xlu0 %941 }
 0x16d   :  { %7592 = vst [vmem:[#allocation67_spill] sm:$0xff] %v4553_v22  ;;  %7593 = vst [vmem:[#allocation68_spill] sm:$0xff] %v4555_v1  ;;  %v1390_v1 = vmul.f32 %v1387_v49, %v4479_v47  ;;  %v1413_v22 = vstv %s3557_s29  ;;  %s3597_s29 = sld [smem:[#allocation6 + $0x7d]] }
 0x16e   :  { %1376 = vrot.lane.b32.xlu1 %v1365_v4, %s3761_s2  ;;  %1374 = vrot.lane.b32.xlu0 %v1364_v51, %s3761_s2  ;;  %v1417_v49 = vmul.f32 %v1413_v22, %v4477_v9 }
 0x170   :  { %v4561_v16 = vpop.permute.xlu1 %947  ;;  %v4563_v37 = vpop.permute.xlu0 %945 }
 0x171   :  { %7594 = vst [vmem:[#allocation69_spill] sm:$0xff] %v4561_v16  ;;  %7595 = vst [vmem:[#allocation70_spill] sm:$0xff] %v4563_v37  ;;  %v1415_v37 = vmul.f32 %v1413_v22, %v4465_v8 }
 0x172   :  { %1398 = vrot.lane.b32.xlu1 %v1389_v42, %s3761_s2  ;;  %1396 = vrot.lane.b32.xlu0 %v1388_v15, %s3761_s2  ;;  %v1414_v42 = vmul.f32 %v1413_v22, %v4467_v61 }
 0x174   :  { %v4569_v4 = vpop.permute.xlu1 %969  ;;  %v4571_v51 = vpop.permute.xlu0 %967 }
 0x175   :  { %7596 = vst [vmem:[#allocation71_spill] sm:$0xff] %v4569_v4  ;;  %7597 = vst [vmem:[#allocation72_spill] sm:$0xff] %v4571_v51  ;;  %v1416_v51 = vmul.f32 %v1413_v22, %v4479_v47  ;;  %v1439_v4 = vstv %s3558_s30  ;;  %s3598_s30 = sld [smem:[#allocation6 + $0x98]] }
 0x176   :  { %1402 = vrot.lane.b32.xlu1 %v1391_v60, %s3761_s2  ;;  %1400 = vrot.lane.b32.xlu0 %v1390_v1, %s3761_s2  ;;  %v1443_v22 = vmul.f32 %v1439_v4, %v4477_v9 }
 0x178   :  { %v4577_v16 = vpop.permute.xlu1 %973  ;;  %v4579_v15 = vpop.permute.xlu0 %971 }
 0x179   :  { %7598 = vst [vmem:[#allocation73_spill] sm:$0xff] %v4577_v16  ;;  %7599 = vst [vmem:[#allocation74_spill] sm:$0xff] %v4579_v15  ;;  %v1441_v15 = vmul.f32 %v1439_v4, %v4465_v8 }
 0x17a   :  { %1424 = vrot.lane.b32.xlu1 %v1415_v37, %s3762_s6  ;;  %1422 = vrot.lane.b32.xlu0 %v1414_v42, %s3762_s6  ;;  %v1440_v37 = vmul.f32 %v1439_v4, %v4467_v61 }
 0x17c   :  { %v4585_v60 = vpop.permute.xlu1 %995  ;;  %v4587_v1 = vpop.permute.xlu0 %993 }
 0x17d   :  { %7600 = vst [vmem:[#allocation75_spill] sm:$0xff] %v4585_v60  ;;  %7601 = vst [vmem:[#allocation76_spill] sm:$0xff] %v4587_v1  ;;  %v1442_v1 = vmul.f32 %v1439_v4, %v4479_v47  ;;  %v1465_v60 = vstv %s3559_s4  ;;  %s3605_s4 = sld [smem:[#allocation6 + $0x13]] }
 0x17e   :  { %1428 = vrot.lane.b32.xlu1 %v1417_v49, %s3762_s6  ;;  %1426 = vrot.lane.b32.xlu0 %v1416_v51, %s3762_s6  ;;  %v1469_v4 = vmul.f32 %v1465_v60, %v4477_v9 }
 0x180   :  { %v4593_v16 = vpop.permute.xlu1 %999  ;;  %v4595_v42 = vpop.permute.xlu0 %997 }
 0x181   :  { %7602 = vst [vmem:[#allocation77_spill] sm:$0xff] %v4593_v16  ;;  %7603 = vst [vmem:[#allocation78_spill] sm:$0xff] %v4595_v42  ;;  %v1467_v42 = vmul.f32 %v1465_v60, %v4465_v8 }
 0x182   :  { %1450 = vrot.lane.b32.xlu1 %v1441_v15, %s3762_s6  ;;  %1448 = vrot.lane.b32.xlu0 %v1440_v37, %s3762_s6  ;;  %v1466_v15 = vmul.f32 %v1465_v60, %v4467_v61 }
 0x184   :  { %v4601_v49 = vpop.permute.xlu1 %1021  ;;  %v4603_v51 = vpop.permute.xlu0 %1019 }
 0x185   :  { %7604 = vst [vmem:[#allocation79_spill] sm:$0xff] %v4601_v49  ;;  %7605 = vst [vmem:[#allocation80_spill] sm:$0xff] %v4603_v51  ;;  %v1468_v51 = vmul.f32 %v1465_v60, %v4479_v47  ;;  %v1491_v49 = vstv %s3560_s5  ;;  %s3606_s5 = sld [smem:[#allocation6 + $0x2e]] }
 0x186   :  { %1454 = vrot.lane.b32.xlu1 %v1443_v22, %s3762_s6  ;;  %1452 = vrot.lane.b32.xlu0 %v1442_v1, %s3762_s6  ;;  %v1495_v60 = vmul.f32 %v1491_v49, %v4477_v9 }
 0x188   :  { %v4609_v16 = vpop.permute.xlu1 %1025  ;;  %v4611_v37 = vpop.permute.xlu0 %1023 }
 0x189   :  { %7606 = vst [vmem:[#allocation81_spill] sm:$0xff] %v4609_v16  ;;  %7607 = vst [vmem:[#allocation82_spill] sm:$0xff] %v4611_v37  ;;  %v1493_v37 = vmul.f32 %v1491_v49, %v4465_v8 }
 0x18a   :  { %1476 = vrot.lane.b32.xlu1 %v1467_v42, %s3762_s6  ;;  %1474 = vrot.lane.b32.xlu0 %v1466_v15, %s3762_s6  ;;  %v1492_v42 = vmul.f32 %v1491_v49, %v4467_v61 }
 0x18c   :  { %v4617_v22 = vpop.permute.xlu1 %1047  ;;  %v4619_v1 = vpop.permute.xlu0 %1045 }
 0x18d   :  { %7608 = vst [vmem:[#allocation83_spill] sm:$0xff] %v4617_v22  ;;  %7609 = vst [vmem:[#allocation84_spill] sm:$0xff] %v4619_v1  ;;  %v1494_v1 = vmul.f32 %v1491_v49, %v4479_v47  ;;  %v1517_v22 = vstv %s3561_s7  ;;  %s3607_s7 = sld [smem:[#allocation6 + $0x49]] }
 0x18e   :  { %1480 = vrot.lane.b32.xlu1 %v1469_v4, %s3762_s6  ;;  %1478 = vrot.lane.b32.xlu0 %v1468_v51, %s3762_s6  ;;  %v1521_v49 = vmul.f32 %v1517_v22, %v4477_v9 }
 0x190   :  { %v4625_v16 = vpop.permute.xlu1 %1051  ;;  %v4627_v15 = vpop.permute.xlu0 %1049 }
 0x191   :  { %7610 = vst [vmem:[#allocation85_spill] sm:$0xff] %v4625_v16  ;;  %7611 = vst [vmem:[#allocation86_spill] sm:$0xff] %v4627_v15  ;;  %v1519_v15 = vmul.f32 %v1517_v22, %v4465_v8 }
 0x192   :  { %1502 = vrot.lane.b32.xlu1 %v1493_v37, %s3762_s6  ;;  %1500 = vrot.lane.b32.xlu0 %v1492_v42, %s3762_s6  ;;  %v1518_v37 = vmul.f32 %v1517_v22, %v4467_v61 }
 0x194   :  { %v4633_v4 = vpop.permute.xlu1 %1073  ;;  %v4635_v51 = vpop.permute.xlu0 %1071 }
 0x195   :  { %7612 = vst [vmem:[#allocation87_spill] sm:$0xff] %v4633_v4  ;;  %7613 = vst [vmem:[#allocation88_spill] sm:$0xff] %v4635_v51  ;;  %v1520_v51 = vmul.f32 %v1517_v22, %v4479_v47  ;;  %v1543_v4 = vstv %s3562_s8  ;;  %s3608_s8 = sld [smem:[#allocation6 + $0x64]] }
 0x196   :  { %1506 = vrot.lane.b32.xlu1 %v1495_v60, %s3762_s6  ;;  %1504 = vrot.lane.b32.xlu0 %v1494_v1, %s3762_s6  ;;  %v1547_v22 = vmul.f32 %v1543_v4, %v4477_v9 }
 0x198   :  { %v4641_v16 = vpop.permute.xlu1 %1077  ;;  %v4643_v42 = vpop.permute.xlu0 %1075 }
 0x199   :  { %7614 = vst [vmem:[#allocation89_spill] sm:$0xff] %v4641_v16  ;;  %7615 = vst [vmem:[#allocation90_spill] sm:$0xff] %v4643_v42  ;;  %v1545_v42 = vmul.f32 %v1543_v4, %v4465_v8 }
 0x19a   :  { %1528 = vrot.lane.b32.xlu1 %v1519_v15, %s3762_s6  ;;  %1526 = vrot.lane.b32.xlu0 %v1518_v37, %s3762_s6  ;;  %v1544_v15 = vmul.f32 %v1543_v4, %v4467_v61 }
 0x19c   :  { %v4649_v60 = vpop.permute.xlu1 %1099  ;;  %v4651_v1 = vpop.permute.xlu0 %1097 }
 0x19d   :  { %7616 = vst [vmem:[#allocation91_spill] sm:$0xff] %v4649_v60  ;;  %7617 = vst [vmem:[#allocation92_spill] sm:$0xff] %v4651_v1  ;;  %v1546_v1 = vmul.f32 %v1543_v4, %v4479_v47  ;;  %v4665_v60 = vld [vmem:[#allocation2 + $0x19] sm:$0x3f]  ;;  %v4679_v47 = vld [vmem:[#allocation2 + $0x41] sm:$0xff] }
 0x19e   :  { %1532 = vrot.lane.b32.xlu1 %v1521_v49, %s3762_s6  ;;  %1530 = vrot.lane.b32.xlu0 %v1520_v51, %s3762_s6  ;;  %v1633_v49 = vstv %s3569_s9  ;;  %v4667_v51 = vld [vmem:[#allocation2 + $0x11] sm:$0xff]  ;;  %s3609_s9 = sld [smem:[#allocation6 + $0x7f]] }
 0x19f   :  { %v1634_v9 = vmul.f32 %v1633_v49, %v4667_v51 }
 0x1a0   :  { %v4657_v16 = vpop.permute.xlu1 %1103  ;;  %v4659_v37 = vpop.permute.xlu0 %1101 }
 0x1a1   :  { %7618 = vst [vmem:[#allocation93_spill] sm:$0xff] %v4657_v16  ;;  %7619 = vst [vmem:[#allocation94_spill] sm:$0xff] %v4659_v37 }
 0x1a2   :  { %1554 = vrot.lane.b32.xlu1 %v1545_v42, %s3762_s6  ;;  %1552 = vrot.lane.b32.xlu0 %v1544_v15, %s3762_s6  ;;  %v1635_v42 = vmul.f32 %v1633_v49, %v4665_v60  ;;  %v4677_v15 = vld [vmem:[#allocation2 + $0x49] sm:$0x3f] }
 0x1a4   :  { %v4669_v8 = vpop.permute.xlu1 %1125  ;;  %v4671_v61 = vpop.permute.xlu0 %1123 }
 0x1a5   :  { %7620 = vst [vmem:[#allocation95_spill] sm:$0xff] %v4669_v8  ;;  %7621 = vst [vmem:[#allocation96_spill] sm:$0xff] %v4671_v61  ;;  %v1659_v61 = vstv %s3570_s10  ;;  %s3610_s10 = sld [smem:[#allocation6 + $0x9a]] }
 0x1a6   :  { %1558 = vrot.lane.b32.xlu1 %v1547_v22, %s3762_s6  ;;  %1556 = vrot.lane.b32.xlu0 %v1546_v1, %s3762_s6  ;;  %v1637_v22 = vmul.f32 %v1633_v49, %v4677_v15  ;;  %v1636_v1 = vmul.f32 %v1633_v49, %v4679_v47  ;;  %v1663_v49 = vmul.f32 %v1659_v61, %v4677_v15 }
 0x1a8   :  { %v4681_v4 = vpop.permute.xlu1 %1129  ;;  %v4683_v37 = vpop.permute.xlu0 %1127 }
 0x1a9   :  { %7622 = vst [vmem:[#allocation97_spill] sm:$0xff] %v4681_v4  ;;  %7623 = vst [vmem:[#allocation98_spill] sm:$0xff] %v4683_v37  ;;  %v1661_v37 = vmul.f32 %v1659_v61, %v4665_v60 }
 0x1aa   :  { %1644 = vrot.lane.b32.xlu1 %v1635_v42, %s3761_s2  ;;  %1642 = vrot.lane.b32.xlu0 %v1634_v9, %s3761_s2  ;;  %v1660_v42 = vmul.f32 %v1659_v61, %v4667_v51 }
 0x1ac   :  { %v4689_v8 = vpop.permute.xlu1 %1151  ;;  %v4691_v16 = vpop.permute.xlu0 %1149 }
 0x1ad   :  { %7624 = vst [vmem:[#allocation99_spill] sm:$0xff] %v4689_v8  ;;  %7625 = vst [vmem:[#allocation100_spill] sm:$0xff] %v4691_v16  ;;  %v1662_v16 = vmul.f32 %v1659_v61, %v4679_v47  ;;  %v1685_v8 = vstv %s3571_s11  ;;  %s3611_s11 = sld [smem:[#allocation6 + $0x14]] }
 0x1ae   :  { %1648 = vrot.lane.b32.xlu1 %v1637_v22, %s3761_s2  ;;  %1646 = vrot.lane.b32.xlu0 %v1636_v1, %s3761_s2  ;;  %v1689_v61 = vmul.f32 %v1685_v8, %v4677_v15 }
 0x1b0   :  { %v4697_v4 = vpop.permute.xlu1 %1155  ;;  %v4699_v9 = vpop.permute.xlu0 %1153 }
 0x1b1   :  { %7626 = vst [vmem:[#allocation101_spill] sm:$0xff] %v4697_v4  ;;  %7627 = vst [vmem:[#allocation102_spill] sm:$0xff] %v4699_v9  ;;  %v1687_v9 = vmul.f32 %v1685_v8, %v4665_v60 }
 0x1b2   :  { %1670 = vrot.lane.b32.xlu1 %v1661_v37, %s3761_s2  ;;  %1668 = vrot.lane.b32.xlu0 %v1660_v42, %s3761_s2  ;;  %v1686_v37 = vmul.f32 %v1685_v8, %v4667_v51 }
 0x1b4   :  { %v4705_v22 = vpop.permute.xlu1 %1177  ;;  %v4707_v1 = vpop.permute.xlu0 %1175 }
 0x1b5   :  { %7628 = vst [vmem:[#allocation103_spill] sm:$0xff] %v4705_v22  ;;  %7629 = vst [vmem:[#allocation104_spill] sm:$0xff] %v4707_v1  ;;  %v1688_v1 = vmul.f32 %v1685_v8, %v4679_v47  ;;  %v1711_v22 = vstv %s3572_s12  ;;  %s5153_s12 = sld [smem:[#allocation6 + $0x6]] }
 0x1b6   :  { %1674 = vrot.lane.b32.xlu1 %v1663_v49, %s3761_s2  ;;  %1672 = vrot.lane.b32.xlu0 %v1662_v16, %s3761_s2  ;;  %v1715_v8 = vmul.f32 %v1711_v22, %v4677_v15 }
 0x1b8   :  { %v4713_v4 = vpop.permute.xlu1 %1181  ;;  %v4715_v42 = vpop.permute.xlu0 %1179 }
 0x1b9   :  { %7630 = vst [vmem:[#allocation105_spill] sm:$0xff] %v4713_v4  ;;  %7631 = vst [vmem:[#allocation106_spill] sm:$0xff] %v4715_v42  ;;  %v1713_v42 = vmul.f32 %v1711_v22, %v4665_v60 }
 0x1ba   :  { %1696 = vrot.lane.b32.xlu1 %v1687_v9, %s3761_s2  ;;  %1694 = vrot.lane.b32.xlu0 %v1686_v37, %s3761_s2  ;;  %v1712_v9 = vmul.f32 %v1711_v22, %v4667_v51 }
 0x1bc   :  { %v4721_v49 = vpop.permute.xlu1 %1268  ;;  %v4723_v16 = vpop.permute.xlu0 %1266 }
 0x1bd   :  { %7632 = vst [vmem:[#allocation107_spill] sm:$0xff] %v4721_v49  ;;  %7633 = vst [vmem:[#allocation108_spill] sm:$0xff] %v4723_v16  ;;  %v1714_v16 = vmul.f32 %v1711_v22, %v4679_v47  ;;  %v1737_v49 = vstv %s3573_s13  ;;  %s5159_s13 = sld [smem:[#allocation6 + $0x21]] }
 0x1be   :  { %1700 = vrot.lane.b32.xlu1 %v1689_v61, %s3761_s2  ;;  %1698 = vrot.lane.b32.xlu0 %v1688_v1, %s3761_s2  ;;  %v1741_v22 = vmul.f32 %v1737_v49, %v4677_v15 }
 0x1c0   :  { %v4729_v4 = vpop.permute.xlu1 %1272  ;;  %v4731_v37 = vpop.permute.xlu0 %1270 }
 0x1c1   :  { %7634 = vst [vmem:[#allocation109_spill] sm:$0xff] %v4729_v4  ;;  %7635 = vst [vmem:[#allocation110_spill] sm:$0xff] %v4731_v37  ;;  %v1739_v37 = vmul.f32 %v1737_v49, %v4665_v60 }
 0x1c2   :  { %1722 = vrot.lane.b32.xlu1 %v1713_v42, %s3761_s2  ;;  %1720 = vrot.lane.b32.xlu0 %v1712_v9, %s3761_s2  ;;  %v1738_v42 = vmul.f32 %v1737_v49, %v4667_v51 }
 0x1c4   :  { %v4737_v61 = vpop.permute.xlu1 %1294  ;;  %v4739_v1 = vpop.permute.xlu0 %1292 }
 0x1c5   :  { %7636 = vst [vmem:[#allocation111_spill] sm:$0xff] %v4737_v61  ;;  %7637 = vst [vmem:[#allocation112_spill] sm:$0xff] %v4739_v1  ;;  %v1740_v1 = vmul.f32 %v1737_v49, %v4679_v47  ;;  %v1763_v61 = vstv %s3574_s14  ;;  %s5171_s14 = sld [smem:[#allocation6 + $0x3c]] }
 0x1c6   :  { %1726 = vrot.lane.b32.xlu1 %v1715_v8, %s3761_s2  ;;  %1724 = vrot.lane.b32.xlu0 %v1714_v16, %s3761_s2  ;;  %v1767_v49 = vmul.f32 %v1763_v61, %v4677_v15 }
 0x1c8   :  { %v4745_v4 = vpop.permute.xlu1 %1298  ;;  %v4747_v9 = vpop.permute.xlu0 %1296 }
 0x1c9   :  { %7638 = vst [vmem:[#allocation113_spill] sm:$0xff] %v4745_v4  ;;  %7639 = vst [vmem:[#allocation114_spill] sm:$0xff] %v4747_v9  ;;  %v1765_v9 = vmul.f32 %v1763_v61, %v4665_v60 }
 0x1ca   :  { %1748 = vrot.lane.b32.xlu1 %v1739_v37, %s3761_s2  ;;  %1746 = vrot.lane.b32.xlu0 %v1738_v42, %s3761_s2  ;;  %v1764_v37 = vmul.f32 %v1763_v61, %v4667_v51 }
 0x1cc   :  { %v4753_v8 = vpop.permute.xlu1 %1320  ;;  %v4755_v16 = vpop.permute.xlu0 %1318 }
 0x1cd   :  { %7640 = vst [vmem:[#allocation115_spill] sm:$0xff] %v4753_v8  ;;  %7641 = vst [vmem:[#allocation116_spill] sm:$0xff] %v4755_v16  ;;  %v1766_v16 = vmul.f32 %v1763_v61, %v4679_v47  ;;  %v1789_v8 = vstv %s3575_s15  ;;  %s5177_s15 = sld [smem:[#allocation6 + $0x57]] }
 0x1ce   :  { %1752 = vrot.lane.b32.xlu1 %v1741_v22, %s3761_s2  ;;  %1750 = vrot.lane.b32.xlu0 %v1740_v1, %s3761_s2  ;;  %v1793_v61 = vmul.f32 %v1789_v8, %v4677_v15 }
 0x1d0   :  { %v4761_v4 = vpop.permute.xlu1 %1324  ;;  %v4763_v42 = vpop.permute.xlu0 %1322 }
 0x1d1   :  { %7642 = vst [vmem:[#allocation117_spill] sm:$0xff] %v4761_v4  ;;  %7643 = vst [vmem:[#allocation118_spill] sm:$0xff] %v4763_v42  ;;  %v1791_v42 = vmul.f32 %v1789_v8, %v4665_v60 }
 0x1d2   :  { %1774 = vrot.lane.b32.xlu1 %v1765_v9, %s3761_s2  ;;  %1772 = vrot.lane.b32.xlu0 %v1764_v37, %s3761_s2  ;;  %v1790_v9 = vmul.f32 %v1789_v8, %v4667_v51 }
 0x1d4   :  { %v4769_v22 = vpop.permute.xlu1 %1346  ;;  %v4771_v1 = vpop.permute.xlu0 %1344 }
 0x1d5   :  { %7644 = vst [vmem:[#allocation119_spill] sm:$0xff] %v4769_v22  ;;  %7645 = vst [vmem:[#allocation120_spill] sm:$0xff] %v4771_v1  ;;  %v1792_v1 = vmul.f32 %v1789_v8, %v4679_v47  ;;  %v1815_v22 = vstv %s3576_s16  ;;  %s5186_s16 = sld [smem:[#allocation6 + $0x2f]] }
 0x1d6   :  { %1778 = vrot.lane.b32.xlu1 %v1767_v49, %s3761_s2  ;;  %1776 = vrot.lane.b32.xlu0 %v1766_v16, %s3761_s2  ;;  %v1819_v8 = vmul.f32 %v1815_v22, %v4677_v15 }
 0x1d8   :  { %v4777_v4 = vpop.permute.xlu1 %1350  ;;  %v4779_v37 = vpop.permute.xlu0 %1348 }
 0x1d9   :  { %7646 = vst [vmem:[#allocation121_spill] sm:$0xff] %v4777_v4  ;;  %7647 = vst [vmem:[#allocation122_spill] sm:$0xff] %v4779_v37  ;;  %v1817_v37 = vmul.f32 %v1815_v22, %v4665_v60 }
 0x1da   :  { %1800 = vrot.lane.b32.xlu1 %v1791_v42, %s3762_s6  ;;  %1798 = vrot.lane.b32.xlu0 %v1790_v9, %s3762_s6  ;;  %v1816_v42 = vmul.f32 %v1815_v22, %v4667_v51 }
 0x1dc   :  { %v4785_v49 = vpop.permute.xlu1 %1372  ;;  %v4787_v16 = vpop.permute.xlu0 %1370 }
 0x1dd   :  { %7648 = vst [vmem:[#allocation123_spill] sm:$0xff] %v4785_v49  ;;  %7649 = vst [vmem:[#allocation124_spill] sm:$0xff] %v4787_v16  ;;  %v1818_v16 = vmul.f32 %v1815_v22, %v4679_v47  ;;  %v1841_v49 = vstv %s3577_s17  ;;  %s5192_s17 = sld [smem:[#allocation6 + $0x72]] }
 0x1de   :  { %1804 = vrot.lane.b32.xlu1 %v1793_v61, %s3762_s6  ;;  %1802 = vrot.lane.b32.xlu0 %v1792_v1, %s3762_s6  ;;  %v1845_v22 = vmul.f32 %v1841_v49, %v4677_v15 }
 0x1e0   :  { %v4793_v4 = vpop.permute.xlu1 %1376  ;;  %v4795_v9 = vpop.permute.xlu0 %1374 }
 0x1e1   :  { %7650 = vst [vmem:[#allocation125_spill] sm:$0xff] %v4793_v4  ;;  %7651 = vst [vmem:[#allocation126_spill] sm:$0xff] %v4795_v9  ;;  %v1843_v9 = vmul.f32 %v1841_v49, %v4665_v60 }
 0x1e2   :  { %1826 = vrot.lane.b32.xlu1 %v1817_v37, %s3762_s6  ;;  %1824 = vrot.lane.b32.xlu0 %v1816_v42, %s3762_s6  ;;  %v1842_v37 = vmul.f32 %v1841_v49, %v4667_v51 }
 0x1e4   :  { %v4801_v61 = vpop.permute.xlu1 %1398  ;;  %v4803_v1 = vpop.permute.xlu0 %1396 }
 0x1e5   :  { %7652 = vst [vmem:[#allocation127_spill] sm:$0xff] %v4801_v61  ;;  %7653 = vst [vmem:[#allocation128_spill] sm:$0xff] %v4803_v1  ;;  %v1844_v1 = vmul.f32 %v1841_v49, %v4679_v47  ;;  %v1867_v61 = vstv %s3578_s18  ;;  %s5225_s18 = sld [smem:[#allocation6 + $0x8d]] }
 0x1e6   :  { %1830 = vrot.lane.b32.xlu1 %v1819_v8, %s3762_s6  ;;  %1828 = vrot.lane.b32.xlu0 %v1818_v16, %s3762_s6  ;;  %v1871_v49 = vmul.f32 %v1867_v61, %v4677_v15 }
 0x1e8   :  { %v4809_v4 = vpop.permute.xlu1 %1402  ;;  %v4811_v42 = vpop.permute.xlu0 %1400 }
 0x1e9   :  { %7654 = vst [vmem:[#allocation129_spill] sm:$0xff] %v4809_v4  ;;  %7655 = vst [vmem:[#allocation130_spill] sm:$0xff] %v4811_v42  ;;  %v1869_v42 = vmul.f32 %v1867_v61, %v4665_v60 }
 0x1ea   :  { %1852 = vrot.lane.b32.xlu1 %v1843_v9, %s3762_s6  ;;  %1850 = vrot.lane.b32.xlu0 %v1842_v37, %s3762_s6  ;;  %v1868_v9 = vmul.f32 %v1867_v61, %v4667_v51 }
 0x1ec   :  { %v4817_v8 = vpop.permute.xlu1 %1424  ;;  %v4819_v16 = vpop.permute.xlu0 %1422 }
 0x1ed   :  { %7656 = vst [vmem:[#allocation131_spill] sm:$0xff] %v4817_v8  ;;  %7657 = vst [vmem:[#allocation132_spill] sm:$0xff] %v4819_v16  ;;  %v1870_v16 = vmul.f32 %v1867_v61, %v4679_v47  ;;  %v1893_v8 = vstv %s3579_s19  ;;  %s5258_s19 = sld [smem:[#allocation6 + $0x4a]] }
 0x1ee   :  { %1856 = vrot.lane.b32.xlu1 %v1845_v22, %s3762_s6  ;;  %1854 = vrot.lane.b32.xlu0 %v1844_v1, %s3762_s6  ;;  %v1897_v61 = vmul.f32 %v1893_v8, %v4677_v15 }
 0x1f0   :  { %v4825_v4 = vpop.permute.xlu1 %1428  ;;  %v4827_v37 = vpop.permute.xlu0 %1426 }
 0x1f1   :  { %7658 = vst [vmem:[#allocation133_spill] sm:$0xff] %v4825_v4  ;;  %7659 = vst [vmem:[#allocation134_spill] sm:$0xff] %v4827_v37  ;;  %v1895_v37 = vmul.f32 %v1893_v8, %v4665_v60 }
 0x1f2   :  { %1878 = vrot.lane.b32.xlu1 %v1869_v42, %s3762_s6  ;;  %1876 = vrot.lane.b32.xlu0 %v1868_v9, %s3762_s6  ;;  %v1894_v42 = vmul.f32 %v1893_v8, %v4667_v51 }
 0x1f4   :  { %v4833_v22 = vpop.permute.xlu1 %1450  ;;  %v4835_v1 = vpop.permute.xlu0 %1448 }
 0x1f5   :  { %7660 = vst [vmem:[#allocation135_spill] sm:$0xff] %v4833_v22  ;;  %7661 = vst [vmem:[#allocation136_spill] sm:$0xff] %v4835_v1  ;;  %v1896_v1 = vmul.f32 %v1893_v8, %v4679_v47  ;;  %v1919_v22 = vstv %s3580_s20  ;;  %s5276_s20 = sld [smem:[#allocation6 + $0x9]] }
 0x1f6   :  { %1882 = vrot.lane.b32.xlu1 %v1871_v49, %s3762_s6  ;;  %1880 = vrot.lane.b32.xlu0 %v1870_v16, %s3762_s6  ;;  %v1923_v8 = vmul.f32 %v1919_v22, %v4677_v15 }
 0x1f8   :  { %v4841_v4 = vpop.permute.xlu1 %1454  ;;  %v4843_v9 = vpop.permute.xlu0 %1452 }
 0x1f9   :  { %7662 = vst [vmem:[#allocation137_spill] sm:$0xff] %v4841_v4  ;;  %7663 = vst [vmem:[#allocation138_spill] sm:$0xff] %v4843_v9  ;;  %v1921_v9 = vmul.f32 %v1919_v22, %v4665_v60 }
 0x1fa   :  { %1904 = vrot.lane.b32.xlu1 %v1895_v37, %s3762_s6  ;;  %1902 = vrot.lane.b32.xlu0 %v1894_v42, %s3762_s6  ;;  %v1920_v37 = vmul.f32 %v1919_v22, %v4667_v51 }
 0x1fc   :  { %v4849_v49 = vpop.permute.xlu1 %1476  ;;  %v4851_v16 = vpop.permute.xlu0 %1474 }
 0x1fd   :  { %7664 = vst [vmem:[#allocation139_spill] sm:$0xff] %v4849_v49  ;;  %7665 = vst [vmem:[#allocation140_spill] sm:$0xff] %v4851_v16  ;;  %v1922_v16 = vmul.f32 %v1919_v22, %v4679_v47  ;;  %v4865_v49 = vld [vmem:[#allocation2 + $0x1a] sm:$0x3f]  ;;  %v4879_v47 = vld [vmem:[#allocation2 + $0x42] sm:$0xff] }
 0x1fe   :  { %1908 = vrot.lane.b32.xlu1 %v1897_v61, %s3762_s6  ;;  %1906 = vrot.lane.b32.xlu0 %v1896_v1, %s3762_s6  ;;  %v2009_v61 = vstv %s3587_s21  ;;  %v4867_v1 = vld [vmem:[#allocation2 + $0x12] sm:$0xff]  ;;  %s5305_s21 = sld [smem:[#allocation6 + $0x24]] }
 0x1ff   :  { %v2010_v15 = vmul.f32 %v2009_v61, %v4867_v1 }
 0x200   :  { %v4857_v4 = vpop.permute.xlu1 %1480  ;;  %v4859_v42 = vpop.permute.xlu0 %1478 }
 0x201   :  { %7666 = vst [vmem:[#allocation141_spill] sm:$0xff] %v4857_v4  ;;  %7667 = vst [vmem:[#allocation142_spill] sm:$0xff] %v4859_v42 }
 0x202   :  { %1930 = vrot.lane.b32.xlu1 %v1921_v9, %s3762_s6  ;;  %1928 = vrot.lane.b32.xlu0 %v1920_v37, %s3762_s6  ;;  %v2011_v9 = vmul.f32 %v2009_v61, %v4865_v49  ;;  %v4877_v37 = vld [vmem:[#allocation2 + $0x4a] sm:$0x3f] }
 0x204   :  { %v4869_v60 = vpop.permute.xlu1 %1502  ;;  %v4871_v51 = vpop.permute.xlu0 %1500 }
 0x205   :  { %7668 = vst [vmem:[#allocation143_spill] sm:$0xff] %v4869_v60  ;;  %7669 = vst [vmem:[#allocation144_spill] sm:$0xff] %v4871_v51  ;;  %v2035_v51 = vstv %s3588_s22  ;;  %s5320_s22 = sld [smem:[#allocation6 + $0x65]] }
 0x206   :  { %1934 = vrot.lane.b32.xlu1 %v1923_v8, %s3762_s6  ;;  %1932 = vrot.lane.b32.xlu0 %v1922_v16, %s3762_s6  ;;  %v2013_v8 = vmul.f32 %v2009_v61, %v4877_v37  ;;  %v2012_v16 = vmul.f32 %v2009_v61, %v4879_v47  ;;  %v2039_v61 = vmul.f32 %v2035_v51, %v4877_v37 }
 0x208   :  { %v4881_v22 = vpop.permute.xlu1 %1506  ;;  %v4883_v42 = vpop.permute.xlu0 %1504 }
 0x209   :  { %7670 = vst [vmem:[#allocation145_spill] sm:$0xff] %v4881_v22  ;;  %7671 = vst [vmem:[#allocation146_spill] sm:$0xff] %v4883_v42  ;;  %v2037_v42 = vmul.f32 %v2035_v51, %v4865_v49 }
 0x20a   :  { %2020 = vrot.lane.b32.xlu1 %v2011_v9, %s3761_s2  ;;  %2018 = vrot.lane.b32.xlu0 %v2010_v15, %s3761_s2  ;;  %v2036_v9 = vmul.f32 %v2035_v51, %v4867_v1 }
 0x20c   :  { %v4889_v60 = vpop.permute.xlu1 %1528  ;;  %v4891_v4 = vpop.permute.xlu0 %1526 }
 0x20d   :  { %7672 = vst [vmem:[#allocation147_spill] sm:$0xff] %v4889_v60  ;;  %7673 = vst [vmem:[#allocation148_spill] sm:$0xff] %v4891_v4  ;;  %v2038_v4 = vmul.f32 %v2035_v51, %v4879_v47  ;;  %v2061_v60 = vstv %s3589_s23  ;;  %s5326_s23 = sld [smem:[#allocation6 + $0x3f]] }
 0x20e   :  { %2024 = vrot.lane.b32.xlu1 %v2013_v8, %s3761_s2  ;;  %2022 = vrot.lane.b32.xlu0 %v2012_v16, %s3761_s2  ;;  %v2065_v51 = vmul.f32 %v2061_v60, %v4877_v37 }
 0x210   :  { %v4897_v22 = vpop.permute.xlu1 %1532  ;;  %v4899_v15 = vpop.permute.xlu0 %1530 }
 0x211   :  { %7674 = vst [vmem:[#allocation149_spill] sm:$0xff] %v4897_v22  ;;  %7675 = vst [vmem:[#allocation150_spill] sm:$0xff] %v4899_v15  ;;  %v2063_v15 = vmul.f32 %v2061_v60, %v4865_v49 }
 0x212   :  { %2046 = vrot.lane.b32.xlu1 %v2037_v42, %s3761_s2  ;;  %2044 = vrot.lane.b32.xlu0 %v2036_v9, %s3761_s2  ;;  %v2062_v42 = vmul.f32 %v2061_v60, %v4867_v1 }
 0x214   :  { %v4905_v8 = vpop.permute.xlu1 %1554  ;;  %v4907_v16 = vpop.permute.xlu0 %1552 }
 0x215   :  { %7676 = vst [vmem:[#allocation151_spill] sm:$0xff] %v4905_v8  ;;  %7677 = vst [vmem:[#allocation152_spill] sm:$0xff] %v4907_v16  ;;  %v2064_v16 = vmul.f32 %v2061_v60, %v4879_v47  ;;  %v2087_v8 = vstv %s3590_s24  ;;  %s5347_s24 = sld [smem:[#allocation6 + $0x5a]] }
 0x216   :  { %2050 = vrot.lane.b32.xlu1 %v2039_v61, %s3761_s2  ;;  %2048 = vrot.lane.b32.xlu0 %v2038_v4, %s3761_s2  ;;  %v2091_v60 = vmul.f32 %v2087_v8, %v4877_v37 }
 0x218   :  { %v4913_v22 = vpop.permute.xlu1 %1558  ;;  %v4915_v9 = vpop.permute.xlu0 %1556 }
 0x219   :  { %7678 = vst [vmem:[#allocation153_spill] sm:$0xff] %v4913_v22  ;;  %7679 = vst [vmem:[#allocation154_spill] sm:$0xff] %v4915_v9  ;;  %v2089_v9 = vmul.f32 %v2087_v8, %v4865_v49 }
 0x21a   :  { %2072 = vrot.lane.b32.xlu1 %v2063_v15, %s3761_s2  ;;  %2070 = vrot.lane.b32.xlu0 %v2062_v42, %s3761_s2  ;;  %v2088_v15 = vmul.f32 %v2087_v8, %v4867_v1 }
 0x21c   :  { %v4921_v61 = vpop.permute.xlu1 %1644  ;;  %v4923_v4 = vpop.permute.xlu0 %1642 }
 0x21d   :  { %7680 = vst [vmem:[#allocation155_spill] sm:$0xff] %v4921_v61  ;;  %7681 = vst [vmem:[#allocation156_spill] sm:$0xff] %v4923_v4  ;;  %v2090_v4 = vmul.f32 %v2087_v8, %v4879_v47  ;;  %v2113_v61 = vstv %s3591_s25  ;;  %s5402_s25 = sld [smem:[#allocation6 + $0x75]] }
 0x21e   :  { %2076 = vrot.lane.b32.xlu1 %v2065_v51, %s3761_s2  ;;  %2074 = vrot.lane.b32.xlu0 %v2064_v16, %s3761_s2  ;;  %v2117_v8 = vmul.f32 %v2113_v61, %v4877_v37 }
 0x220   :  { %v4929_v22 = vpop.permute.xlu1 %1648  ;;  %v4931_v42 = vpop.permute.xlu0 %1646 }
 0x221   :  { %7682 = vst [vmem:[#allocation157_spill] sm:$0xff] %v4929_v22  ;;  %7683 = vst [vmem:[#allocation158_spill] sm:$0xff] %v4931_v42  ;;  %v2115_v42 = vmul.f32 %v2113_v61, %v4865_v49 }
 0x222   :  { %2098 = vrot.lane.b32.xlu1 %v2089_v9, %s3761_s2  ;;  %2096 = vrot.lane.b32.xlu0 %v2088_v15, %s3761_s2  ;;  %v2114_v9 = vmul.f32 %v2113_v61, %v4867_v1 }
 0x224   :  { %v4937_v51 = vpop.permute.xlu1 %1670  ;;  %v4939_v16 = vpop.permute.xlu0 %1668 }
 0x225   :  { %7684 = vst [vmem:[#allocation159_spill] sm:$0xff] %v4937_v51  ;;  %7685 = vst [vmem:[#allocation160_spill] sm:$0xff] %v4939_v16  ;;  %v2116_v16 = vmul.f32 %v2113_v61, %v4879_v47  ;;  %v2139_v51 = vstv %s3592_s26  ;;  %s5427_s26 = sld [smem:[#allocation6 + $0x80]] }
 0x226   :  { %2102 = vrot.lane.b32.xlu1 %v2091_v60, %s3761_s2  ;;  %2100 = vrot.lane.b32.xlu0 %v2090_v4, %s3761_s2  ;;  %v2143_v61 = vmul.f32 %v2139_v51, %v4877_v37 }
 0x228   :  { %v4945_v22 = vpop.permute.xlu1 %1674  ;;  %v4947_v15 = vpop.permute.xlu0 %1672 }
 0x229   :  { %7686 = vst [vmem:[#allocation161_spill] sm:$0xff] %v4945_v22  ;;  %7687 = vst [vmem:[#allocation162_spill] sm:$0xff] %v4947_v15  ;;  %v2141_v15 = vmul.f32 %v2139_v51, %v4865_v49 }
 0x22a   :  { %2124 = vrot.lane.b32.xlu1 %v2115_v42, %s3761_s2  ;;  %2122 = vrot.lane.b32.xlu0 %v2114_v9, %s3761_s2  ;;  %v2140_v42 = vmul.f32 %v2139_v51, %v4867_v1 }
 0x22c   :  { %v4953_v60 = vpop.permute.xlu1 %1696  ;;  %v4955_v4 = vpop.permute.xlu0 %1694 }
 0x22d   :  { %7688 = vst [vmem:[#allocation163_spill] sm:$0xff] %v4953_v60  ;;  %7689 = vst [vmem:[#allocation164_spill] sm:$0xff] %v4955_v4  ;;  %v2142_v4 = vmul.f32 %v2139_v51, %v4879_v47  ;;  %v2165_v60 = vstv %s3593_s0  ;;  %s5462_s0 = sld [smem:[#allocation6 + $0x90]] }
 0x22e   :  { %2128 = vrot.lane.b32.xlu1 %v2117_v8, %s3761_s2  ;;  %2126 = vrot.lane.b32.xlu0 %v2116_v16, %s3761_s2  ;;  %v2169_v51 = vmul.f32 %v2165_v60, %v4877_v37 }
 0x230   :  { %v4961_v22 = vpop.permute.xlu1 %1700  ;;  %v4963_v9 = vpop.permute.xlu0 %1698 }
 0x231   :  { %7690 = vst [vmem:[#allocation165_spill] sm:$0xff] %v4961_v22  ;;  %7691 = vst [vmem:[#allocation166_spill] sm:$0xff] %v4963_v9  ;;  %v2167_v9 = vmul.f32 %v2165_v60, %v4865_v49 }
 0x232   :  { %2150 = vrot.lane.b32.xlu1 %v2141_v15, %s3761_s2  ;;  %2148 = vrot.lane.b32.xlu0 %v2140_v42, %s3761_s2  ;;  %v2166_v15 = vmul.f32 %v2165_v60, %v4867_v1 }
 0x234   :  { %v4969_v8 = vpop.permute.xlu1 %1722  ;;  %v4971_v16 = vpop.permute.xlu0 %1720 }
 0x235   :  { %7692 = vst [vmem:[#allocation167_spill] sm:$0xff] %v4969_v8  ;;  %7693 = vst [vmem:[#allocation168_spill] sm:$0xff] %v4971_v16  ;;  %v2168_v16 = vmul.f32 %v2165_v60, %v4879_v47  ;;  %v2191_v8 = vstv %s3594_s1  ;;  %s5523_s1 = sld [smem:[#allocation6 + $0x9b]] }
 0x236   :  { %2154 = vrot.lane.b32.xlu1 %v2143_v61, %s3761_s2  ;;  %2152 = vrot.lane.b32.xlu0 %v2142_v4, %s3761_s2  ;;  %v2195_v60 = vmul.f32 %v2191_v8, %v4877_v37 }
 0x238   :  { %v4977_v22 = vpop.permute.xlu1 %1726  ;;  %v4979_v42 = vpop.permute.xlu0 %1724 }
 0x239   :  { %7694 = vst [vmem:[#allocation169_spill] sm:$0xff] %v4977_v22  ;;  %7695 = vst [vmem:[#allocation170_spill] sm:$0xff] %v4979_v42  ;;  %v2193_v42 = vmul.f32 %v2191_v8, %v4865_v49 }
 0x23a   :  { %2176 = vrot.lane.b32.xlu1 %v2167_v9, %s3762_s6  ;;  %2174 = vrot.lane.b32.xlu0 %v2166_v15, %s3762_s6  ;;  %v2192_v9 = vmul.f32 %v2191_v8, %v4867_v1 }
 0x23c   :  { %v4985_v61 = vpop.permute.xlu1 %1748  ;;  %v4987_v4 = vpop.permute.xlu0 %1746 }
 0x23d   :  { %7696 = vst [vmem:[#allocation171_spill] sm:$0xff] %v4985_v61  ;;  %7697 = vst [vmem:[#allocation172_spill] sm:$0xff] %v4987_v4  ;;  %v2194_v4 = vmul.f32 %v2191_v8, %v4879_v47  ;;  %v2217_v61 = vstv %s3595_s27  ;;  %s5611_s27 = sld [smem:[#allocation6 + $0x16]] }
 0x23e   :  { %2180 = vrot.lane.b32.xlu1 %v2169_v51, %s3762_s6  ;;  %2178 = vrot.lane.b32.xlu0 %v2168_v16, %s3762_s6  ;;  %v2221_v8 = vmul.f32 %v2217_v61, %v4877_v37 }
 0x240   :  { %v4993_v22 = vpop.permute.xlu1 %1752  ;;  %v4995_v15 = vpop.permute.xlu0 %1750 }
 0x241   :  { %7698 = vst [vmem:[#allocation173_spill] sm:$0xff] %v4993_v22  ;;  %7699 = vst [vmem:[#allocation174_spill] sm:$0xff] %v4995_v15  ;;  %v2219_v15 = vmul.f32 %v2217_v61, %v4865_v49 }
 0x242   :  { %2202 = vrot.lane.b32.xlu1 %v2193_v42, %s3762_s6  ;;  %2200 = vrot.lane.b32.xlu0 %v2192_v9, %s3762_s6  ;;  %v2218_v42 = vmul.f32 %v2217_v61, %v4867_v1 }
 0x244   :  { %v5001_v51 = vpop.permute.xlu1 %1774  ;;  %v5003_v16 = vpop.permute.xlu0 %1772 }
 0x245   :  { %7700 = vst [vmem:[#allocation175_spill] sm:$0xff] %v5001_v51  ;;  %7701 = vst [vmem:[#allocation176_spill] sm:$0xff] %v5003_v16  ;;  %v2220_v16 = vmul.f32 %v2217_v61, %v4879_v47  ;;  %v2243_v51 = vstv %s3596_s28  ;;  %s5638_s28 = sld [smem:[#allocation6 + $0xc]] }
 0x246   :  { %2206 = vrot.lane.b32.xlu1 %v2195_v60, %s3762_s6  ;;  %2204 = vrot.lane.b32.xlu0 %v2194_v4, %s3762_s6  ;;  %v2247_v61 = vmul.f32 %v2243_v51, %v4877_v37 }
 0x248   :  { %v5009_v22 = vpop.permute.xlu1 %1778  ;;  %v5011_v9 = vpop.permute.xlu0 %1776 }
 0x249   :  { %7702 = vst [vmem:[#allocation177_spill] sm:$0xff] %v5009_v22  ;;  %7703 = vst [vmem:[#allocation178_spill] sm:$0xff] %v5011_v9  ;;  %v2245_v9 = vmul.f32 %v2243_v51, %v4865_v49 }
 0x24a   :  { %2228 = vrot.lane.b32.xlu1 %v2219_v15, %s3762_s6  ;;  %2226 = vrot.lane.b32.xlu0 %v2218_v42, %s3762_s6  ;;  %v2244_v15 = vmul.f32 %v2243_v51, %v4867_v1 }
 0x24c   :  { %v5017_v60 = vpop.permute.xlu1 %1800  ;;  %v5019_v4 = vpop.permute.xlu0 %1798 }
 0x24d   :  { %7704 = vst [vmem:[#allocation179_spill] sm:$0xff] %v5017_v60  ;;  %7705 = vst [vmem:[#allocation180_spill] sm:$0xff] %v5019_v4  ;;  %v2246_v4 = vmul.f32 %v2243_v51, %v4879_v47  ;;  %v2269_v60 = vstv %s3597_s29  ;;  %s5670_s29 = sld [smem:[#allocation6 + $0x27]] }
 0x24e   :  { %2232 = vrot.lane.b32.xlu1 %v2221_v8, %s3762_s6  ;;  %2230 = vrot.lane.b32.xlu0 %v2220_v16, %s3762_s6  ;;  %v2273_v51 = vmul.f32 %v2269_v60, %v4877_v37 }
 0x250   :  { %v5025_v22 = vpop.permute.xlu1 %1804  ;;  %v5027_v42 = vpop.permute.xlu0 %1802 }
 0x251   :  { %7706 = vst [vmem:[#allocation181_spill] sm:$0xff] %v5025_v22  ;;  %7707 = vst [vmem:[#allocation182_spill] sm:$0xff] %v5027_v42  ;;  %v2271_v42 = vmul.f32 %v2269_v60, %v4865_v49 }
 0x252   :  { %2254 = vrot.lane.b32.xlu1 %v2245_v9, %s3762_s6  ;;  %2252 = vrot.lane.b32.xlu0 %v2244_v15, %s3762_s6  ;;  %v2270_v9 = vmul.f32 %v2269_v60, %v4867_v1 }
 0x254   :  { %v5033_v8 = vpop.permute.xlu1 %1826  ;;  %v5035_v16 = vpop.permute.xlu0 %1824 }
 0x255   :  { %7708 = vst [vmem:[#allocation183_spill] sm:$0xff] %v5033_v8  ;;  %7709 = vst [vmem:[#allocation184_spill] sm:$0xff] %v5035_v16  ;;  %v2272_v16 = vmul.f32 %v2269_v60, %v4879_v47  ;;  %v2295_v8 = vstv %s3598_s30  ;;  %s5691_s30 = sld [smem:[#allocation6 + $0x31]] }
 0x256   :  { %2258 = vrot.lane.b32.xlu1 %v2247_v61, %s3762_s6  ;;  %2256 = vrot.lane.b32.xlu0 %v2246_v4, %s3762_s6  ;;  %v2299_v60 = vmul.f32 %v2295_v8, %v4877_v37 }
 0x258   :  { %v5041_v22 = vpop.permute.xlu1 %1830  ;;  %v5043_v15 = vpop.permute.xlu0 %1828 }
 0x259   :  { %7710 = vst [vmem:[#allocation185_spill] sm:$0xff] %v5041_v22  ;;  %7711 = vst [vmem:[#allocation186_spill] sm:$0xff] %v5043_v15  ;;  %v2297_v15 = vmul.f32 %v2295_v8, %v4865_v49 }
 0x25a   :  { %2280 = vrot.lane.b32.xlu1 %v2271_v42, %s3762_s6  ;;  %2278 = vrot.lane.b32.xlu0 %v2270_v9, %s3762_s6  ;;  %v2296_v42 = vmul.f32 %v2295_v8, %v4867_v1 }
 0x25c   :  { %v5049_v61 = vpop.permute.xlu1 %1852  ;;  %v5051_v4 = vpop.permute.xlu0 %1850 }
 0x25d   :  { %7712 = vst [vmem:[#allocation187_spill] sm:$0xff] %v5049_v61  ;;  %7713 = vst [vmem:[#allocation188_spill] sm:$0xff] %v5051_v4  ;;  %v2298_v4 = vmul.f32 %v2295_v8, %v4879_v47  ;;  %v5065_v61 = vld [vmem:[#allocation2 + $0x28] sm:$0x3f]  ;;  %v5079_v47 = vld [vmem:[#allocation2 + $0x50] sm:$0xff] }
 0x25e   :  { %2284 = vrot.lane.b32.xlu1 %v2273_v51, %s3762_s6  ;;  %2282 = vrot.lane.b32.xlu0 %v2272_v16, %s3762_s6  ;;  %v2386_v51 = vstv %s3605_s4  ;;  %v5067_v16 = vld [vmem:[#allocation2 + $0x20] sm:$0xff]  ;;  %s5705_s4 = sld [smem:[#allocation6 + $0x42]] }
 0x25f   :  { %v2387_v37 = vmul.f32 %v2386_v51, %v5067_v16 }
 0x260   :  { %v5057_v22 = vpop.permute.xlu1 %1856  ;;  %v5059_v9 = vpop.permute.xlu0 %1854 }
 0x261   :  { %7714 = vst [vmem:[#allocation189_spill] sm:$0xff] %v5057_v22  ;;  %7715 = vst [vmem:[#allocation190_spill] sm:$0xff] %v5059_v9 }
 0x262   :  { %2306 = vrot.lane.b32.xlu1 %v2297_v15, %s3762_s6  ;;  %2304 = vrot.lane.b32.xlu0 %v2296_v42, %s3762_s6  ;;  %v2388_v15 = vmul.f32 %v2386_v51, %v5065_v61  ;;  %v5077_v42 = vld [vmem:[#allocation2 + $0x58] sm:$0x3f] }
 0x264   :  { %v5069_v49 = vpop.permute.xlu1 %1878  ;;  %v5071_v1 = vpop.permute.xlu0 %1876 }
 0x265   :  { %7716 = vst [vmem:[#allocation191_spill] sm:$0xff] %v5069_v49  ;;  %7717 = vst [vmem:[#allocation192_spill] sm:$0xff] %v5071_v1  ;;  %v2412_v1 = vstv %s3606_s5  ;;  %s5727_s5 = sld [smem:[#allocation6 + $0x5d]] }
 0x266   :  { %2310 = vrot.lane.b32.xlu1 %v2299_v60, %s3762_s6  ;;  %2308 = vrot.lane.b32.xlu0 %v2298_v4, %s3762_s6  ;;  %v2390_v60 = vmul.f32 %v2386_v51, %v5077_v42  ;;  %v2389_v4 = vmul.f32 %v2386_v51, %v5079_v47  ;;  %v2416_v51 = vmul.f32 %v2412_v1, %v5077_v42 }
 0x268   :  { %v5081_v8 = vpop.permute.xlu1 %1882  ;;  %v5083_v9 = vpop.permute.xlu0 %1880 }
 0x269   :  { %7718 = vst [vmem:[#allocation193_spill] sm:$0xff] %v5081_v8  ;;  %7719 = vst [vmem:[#allocation194_spill] sm:$0xff] %v5083_v9  ;;  %v2414_v9 = vmul.f32 %v2412_v1, %v5065_v61 }
 0x26a   :  { %2397 = vrot.lane.b32.xlu1 %v2388_v15, %s3761_s2  ;;  %2395 = vrot.lane.b32.xlu0 %v2387_v37, %s3761_s2  ;;  %v2413_v15 = vmul.f32 %v2412_v1, %v5067_v16 }
 0x26c   :  { %v5089_v49 = vpop.permute.xlu1 %1904  ;;  %v5091_v22 = vpop.permute.xlu0 %1902 }
 0x26d   :  { %7720 = vst [vmem:[#allocation195_spill] sm:$0xff] %v5089_v49  ;;  %7721 = vst [vmem:[#allocation196_spill] sm:$0xff] %v5091_v22  ;;  %v2415_v22 = vmul.f32 %v2412_v1, %v5079_v47  ;;  %v2438_v49 = vstv %s3607_s7  ;;  %s5787_s7 = sld [smem:[#allocation6 + $0x78]] }
 0x26e   :  { %2401 = vrot.lane.b32.xlu1 %v2390_v60, %s3761_s2  ;;  %2399 = vrot.lane.b32.xlu0 %v2389_v4, %s3761_s2  ;;  %v2442_v1 = vmul.f32 %v2438_v49, %v5077_v42 }
 0x270   :  { %v5097_v8 = vpop.permute.xlu1 %1908  ;;  %v5099_v37 = vpop.permute.xlu0 %1906 }
 0x271   :  { %7722 = vst [vmem:[#allocation197_spill] sm:$0xff] %v5097_v8  ;;  %7723 = vst [vmem:[#allocation198_spill] sm:$0xff] %v5099_v37  ;;  %v2440_v37 = vmul.f32 %v2438_v49, %v5065_v61 }
 0x272   :  { %2423 = vrot.lane.b32.xlu1 %v2414_v9, %s3761_s2  ;;  %2421 = vrot.lane.b32.xlu0 %v2413_v15, %s3761_s2  ;;  %v2439_v9 = vmul.f32 %v2438_v49, %v5067_v16 }
 0x274   :  { %v5105_v60 = vpop.permute.xlu1 %1930  ;;  %v5107_v4 = vpop.permute.xlu0 %1928 }
 0x275   :  { %7724 = vst [vmem:[#allocation199_spill] sm:$0xff] %v5105_v60  ;;  %7725 = vst [vmem:[#allocation200_spill] sm:$0xff] %v5107_v4  ;;  %v2441_v4 = vmul.f32 %v2438_v49, %v5079_v47  ;;  %v2464_v60 = vstv %s3608_s8  ;;  %s5810_s8 = sld [smem:[#allocation6 + $0x4c]] }
 0x276   :  { %2427 = vrot.lane.b32.xlu1 %v2416_v51, %s3761_s2  ;;  %2425 = vrot.lane.b32.xlu0 %v2415_v22, %s3761_s2  ;;  %v2468_v49 = vmul.f32 %v2464_v60, %v5077_v42 }
 0x278   :  { %v5113_v8 = vpop.permute.xlu1 %1934  ;;  %v5115_v15 = vpop.permute.xlu0 %1932 }
 0x279   :  { %7726 = vst [vmem:[#allocation201_spill] sm:$0xff] %v5113_v8  ;;  %7727 = vst [vmem:[#allocation202_spill] sm:$0xff] %v5115_v15  ;;  %v2466_v15 = vmul.f32 %v2464_v60, %v5065_v61 }
 0x27a   :  { %2449 = vrot.lane.b32.xlu1 %v2440_v37, %s3761_s2  ;;  %2447 = vrot.lane.b32.xlu0 %v2439_v9, %s3761_s2  ;;  %v2465_v37 = vmul.f32 %v2464_v60, %v5067_v16 }
 0x27c   :  { %v5121_v51 = vpop.permute.xlu1 %2020  ;;  %v5123_v22 = vpop.permute.xlu0 %2018 }
 0x27d   :  { %7728 = vst [vmem:[#allocation203_spill] sm:$0xff] %v5121_v51  ;;  %7729 = vst [vmem:[#allocation204_spill] sm:$0xff] %v5123_v22  ;;  %v2467_v22 = vmul.f32 %v2464_v60, %v5079_v47  ;;  %v2490_v51 = vstv %s3609_s9  ;;  %s5844_s9 = sld [smem:[#allocation6 + $0x93]] }
 0x27e   :  { %2453 = vrot.lane.b32.xlu1 %v2442_v1, %s3761_s2  ;;  %2451 = vrot.lane.b32.xlu0 %v2441_v4, %s3761_s2  ;;  %v2494_v60 = vmul.f32 %v2490_v51, %v5077_v42 }
 0x280   :  { %v5129_v8 = vpop.permute.xlu1 %2024  ;;  %v5131_v9 = vpop.permute.xlu0 %2022 }
 0x281   :  { %7730 = vst [vmem:[#allocation205_spill] sm:$0xff] %v5129_v8  ;;  %7731 = vst [vmem:[#allocation206_spill] sm:$0xff] %v5131_v9  ;;  %v2492_v9 = vmul.f32 %v2490_v51, %v5065_v61 }
 0x282   :  { %2475 = vrot.lane.b32.xlu1 %v2466_v15, %s3761_s2  ;;  %2473 = vrot.lane.b32.xlu0 %v2465_v37, %s3761_s2  ;;  %v2491_v15 = vmul.f32 %v2490_v51, %v5067_v16 }
 0x284   :  { %v5137_v1 = vpop.permute.xlu1 %2046  ;;  %v5139_v4 = vpop.permute.xlu0 %2044 }
 0x285   :  { %7732 = vst [vmem:[#allocation207_spill] sm:$0xff] %v5137_v1  ;;  %7733 = vst [vmem:[#allocation208_spill] sm:$0xff] %v5139_v4  ;;  %v2493_v4 = vmul.f32 %v2490_v51, %v5079_v47  ;;  %v2516_v1 = vstv %s3610_s10  ;;  %s5906_s10 = sld [smem:[#allocation6 + $0x67]] }
 0x286   :  { %2479 = vrot.lane.b32.xlu1 %v2468_v49, %s3761_s2  ;;  %2477 = vrot.lane.b32.xlu0 %v2467_v22, %s3761_s2 }
 0x288   :  { %v5145_v8 = vpop.permute.xlu1 %2050  ;;  %v5147_v37 = vpop.permute.xlu0 %2048 }
 0x289   :  { %7734 = vst [vmem:[#allocation209_spill] sm:$0xff] %v5145_v8  ;;  %7735 = vst [vmem:[#allocation210_spill] sm:$0xff] %v5147_v37  ;;  %v3680_v37 = vld [vmem:[#allocation2 + $0x38] sm:$0x3f] }
 0x28a   :  { %2501 = vrot.lane.b32.xlu1 %v2492_v9, %s3761_s2  ;;  %2499 = vrot.lane.b32.xlu0 %v2491_v15, %s3761_s2  ;;  %v2518_v9 = vmul.f32 %v2516_v1, %v5065_v61  ;;  %v2517_v15 = vmul.f32 %v2516_v1, %v5067_v16  ;;  %v72_v51 = vmul.f32 %v3680_v37, %v3998_v63 }
 0x28b   :  { %v82_v8 = vmul.f32 %v3680_v37, %v4020_v18  ;;  %v92_v44 = vmul.f32 %v3680_v37, %v4064_v58  ;;  %v122_v50 = vmul.f32 %v3680_v37, %v4224_v62  ;;  %v2520_v63 = vmul.f32 %v2516_v1, %v5077_v42 }
 0x28c   :  { %v5155_v22 = vpop.permute.xlu1 %2072  ;;  %v5157_v49 = vpop.permute.xlu0 %2070  ;;  %v2519_v18 = vmul.f32 %v2516_v1, %v5079_v47  ;;  %v76_v58 = vadd.f32 %v72_v51, %v4012_v14  ;;  %v2542_v62 = vstv %s3611_s11  ;;  %v3683_v51 = vld [vmem:[#allocation2 + $0x2] sm:$0xff]  ;;  %s5994_s11 = sld [smem:[#allocation6 + $0x82]] }
 0x28d   :  { %7736 = vst [vmem:[#allocation211_spill] sm:$0xff] %v5155_v22  ;;  %7737 = vst [vmem:[#allocation212_spill] sm:$0xff] %v5157_v49  ;;  %v102_v22 = vmul.f32 %v3680_v37, %v4116_v32  ;;  %v112_v49 = vmul.f32 %v3680_v37, %v4168_v41  ;;  %v86_v32 = vadd.f32 %v82_v8, %v4043_v35  ;;  %v3681_v35 = vld [vmem:[#allocation2 + $0x39] sm:$0x3f] }
 0x28e   :  { %2505 = vrot.lane.b32.xlu1 %v2494_v60, %s3761_s2  ;;  %2503 = vrot.lane.b32.xlu0 %v2493_v4, %s3761_s2  ;;  %v96_v41 = vadd.f32 %v92_v44, %v4093_v31  ;;  %v5199_v31 = vmul.f32 %v3681_v35, %v4036_v29  ;;  %v5202_v44 = vmul.f32 %v3681_v35, %v4080_v13 }
 0x28f   :  { %v106_v37 = vadd.f32 %v102_v22, %v4145_v38  ;;  %v5205_v38 = vmul.f32 %v3681_v35, %v4132_v20  ;;  %v2544_v29 = vmul.f32 %v2542_v62, %v5065_v61  ;;  %v2543_v13 = vmul.f32 %v2542_v62, %v5067_v16  ;;  %v3682_v22 = vld [vmem:[#allocation2 + $0xa] sm:$0x3f] }
 0x290   :  { %v5173_v4 = vpop.permute.xlu1 %2076  ;;  %v5175_v60 = vpop.permute.xlu0 %2074  ;;  %v152_v8 = vadd.f32 %v3934_v27, %v76_v58  ;;  %v178_v20 = vadd.f32 %v3950_v36, %v86_v32  ;;  %v840_v27 = vstv %s5171_s14  ;;  %v3685_v32 = vld [vmem:[#allocation2 + $0x32] sm:$0xff]  ;;  %s6056_s14 = sld [smem:[#allocation6 + $0x9d]] }
 0x291   :  { %7738 = vst [vmem:[#allocation213_spill] sm:$0xff] %v5173_v4  ;;  %7739 = vst [vmem:[#allocation214_spill] sm:$0xff] %v5175_v60  ;;  %v820_v60 = vstv %s5153_s12  ;;  %v850_v4 = vstv %s5177_s15  ;;  %s6011_s12 = sld [smem:[#allocation6 + $0xf]] }
 0x292   :  { %2527 = vrot.lane.b32.xlu1 %v2518_v9, %s3761_s2  ;;  %2525 = vrot.lane.b32.xlu0 %v2517_v15, %s3761_s2  ;;  %v116_v9 = vadd.f32 %v112_v49, %v4197_v43  ;;  %v126_v15 = vadd.f32 %v122_v50, %v4255_v33  ;;  %v5208_v43 = vmul.f32 %v3681_v35, %v4184_v17  ;;  %v830_v50 = vstv %s5159_s13  ;;  %s6043_s13 = sld [smem:[#allocation6 + $0x2a]] }
 0x293   :  { %v5211_v33 = vmul.f32 %v3681_v35, %v4242_v3  ;;  %v5221_v17 = vmul.f32 %v3681_v35, %v4285_v52  ;;  %v5223_v3 = vmul.f32 %v3682_v22, %v820_v60  ;;  %v204_v49 = vadd.f32 %v3966_v45, %v96_v41  ;;  %s6070_s15 = sld [smem:[#allocation6 + $0x45]] }
 0x294   :  { %v5194_v1 = vpop.permute.xlu1 %2098  ;;  %v5196_v14 = vpop.permute.xlu0 %2096  ;;  %v230_v52 = vadd.f32 %v3982_v54, %v106_v37  ;;  %v5238_v35 = vmul.f32 %v3685_v32, %v820_v60  ;;  %v5242_v45 = vmul.f32 %v3683_v51, %v830_v50  ;;  %v5251_v54 = vmul.f32 %v3685_v32, %v830_v50 }
 0x295   :  { %7740 = vst [vmem:[#allocation215_spill] sm:$0xff] %v5194_v1  ;;  %7741 = vst [vmem:[#allocation216_spill] sm:$0xff] %v5196_v14  ;;  %v5240_v1 = vmul.f32 %v3682_v22, %v830_v50  ;;  %v5255_v37 = vmul.f32 %v3683_v51, %v840_v27 }
 0x296   :  { %2531 = vrot.lane.b32.xlu1 %v2520_v63, %s3761_s2  ;;  %2529 = vrot.lane.b32.xlu0 %v2519_v18, %s3761_s2  ;;  %v5228_v63 = vmul.f32 %v3683_v51, %v820_v60  ;;  %v3684_v18 = vld [vmem:[#allocation2 + $0x3a] sm:$0x3f]  ;;  %7744 = vst [vmem:[#allocation219_spill] sm:$0xff] %v5238_v35  ;;  %7746 = vst [vmem:[#allocation221_spill] sm:$0xff] %v5242_v45 }
 0x297   :  { %v5230_v14 = vmul.f32 %v3684_v18, %v820_v60  ;;  %7745 = vst [vmem:[#allocation220_spill] sm:$0xff] %v5240_v1  ;;  %v5244_v41 = vmul.f32 %v3684_v18, %v830_v50  ;;  %7748 = vst [vmem:[#allocation223_spill] sm:$0xff] %v5251_v54  ;;  %v5253_v60 = vmul.f32 %v3682_v22, %v840_v27  ;;  %v2568_v1 = vstv %s5186_s16  ;;  %s6092_s16 = sld [smem:[#allocation6 + $0x60]] }
 0x298   :  { %v5233_v58 = vpop.permute.xlu1 %2102  ;;  %v5235_v36 = vpop.permute.xlu0 %2100  ;;  %7750 = vst [vmem:[#allocation225_spill] sm:$0xff] %v5255_v37  ;;  %v5261_v45 = vmul.f32 %v3684_v18, %v840_v27  ;;  %v282_v50 = vadd.f32 %v4032_v25, %v126_v15  ;;  %v5272_v37 = vmul.f32 %v3682_v22, %v850_v4  ;;  %v5274_v54 = vmul.f32 %v3683_v51, %v850_v4 }
 0x299   :  { %7742 = vst [vmem:[#allocation217_spill] sm:$0xff] %v5233_v58  ;;  %7743 = vst [vmem:[#allocation218_spill] sm:$0xff] %v5235_v36  ;;  %v2546_v58 = vmul.f32 %v2542_v62, %v5077_v42  ;;  %v2545_v36 = vmul.f32 %v2542_v62, %v5079_v47  ;;  %v870_v15 = vstv %s5225_s18  ;;  %s6166_s18 = sld [smem:[#allocation6 + $0x17]] }
 0x29a   :  { %7747 = vst [vmem:[#allocation222_spill] sm:$0xff] %v5244_v41  ;;  %2553 = vrot.lane.b32.xlu1 %v2544_v29, %s3762_s6  ;;  %2551 = vrot.lane.b32.xlu0 %v2543_v13, %s3762_s6  ;;  %7749 = vst [vmem:[#allocation224_spill] sm:$0xff] %v5253_v60  ;;  %v256_v41 = vadd.f32 %v4000_v5, %v116_v9  ;;  %v5263_v29 = vmul.f32 %v3685_v32, %v840_v27  ;;  %v860_v13 = vstv %s5192_s17  ;;  %s6143_s17 = sld [smem:[#allocation6 + $0x7b]] }
 0x29b   :  { %v308_v60 = vadd.f32 %v4085_v19, %v152_v8  ;;  %7753 = vst [vmem:[#allocation228_spill] sm:$0xff] %v5274_v54  ;;  %v5278_v5 = vmul.f32 %v3684_v18, %v850_v4  ;;  %v2570_v9 = vmul.f32 %v2568_v1, %v5065_v61  ;;  %v2569_v27 = vmul.f32 %v2568_v1, %v5067_v16 }
 0x29c   :  { %v5266_v35 = vpop.permute.xlu1 %2124  ;;  %v5268_v62 = vpop.permute.xlu0 %2122  ;;  %v5286_v25 = vmul.f32 %v3682_v22, %v860_v13  ;;  %v5288_v19 = vmul.f32 %v3683_v51, %v860_v13  ;;  %v334_v8 = vadd.f32 %v4137_v23, %v178_v20  ;;  %v5307_v23 = vmul.f32 %v3682_v22, %v870_v15 }
 0x29d   :  { %7751 = vst [vmem:[#allocation226_spill] sm:$0xff] %v5266_v35  ;;  %7752 = vst [vmem:[#allocation227_spill] sm:$0xff] %v5268_v62  ;;  %v5284_v62 = vmul.f32 %v3685_v32, %v850_v4  ;;  %v360_v35 = vadd.f32 %v4189_v39, %v204_v49  ;;  %v438_v4 = vadd.f32 %v4313_v28, %v282_v50  ;;  %v2594_v20 = vstv %s5258_s19  ;;  %s6198_s19 = sld [smem:[#allocation6 + $0x96]] }
 0x29e   :  { %7754 = vst [vmem:[#allocation229_spill] sm:$0xff] %v5278_v5  ;;  %2557 = vrot.lane.b32.xlu1 %v2546_v58, %s3762_s6  ;;  %2555 = vrot.lane.b32.xlu0 %v2545_v36, %s3762_s6  ;;  %7756 = vst [vmem:[#allocation231_spill] sm:$0xff] %v5286_v25  ;;  %v386_v5 = vadd.f32 %v4247_v53, %v230_v52  ;;  %v412_v58 = vadd.f32 %v4287_v55, %v256_v41 }
 0x29f   :  { %7755 = vst [vmem:[#allocation230_spill] sm:$0xff] %v5284_v62  ;;  %7757 = vst [vmem:[#allocation232_spill] sm:$0xff] %v5288_v19  ;;  %v452_v25 = vadd.f32 %v5199_v31, %v308_v60  ;;  %v5301_v62 = vmul.f32 %v3684_v18, %v860_v13  ;;  %v5303_v19 = vmul.f32 %v3685_v32, %v860_v13 }
 0x2a0   :  { %v5295_v36 = vpop.permute.xlu1 %2128  ;;  %v5297_v54 = vpop.permute.xlu0 %2126  ;;  %v2572_v39 = vmul.f32 %v2568_v1, %v5077_v42  ;;  %v2571_v53 = vmul.f32 %v2568_v1, %v5079_v47  ;;  %v5313_v55 = vmul.f32 %v3683_v51, %v870_v15  ;;  %v5315_v28 = vmul.f32 %v3684_v18, %v870_v15 }
 0x2a1   :  { %7758 = vst [vmem:[#allocation233_spill] sm:$0xff] %v5295_v36  ;;  %7759 = vst [vmem:[#allocation234_spill] sm:$0xff] %v5297_v54  ;;  %v5317_v31 = vmul.f32 %v3685_v32, %v870_v15  ;;  %v462_v22 = vadd.f32 %v5202_v44, %v334_v8  ;;  %v472_v49 = vadd.f32 %v5205_v38, %v360_v35  ;;  %v7762_v32 = vld [vmem:[#allocation11_spill] sm:$0xff]  ;;  %v1197_v38 = vstv %s5276_s20  ;;  %s6260_s20 = sld [smem:[#allocation6 + $0x32]] }
 0x2a2   :  { %2579 = vrot.lane.b32.xlu1 %v2570_v9, %s3762_s6  ;;  %2577 = vrot.lane.b32.xlu0 %v2569_v27, %s3762_s6  ;;  %v482_v52 = vadd.f32 %v5208_v43, %v386_v5  ;;  %v492_v41 = vadd.f32 %v5211_v33, %v412_v58  ;;  %v5334_v18 = vadd.f32 %v4321_v40, %v4075_v11  ;;  %v7763_v33 = vld [vmem:[#allocation12_spill] sm:$0xff]  ;;  %v7766_v5 = vld [vmem:[#allocation15_spill] sm:$0xff]  ;;  %v7771_v58 = vld [vmem:[#allocation18_spill] sm:$0xff]  ;;  %v1227_v36 = vstv %s5347_s24  ;;  %s6410_s24 = sld [smem:[#allocation6 + $0x68]] }
 0x2a3   :  { %v5338_v60 = vadd.f32 %v4323_v56, %v7762_v32  ;;  %v5341_v44 = vadd.f32 %v5221_v17, %v438_v4  ;;  %v5345_v43 = vadd.f32 %v4329_v12, %v452_v25  ;;  %v2596_v11 = vmul.f32 %v2594_v20, %v5065_v61  ;;  %v7764_v17 = vld [vmem:[#allocation13_spill] sm:$0xff]  ;;  %v7765_v12 = vld [vmem:[#allocation14_spill] sm:$0xff]  ;;  %v7767_v27 = vld [vmem:[#allocation16_spill] sm:$0xff] }
 0x2a4   :  { %v5328_v1 = vpop.permute.xlu1 %2150  ;;  %v5330_v51 = vpop.permute.xlu0 %2148  ;;  %v2595_v40 = vmul.f32 %v2594_v20, %v5067_v16  ;;  %v5355_v56 = vadd.f32 %v4331_v48, %v7763_v33  ;;  %v5359_v35 = vadd.f32 %v4337_v57, %v7764_v17  ;;  %v5363_v13 = vadd.f32 %v4339_v21, %v7765_v12  ;;  %v7768_v48 = vld [vmem:[#allocation17_spill] sm:$0xff]  ;;  %v5380_v57 = vld [vmem:[#allocation2 + $0x18] sm:$0x3f]  ;;  %v7773_v33 = vld [vmem:[#allocation20_spill] sm:$0xff] }
 0x2a5   :  { %7760 = vst [vmem:[#allocation235_spill] sm:$0xff] %v5328_v1  ;;  %7761 = vst [vmem:[#allocation236_spill] sm:$0xff] %v5330_v51  ;;  %v5366_v50 = vadd.f32 %v4345_v2, %v462_v22  ;;  %v5370_v9 = vadd.f32 %v4347_v6, %v7766_v5  ;;  %v5374_v25 = vadd.f32 %v4353_v30, %v7767_v27  ;;  %v5396_v4 = vld [vmem:[#allocation2 + $0x10] sm:$0xff]  ;;  %v5421_v12 = vld [vmem:[#allocation2 + $0x40] sm:$0xff] }
 0x2a6   :  { %2583 = vrot.lane.b32.xlu1 %v2572_v39, %s3762_s6  ;;  %2581 = vrot.lane.b32.xlu0 %v2571_v53, %s3762_s6  ;;  %v5378_v15 = vadd.f32 %v4355_v0, %v7768_v48  ;;  %v5383_v21 = vmul.f32 %v5380_v57, %v1197_v38  ;;  %v5390_v6 = vadd.f32 %v4361_v10, %v472_v49  ;;  %v1207_v39 = vstv %s5305_s21  ;;  %v5404_v53 = vld [vmem:[#allocation2 + $0x48] sm:$0x3f]  ;;  %v7772_v49 = vld [vmem:[#allocation19_spill] sm:$0xff]  ;;  %v7781_v51 = vld [vmem:[#allocation22_spill] sm:$0xff]  ;;  %s6348_s21 = sld [smem:[#allocation6 + $0x4d]] }
 0x2a7   :  { %v5394_v30 = vadd.f32 %v4363_v7, %v7771_v58  ;;  %v5399_v0 = vmul.f32 %v5396_v4, %v1197_v38  ;;  %v5407_v22 = vmul.f32 %v5404_v53, %v1197_v38  ;;  %v2598_v10 = vmul.f32 %v2594_v20, %v5077_v42  ;;  %v7777_v58 = vld [vmem:[#allocation21_spill] sm:$0xff]  ;;  %v7782_v1 = vld [vmem:[#allocation28_spill] sm:$0xff] }
 0x2a8   :  { %v5385_v8 = vpop.permute.xlu1 %2154  ;;  %v5387_v2 = vpop.permute.xlu0 %2152  ;;  %v2597_v7 = vmul.f32 %v2594_v20, %v5079_v47  ;;  %v5415_v32 = vadd.f32 %v4369_v24, %v7772_v49  ;;  %v5419_v17 = vadd.f32 %v4371_v59, %v7773_v33  ;;  %v5424_v5 = vmul.f32 %v5421_v12, %v1197_v38  ;;  %v7778_v49 = vld [vmem:[#allocation27_spill] sm:$0xff] }
 0x2a9   :  { %7769 = vst [vmem:[#allocation11_spill] sm:$0xff] %v5385_v8  ;;  %7770 = vst [vmem:[#allocation12_spill] sm:$0xff] %v5387_v2  ;;  %v5433_v20 = vmul.f32 %v5380_v57, %v1207_v39  ;;  %v5436_v24 = vmul.f32 %v5396_v4, %v1207_v39  ;;  %v1217_v59 = vstv %s5326_s23  ;;  %v5445_v38 = vadd.f32 %v4379_v26, %v4267_v46  ;;  %v7790_v8 = vld [vmem:[#allocation25_spill] sm:$0xff]  ;;  %s6397_s23 = sld [smem:[#allocation6 + $0x2d]] }
 0x2aa   :  { %2605 = vrot.lane.b32.xlu1 %v2596_v11, %s3762_s6  ;;  %2603 = vrot.lane.b32.xlu0 %v2595_v40, %s3762_s6  ;;  %v2620_v11 = vstv %s5320_s22  ;;  %v5430_v40 = vadd.f32 %v4377_v34, %v482_v52  ;;  %v5449_v33 = vadd.f32 %v7778_v49, %v7777_v58  ;;  %v5452_v34 = vmul.f32 %v5404_v53, %v1207_v39  ;;  %v7783_v58 = vld [vmem:[#allocation29_spill] sm:$0xff]  ;;  %s6365_s22 = sld [smem:[#allocation6 + $0x12]] }
 0x2ab   :  { %7774 = vst [vmem:[#allocation13_spill] sm:$0xff] %v5436_v24  ;;  %v5455_v52 = vmul.f32 %v5421_v12, %v1207_v39  ;;  %v5459_v54 = vadd.f32 %v7782_v1, %v7781_v51  ;;  %v2622_v46 = vmul.f32 %v2620_v11, %v5065_v61  ;;  %v2621_v26 = vmul.f32 %v2620_v11, %v5067_v16  ;;  %v7784_v39 = vld [vmem:[#allocation23_spill] sm:$0xff] }
 0x2ac   :  { %v5439_v27 = vpop.permute.xlu1 %2176  ;;  %v5441_v48 = vpop.permute.xlu0 %2174  ;;  %7779 = vst [vmem:[#allocation16_spill] sm:$0xff] %v5452_v34  ;;  %v5469_v49 = vadd.f32 %v7783_v58, %v492_v41  ;;  %v5476_v1 = vmul.f32 %v5380_v57, %v1217_v59  ;;  %v5479_v51 = vmul.f32 %v5396_v4, %v1217_v59  ;;  %v5490_v41 = vmul.f32 %v5404_v53, %v1217_v59 }
 0x2ad   :  { %7775 = vst [vmem:[#allocation14_spill] sm:$0xff] %v5439_v27  ;;  %7776 = vst [vmem:[#allocation15_spill] sm:$0xff] %v5441_v48  ;;  %v7785_v48 = vld [vmem:[#allocation30_spill] sm:$0xff] }
 0x2ae   :  { %7780 = vst [vmem:[#allocation17_spill] sm:$0xff] %v5455_v52  ;;  %2609 = vrot.lane.b32.xlu1 %v2598_v10, %s3762_s6  ;;  %2607 = vrot.lane.b32.xlu0 %v2597_v7, %s3762_s6  ;;  %v5473_v27 = vadd.f32 %v7785_v48, %v7784_v39  ;;  %7786 = vst [vmem:[#allocation18_spill] sm:$0xff] %v5476_v1  ;;  %v7788_v10 = vld [vmem:[#allocation24_spill] sm:$0xff]  ;;  %v7789_v7 = vld [vmem:[#allocation31_spill] sm:$0xff]  ;;  %v5493_v48 = vmul.f32 %v5421_v12, %v1217_v59 }
 0x2af   :  { %7787 = vst [vmem:[#allocation19_spill] sm:$0xff] %v5479_v51  ;;  %v5483_v2 = vadd.f32 %v7789_v7, %v7788_v10  ;;  %v7791_v52 = vld [vmem:[#allocation32_spill] sm:$0xff]  ;;  %7792 = vst [vmem:[#allocation20_spill] sm:$0xff] %v5490_v41  ;;  %v7796_v51 = vld [vmem:[#allocation35_spill] sm:$0xff]  ;;  %v5508_v41 = vmul.f32 %v5396_v4, %v1227_v36  ;;  %v2624_v59 = vmul.f32 %v2620_v11, %v5077_v42 }
 0x2b0   :  { %v5487_v34 = vadd.f32 %v7791_v52, %v7790_v8  ;;  %7793 = vst [vmem:[#allocation21_spill] sm:$0xff] %v5493_v48  ;;  %v5495_v58 = vpop.permute.xlu1 %2180  ;;  %v5497_v39 = vpop.permute.xlu0 %2178  ;;  %v682_v1 = vadd.f32 %v7796_v51, %v5334_v18  ;;  %v7797_v10 = vld [vmem:[#allocation36_spill] sm:$0xff]  ;;  %v5504_v8 = vmul.f32 %v5380_v57, %v1227_v36  ;;  %v1237_v52 = vstv %s5402_s25  ;;  %v7800_v18 = vld [vmem:[#allocation33_spill] sm:$0xff]  ;;  %s6424_s25 = sld [smem:[#allocation6 + $0x48]] }
 0x2b1   :  { %7794 = vst [vmem:[#allocation27_spill] sm:$0xff] %v5495_v58  ;;  %7795 = vst [vmem:[#allocation22_spill] sm:$0xff] %v5497_v39  ;;  %v681_v7 = vadd.f32 %v7797_v10, %v5338_v60  ;;  %v2623_v39 = vmul.f32 %v2620_v11, %v5079_v47  ;;  %v5516_v51 = vadd.f32 %v7800_v18, %v5341_v44  ;;  %v7801_v60 = vld [vmem:[#allocation37_spill] sm:$0xff]  ;;  %v7802_v58 = vld [vmem:[#allocation38_spill] sm:$0xff] }
 0x2b2   :  { %7798 = vst [vmem:[#allocation28_spill] sm:$0xff] %v5504_v8  ;;  %7799 = vst [vmem:[#allocation29_spill] sm:$0xff] %v5508_v41  ;;  %2631 = vrot.lane.b32.xlu1 %v2622_v46, %s3762_s6  ;;  %2629 = vrot.lane.b32.xlu0 %v2621_v26, %s3762_s6  ;;  %v684_v10 = vadd.f32 %v7801_v60, %v5345_v43  ;;  %v683_v8 = vadd.f32 %v7802_v58, %v5355_v56  ;;  %v2646_v41 = vstv %s5427_s26  ;;  %v7803_v46 = vld [vmem:[#allocation26_spill] sm:$0xff]  ;;  %v7810_v56 = vld [vmem:[#allocation39_spill] sm:$0xff]  ;;  %s6446_s26 = sld [smem:[#allocation6 + $0x63]] }
 0x2b3   :  { %v7804_v26 = vld [vmem:[#allocation34_spill] sm:$0xff]  ;;  %v5530_v11 = vmul.f32 %v5404_v53, %v1227_v36  ;;  %v5533_v44 = vmul.f32 %v5421_v12, %v1227_v36  ;;  %v5536_v18 = vmul.f32 %v5380_v57, %v1237_v52  ;;  %v708_v58 = vadd.f32 %v7810_v56, %v5359_v35  ;;  %v7812_v36 = vld [vmem:[#allocation40_spill] sm:$0xff] }
 0x2b4   :  { %v5527_v48 = vadd.f32 %v7804_v26, %v7803_v46  ;;  %v5538_v43 = vpop.permute.xlu1 %2202  ;;  %v5540_v60 = vpop.permute.xlu0 %2200  ;;  %v5545_v24 = vadd.f32 %v5223_v3, %v682_v1  ;;  %v5548_v46 = vadd.f32 %v5228_v63, %v681_v7  ;;  %v5551_v26 = vmul.f32 %v5396_v4, %v1237_v52  ;;  %v7813_v63 = vld [vmem:[#allocation219_spill] sm:$0xff] }
 0x2b5   :  { %7805 = vst [vmem:[#allocation23_spill] sm:$0xff] %v5530_v11  ;;  %7806 = vst [vmem:[#allocation30_spill] sm:$0xff] %v5533_v44  ;;  %v707_v44 = vadd.f32 %v7812_v36, %v5363_v13  ;;  %v2647_v35 = vmul.f32 %v2646_v41, %v5067_v16  ;;  %v5561_v3 = vadd.f32 %v5230_v14, %v684_v10  ;;  %v7819_v14 = vld [vmem:[#allocation44_spill] sm:$0xff] }
 0x2b6   :  { %7807 = vst [vmem:[#allocation24_spill] sm:$0xff] %v5536_v18  ;;  %7808 = vst [vmem:[#allocation31_spill] sm:$0xff] %v5538_v43  ;;  %v1247_v18 = vstv %s5462_s0  ;;  %2635 = vrot.lane.b32.xlu1 %v2624_v59, %s3762_s6  ;;  %2633 = vrot.lane.b32.xlu0 %v2623_v39, %s3762_s6  ;;  %v5564_v1 = vadd.f32 %v7813_v63, %v683_v8  ;;  %v5567_v7 = vmul.f32 %v5404_v53, %v1237_v52  ;;  %v7816_v59 = vld [vmem:[#allocation41_spill] sm:$0xff]  ;;  %v7817_v39 = vld [vmem:[#allocation42_spill] sm:$0xff]  ;;  %s6497_s0 = sld [smem:[#allocation6 + $0x7e]] }
 0x2b7   :  { %7809 = vst [vmem:[#allocation25_spill] sm:$0xff] %v5540_v60  ;;  %7811 = vst [vmem:[#allocation32_spill] sm:$0xff] %v5551_v26  ;;  %v2648_v60 = vmul.f32 %v2646_v41, %v5065_v61  ;;  %v5570_v13 = vmul.f32 %v5421_v12, %v1237_v52  ;;  %v710_v56 = vadd.f32 %v7816_v59, %v5366_v50  ;;  %v7818_v43 = vld [vmem:[#allocation43_spill] sm:$0xff]  ;;  %v7822_v52 = vld [vmem:[#allocation45_spill] sm:$0xff]  ;;  %v2672_v59 = vstv %s5523_s1  ;;  %s6520_s1 = sld [smem:[#allocation6 + $0x83]] }
 0x2b8   :  { %7814 = vst [vmem:[#allocation35_spill] sm:$0xff] %v5567_v7  ;;  %v709_v36 = vadd.f32 %v7817_v39, %v5370_v9  ;;  %v734_v26 = vadd.f32 %v7818_v43, %v5374_v25  ;;  %v733_v8 = vadd.f32 %v7819_v14, %v5378_v15  ;;  %v5580_v10 = vpop.permute.xlu1 %2206  ;;  %v5582_v63 = vpop.permute.xlu0 %2204  ;;  %v7823_v7 = vld [vmem:[#allocation220_spill] sm:$0xff]  ;;  %v5590_v50 = vmul.f32 %v5380_v57, %v1247_v18  ;;  %v7824_v25 = vld [vmem:[#allocation221_spill] sm:$0xff] }
 0x2b9   :  { %7815 = vst [vmem:[#allocation36_spill] sm:$0xff] %v5570_v13  ;;  %7820 = vst [vmem:[#allocation33_spill] sm:$0xff] %v5580_v10  ;;  %v736_v13 = vadd.f32 %v7822_v52, %v5390_v6  ;;  %v5587_v11 = vadd.f32 %v7823_v7, %v708_v58  ;;  %v5593_v9 = vmul.f32 %v5396_v4, %v1247_v18  ;;  %v7825_v58 = vld [vmem:[#allocation46_spill] sm:$0xff]  ;;  %v7828_v14 = vld [vmem:[#allocation224_spill] sm:$0xff] }
 0x2ba   :  { %7821 = vst [vmem:[#allocation37_spill] sm:$0xff] %v5582_v63  ;;  %v5596_v43 = vadd.f32 %v7824_v25, %v707_v44  ;;  %2657 = vrot.lane.b32.xlu1 %v2648_v60, %s3762_s6  ;;  %2655 = vrot.lane.b32.xlu0 %v2647_v35, %s3762_s6  ;;  %v2650_v15 = vmul.f32 %v2646_v41, %v5077_v42  ;;  %v7826_v44 = vld [vmem:[#allocation222_spill] sm:$0xff]  ;;  %v7827_v35 = vld [vmem:[#allocation223_spill] sm:$0xff]  ;;  %v7829_v52 = vld [vmem:[#allocation225_spill] sm:$0xff] }
 0x2bb   :  { %v2649_v6 = vmul.f32 %v2646_v41, %v5079_v47  ;;  %v735_v7 = vadd.f32 %v7825_v58, %v5394_v30  ;;  %v5605_v57 = vmul.f32 %v5404_v53, %v1247_v18  ;;  %v5608_v4 = vmul.f32 %v5421_v12, %v1247_v18  ;;  %v7832_v12 = vld [vmem:[#allocation47_spill] sm:$0xff]  ;;  %v7833_v58 = vld [vmem:[#allocation48_spill] sm:$0xff] }
 0x2bc   :  { %v5614_v60 = vadd.f32 %v7826_v44, %v710_v56  ;;  %v5617_v39 = vadd.f32 %v7827_v35, %v709_v36  ;;  %v5620_v41 = vadd.f32 %v7828_v14, %v734_v26  ;;  %v5623_v30 = vadd.f32 %v7829_v52, %v733_v8  ;;  %v5625_v53 = vpop.permute.xlu1 %2228  ;;  %v5627_v25 = vpop.permute.xlu0 %2226  ;;  %v7834_v44 = vld [vmem:[#allocation49_spill] sm:$0xff]  ;;  %v7835_v26 = vld [vmem:[#allocation50_spill] sm:$0xff]  ;;  %v7880_v63 = vld [vmem:[#allocation80_spill] sm:$0xff] }
 0x2bd   :  { %7830 = vst [vmem:[#allocation38_spill] sm:$0xff] %v5625_v53  ;;  %7831 = vst [vmem:[#allocation26_spill] sm:$0xff] %v5627_v25  ;;  %v760_v18 = vadd.f32 %v7832_v12, %v5415_v32  ;;  %v759_v56 = vadd.f32 %v7833_v58, %v5419_v17  ;;  %v762_v36 = vadd.f32 %v7834_v44, %v5430_v40  ;;  %v7836_v17 = vld [vmem:[#allocation51_spill] sm:$0xff]  ;;  %v7837_v40 = vld [vmem:[#allocation52_spill] sm:$0xff] }
 0x2be   :  { %v5636_v35 = vadd.f32 %v5261_v45, %v736_v13  ;;  %v761_v8 = vadd.f32 %v7835_v26, %v5445_v38  ;;  %2661 = vrot.lane.b32.xlu1 %v2650_v15, %s3762_s6  ;;  %2659 = vrot.lane.b32.xlu0 %v2649_v6, %s3762_s6  ;;  %v2674_v32 = vmul.f32 %v2672_v59, %v5065_v61  ;;  %v7838_v13 = vld [vmem:[#allocation53_spill] sm:$0xff]  ;;  %v7839_v38 = vld [vmem:[#allocation54_spill] sm:$0xff]  ;;  %v7840_v6 = vld [vmem:[#allocation55_spill] sm:$0xff] }
 0x2bf   :  { %v2673_v14 = vmul.f32 %v2672_v59, %v5067_v16  ;;  %v786_v52 = vadd.f32 %v7836_v17, %v5449_v33  ;;  %v785_v45 = vadd.f32 %v7837_v40, %v5459_v54  ;;  %v788_v12 = vadd.f32 %v7838_v13, %v5469_v49  ;;  %v7841_v61 = vld [vmem:[#allocation56_spill] sm:$0xff]  ;;  %v7842_v26 = vld [vmem:[#allocation57_spill] sm:$0xff]  ;;  %v7845_v49 = vld [vmem:[#allocation58_spill] sm:$0xff] }
 0x2c0   :  { %v847_v58 = vadd.f32 %v5263_v29, %v735_v7  ;;  %v787_v15 = vadd.f32 %v7839_v38, %v5473_v27  ;;  %v812_v44 = vadd.f32 %v7840_v6, %v5483_v2  ;;  %v811_v16 = vadd.f32 %v7841_v61, %v5487_v34  ;;  %v5661_v17 = vpop.permute.xlu1 %2232  ;;  %v5663_v54 = vpop.permute.xlu0 %2230  ;;  %v7846_v27 = vld [vmem:[#allocation228_spill] sm:$0xff]  ;;  %v7847_v13 = vld [vmem:[#allocation229_spill] sm:$0xff]  ;;  %v7848_v34 = vld [vmem:[#allocation230_spill] sm:$0xff] }
 0x2c1   :  { %v814_v33 = vadd.f32 %v7842_v26, %v5516_v51  ;;  %7843 = vst [vmem:[#allocation34_spill] sm:$0xff] %v5661_v17  ;;  %7844 = vst [vmem:[#allocation39_spill] sm:$0xff] %v5663_v54  ;;  %v813_v29 = vadd.f32 %v7845_v49, %v5527_v48  ;;  %v856_v7 = vadd.f32 %v5272_v37, %v760_v18  ;;  %v7849_v48 = vld [vmem:[#allocation231_spill] sm:$0xff]  ;;  %v7850_v37 = vld [vmem:[#allocation232_spill] sm:$0xff] }
 0x2c2   :  { %v855_v40 = vadd.f32 %v7846_v27, %v759_v56  ;;  %v858_v2 = vadd.f32 %v7847_v13, %v762_v36  ;;  %v5673_v38 = vadd.f32 %v7848_v34, %v761_v8  ;;  %2683 = vrot.lane.b32.xlu1 %v2674_v32, %s3762_s6  ;;  %2681 = vrot.lane.b32.xlu0 %v2673_v14, %s3762_s6  ;;  %v5686_v36 = vld [vmem:[#allocation2 + $0x29] sm:$0x3f]  ;;  %v2762_v8 = vstv %s5611_s27  ;;  %v5689_v26 = vld [vmem:[#allocation2 + $0x21] sm:$0xff]  ;;  %v5749_v13 = vld [vmem:[#allocation2 + $0x59] sm:$0x3f]  ;;  %s6552_s27 = sld [smem:[#allocation6 + $0x99]] }
 0x2c3   :  { %v2676_v51 = vmul.f32 %v2672_v59, %v5077_v42  ;;  %v2675_v6 = vmul.f32 %v2672_v59, %v5079_v47  ;;  %v866_v61 = vadd.f32 %v7849_v48, %v786_v52  ;;  %v5681_v18 = vadd.f32 %v7850_v37, %v785_v45  ;;  %v7853_v52 = vld [vmem:[#allocation59_spill] sm:$0xff]  ;;  %v5751_v34 = vld [vmem:[#allocation2 + $0x51] sm:$0xff]  ;;  %v7862_v48 = vld [vmem:[#allocation68_spill] sm:$0xff] }
 0x2c4   :  { %v5684_v56 = vadd.f32 %v5301_v62, %v788_v12  ;;  %v5694_v42 = vadd.f32 %v5303_v19, %v787_v15  ;;  %v5697_v47 = vadd.f32 %v5307_v23, %v812_v44  ;;  %v5700_v59 = vadd.f32 %v5313_v55, %v811_v16  ;;  %v5707_v62 = vpop.permute.xlu1 %2254  ;;  %v5709_v14 = vpop.permute.xlu0 %2252  ;;  %v7854_v19 = vld [vmem:[#allocation60_spill] sm:$0xff]  ;;  %v5765_v37 = vld [vmem:[#allocation2 + $0x19] sm:$0x3f]  ;;  %v7873_v54 = vld [vmem:[#allocation75_spill] sm:$0xff] }
 0x2c5   :  { %v5703_v32 = vadd.f32 %v5315_v28, %v814_v33  ;;  %7851 = vst [vmem:[#allocation40_spill] sm:$0xff] %v5707_v62  ;;  %7852 = vst [vmem:[#allocation219_spill] sm:$0xff] %v5709_v14  ;;  %v5713_v45 = vadd.f32 %v7853_v52, %v5545_v24  ;;  %v5717_v23 = vadd.f32 %v7854_v19, %v5548_v46  ;;  %v1573_v12 = vstv %s5638_s28  ;;  %v7855_v28 = vld [vmem:[#allocation61_spill] sm:$0xff]  ;;  %v7856_v46 = vld [vmem:[#allocation62_spill] sm:$0xff]  ;;  %s6614_s28 = sld [smem:[#allocation6 + $0x9e]] }
 0x2c6   :  { %v5720_v55 = vadd.f32 %v5317_v31, %v813_v29  ;;  %v5725_v15 = vadd.f32 %v7855_v28, %v5561_v3  ;;  %2687 = vrot.lane.b32.xlu1 %v2676_v51, %s3762_s6  ;;  %2685 = vrot.lane.b32.xlu0 %v2675_v6, %s3762_s6  ;;  %v2764_v24 = vmul.f32 %v2762_v8, %v5686_v36  ;;  %v7857_v31 = vld [vmem:[#allocation63_spill] sm:$0xff]  ;;  %v7858_v3 = vld [vmem:[#allocation64_spill] sm:$0xff]  ;;  %v7859_v29 = vld [vmem:[#allocation65_spill] sm:$0xff]  ;;  %v2788_v14 = vstv %s5691_s30  ;;  %s6727_s30 = sld [smem:[#allocation6 + $0x15]] }
 0x2c7   :  { %v2763_v44 = vmul.f32 %v2762_v8, %v5689_v26  ;;  %v5735_v16 = vadd.f32 %v7856_v46, %v5564_v1  ;;  %v5739_v33 = vadd.f32 %v7857_v31, %v5587_v11  ;;  %v5743_v49 = vadd.f32 %v7858_v3, %v5596_v43  ;;  %v7860_v1 = vld [vmem:[#allocation66_spill] sm:$0xff]  ;;  %v7861_v11 = vld [vmem:[#allocation67_spill] sm:$0xff]  ;;  %v7874_v25 = vld [vmem:[#allocation76_spill] sm:$0xff] }
 0x2c8   :  { %v5747_v27 = vadd.f32 %v7859_v29, %v5614_v60  ;;  %v5755_v51 = vadd.f32 %v7860_v1, %v5617_v39  ;;  %v5759_v6 = vadd.f32 %v7861_v11, %v5620_v41  ;;  %v5763_v43 = vadd.f32 %v7862_v48, %v5623_v30  ;;  %v5770_v52 = vpop.permute.xlu1 %2258  ;;  %v5772_v19 = vpop.permute.xlu0 %2256  ;;  %v7865_v39 = vld [vmem:[#allocation69_spill] sm:$0xff]  ;;  %v7866_v46 = vld [vmem:[#allocation70_spill] sm:$0xff]  ;;  %v5789_v29 = vld [vmem:[#allocation2 + $0x49] sm:$0x3f] }
 0x2c9   :  { %v5768_v60 = vmul.f32 %v5765_v37, %v1573_v12  ;;  %7863 = vst [vmem:[#allocation41_spill] sm:$0xff] %v5770_v52  ;;  %7864 = vst [vmem:[#allocation42_spill] sm:$0xff] %v5772_v19  ;;  %v5776_v28 = vadd.f32 %v7865_v39, %v5636_v35  ;;  %v5779_v41 = vadd.f32 %v7866_v46, %v847_v58  ;;  %v5781_v31 = vld [vmem:[#allocation2 + $0x11] sm:$0xff]  ;;  %v1583_v3 = vstv %s5670_s29  ;;  %v7867_v11 = vld [vmem:[#allocation71_spill] sm:$0xff]  ;;  %s6702_s29 = sld [smem:[#allocation6 + $0x19]] }
 0x2ca   :  { %v5784_v30 = vmul.f32 %v5781_v31, %v1573_v12  ;;  %v5792_v1 = vmul.f32 %v5789_v29, %v1573_v12  ;;  %2773 = vrot.lane.b32.xlu1 %v2764_v24, %s3761_s2  ;;  %2771 = vrot.lane.b32.xlu0 %v2763_v44, %s3761_s2  ;;  %v2766_v35 = vmul.f32 %v2762_v8, %v5749_v13  ;;  %v7868_v39 = vld [vmem:[#allocation72_spill] sm:$0xff]  ;;  %v7869_v24 = vld [vmem:[#allocation73_spill] sm:$0xff] }
 0x2cb   :  { %v2765_v58 = vmul.f32 %v2762_v8, %v5751_v34  ;;  %v5799_v48 = vadd.f32 %v7867_v11, %v856_v7  ;;  %v5802_v46 = vadd.f32 %v7868_v39, %v855_v40  ;;  %v5804_v19 = vld [vmem:[#allocation2 + $0x41] sm:$0xff]  ;;  %v5813_v44 = vadd.f32 %v7869_v24, %v858_v2 }
 0x2cc   :  { %v5807_v52 = vmul.f32 %v5804_v19, %v1573_v12  ;;  %v5816_v8 = vmul.f32 %v5765_v37, %v1583_v3  ;;  %v5819_v7 = vmul.f32 %v5781_v31, %v1583_v3  ;;  %v1593_v40 = vstv %s5705_s4  ;;  %v5822_v11 = vpop.permute.xlu1 %2280  ;;  %v5824_v39 = vpop.permute.xlu0 %2278  ;;  %v7872_v12 = vld [vmem:[#allocation74_spill] sm:$0xff]  ;;  %s6759_s4 = sld [smem:[#allocation6 + $0x30]] }
 0x2cd   :  { %7870 = vst [vmem:[#allocation43_spill] sm:$0xff] %v5822_v11  ;;  %7871 = vst [vmem:[#allocation44_spill] sm:$0xff] %v5824_v39  ;;  %v5828_v62 = vadd.f32 %v7872_v12, %v5673_v38  ;;  %v5831_v17 = vadd.f32 %v7873_v54, %v866_v61  ;;  %v5834_v2 = vmul.f32 %v5789_v29, %v1583_v3  ;;  %v1603_v11 = vstv %s5727_s5  ;;  %v7875_v61 = vld [vmem:[#allocation77_spill] sm:$0xff]  ;;  %v7876_v12 = vld [vmem:[#allocation78_spill] sm:$0xff]  ;;  %s6776_s5 = sld [smem:[#allocation6 + $0x34]] }
 0x2ce   :  { %v5837_v24 = vmul.f32 %v5804_v19, %v1583_v3  ;;  %v5841_v53 = vadd.f32 %v7874_v25, %v5681_v18  ;;  %2777 = vrot.lane.b32.xlu1 %v2766_v35, %s3761_s2  ;;  %2775 = vrot.lane.b32.xlu0 %v2765_v58, %s3761_s2  ;;  %v2790_v54 = vmul.f32 %v2788_v14, %v5686_v36  ;;  %v7879_v58 = vld [vmem:[#allocation79_spill] sm:$0xff] }
 0x2cf   :  { %v2789_v38 = vmul.f32 %v2788_v14, %v5689_v26  ;;  %v5852_v3 = vadd.f32 %v7875_v61, %v5684_v56  ;;  %v5856_v25 = vadd.f32 %v7876_v12, %v5694_v42  ;;  %v5859_v18 = vmul.f32 %v5765_v37, %v1593_v40 }
 0x2d0   :  { %v5862_v35 = vmul.f32 %v5781_v31, %v1593_v40  ;;  %v5866_v39 = vadd.f32 %v7879_v58, %v5697_v47  ;;  %v5870_v10 = vadd.f32 %v7880_v63, %v5700_v59  ;;  %v5873_v56 = vmul.f32 %v5789_v29, %v1593_v40  ;;  %v5878_v61 = vpop.permute.xlu1 %2284  ;;  %v5880_v12 = vpop.permute.xlu0 %2282  ;;  %v7886_v47 = vld [vmem:[#allocation84_spill] sm:$0xff] }
 0x2d1   :  { %7877 = vst [vmem:[#allocation45_spill] sm:$0xff] %v5859_v18  ;;  %v5876_v42 = vmul.f32 %v5804_v19, %v1593_v40  ;;  %7883 = vst [vmem:[#allocation222_spill] sm:$0xff] %v5878_v61  ;;  %v1057_v58 = vadd.f32 %v7886_v47, %v5717_v23  ;;  %v5887_v63 = vmul.f32 %v5765_v37, %v1603_v11  ;;  %v1613_v59 = vstv %s5787_s7  ;;  %v7890_v23 = vld [vmem:[#allocation85_spill] sm:$0xff]  ;;  %v7891_v61 = vld [vmem:[#allocation86_spill] sm:$0xff]  ;;  %s6798_s7 = sld [smem:[#allocation6 + $0x4b]] }
 0x2d2   :  { %7878 = vst [vmem:[#allocation220_spill] sm:$0xff] %v5862_v35  ;;  %7881 = vst [vmem:[#allocation221_spill] sm:$0xff] %v5873_v56  ;;  %v7885_v35 = vld [vmem:[#allocation83_spill] sm:$0xff]  ;;  %v5891_v56 = vmul.f32 %v5781_v31, %v1603_v11  ;;  %2799 = vrot.lane.b32.xlu1 %v2790_v54, %s3761_s2  ;;  %2797 = vrot.lane.b32.xlu0 %v2789_v38, %s3761_s2  ;;  %v2792_v40 = vmul.f32 %v2788_v14, %v5749_v13  ;;  %v7892_v54 = vld [vmem:[#allocation82_spill] sm:$0xff] }
 0x2d3   :  { %7882 = vst [vmem:[#allocation46_spill] sm:$0xff] %v5876_v42  ;;  %7884 = vst [vmem:[#allocation223_spill] sm:$0xff] %v5880_v12  ;;  %v1058_v18 = vadd.f32 %v7885_v35, %v5713_v45  ;;  %v2791_v12 = vmul.f32 %v2788_v14, %v5751_v34  ;;  %v7889_v45 = vld [vmem:[#allocation81_spill] sm:$0xff]  ;;  %v1060_v47 = vadd.f32 %v7890_v23, %v5725_v15 }
 0x2d4   :  { %7887 = vst [vmem:[#allocation224_spill] sm:$0xff] %v5887_v63  ;;  %7888 = vst [vmem:[#allocation225_spill] sm:$0xff] %v5891_v56  ;;  %v5899_v35 = vadd.f32 %v7889_v45, %v5703_v32  ;;  %v1059_v63 = vadd.f32 %v7891_v61, %v5735_v16  ;;  %v2814_v56 = vstv %s5810_s8  ;;  %v5910_v38 = vadd.f32 %v7892_v54, %v5720_v55  ;;  %v5921_v15 = vpop.permute.xlu1 %2306  ;;  %v5923_v23 = vpop.permute.xlu0 %2304  ;;  %v7897_v16 = vld [vmem:[#allocation87_spill] sm:$0xff]  ;;  %s6871_s8 = sld [smem:[#allocation6 + $0x4f]] }
 0x2d5   :  { %v5913_v14 = vmul.f32 %v5789_v29, %v1603_v11  ;;  %v5916_v32 = vmul.f32 %v5804_v19, %v1603_v11  ;;  %v5919_v45 = vmul.f32 %v5765_v37, %v1613_v59  ;;  %7895 = vst [vmem:[#allocation49_spill] sm:$0xff] %v5921_v15  ;;  %7896 = vst [vmem:[#allocation50_spill] sm:$0xff] %v5923_v23  ;;  %v7898_v11 = vld [vmem:[#allocation88_spill] sm:$0xff] }
 0x2d6   :  { %v1084_v61 = vadd.f32 %v7897_v16, %v5739_v33  ;;  %v5928_v42 = vadd.f32 %v5383_v21, %v1058_v18  ;;  %v5931_v55 = vadd.f32 %v5399_v0, %v1057_v58  ;;  %v5934_v54 = vmul.f32 %v5781_v31, %v1613_v59  ;;  %2803 = vrot.lane.b32.xlu1 %v2792_v40, %s3761_s2  ;;  %v7901_v58 = vld [vmem:[#allocation89_spill] sm:$0xff] }
 0x2d7   :  { %7893 = vst [vmem:[#allocation47_spill] sm:$0xff] %v5916_v32  ;;  %7894 = vst [vmem:[#allocation48_spill] sm:$0xff] %v5919_v45  ;;  %v1083_v32 = vadd.f32 %v7898_v11, %v5743_v49  ;;  %v1623_v45 = vstv %s5844_s9  ;;  %2801 = vrot.lane.b32.xlu0 %v2791_v12, %s3761_s2  ;;  %v2816_v23 = vmul.f32 %v2814_v56, %v5686_v36  ;;  %v7902_v12 = vld [vmem:[#allocation90_spill] sm:$0xff]  ;;  %v7903_v11 = vld [vmem:[#allocation91_spill] sm:$0xff]  ;;  %s6913_s9 = sld [smem:[#allocation6 + $0x66]] }
 0x2d8   :  { %v2815_v33 = vmul.f32 %v2814_v56, %v5689_v26  ;;  %v5944_v21 = vadd.f32 %v5407_v22, %v1060_v47  ;;  %v5947_v0 = vadd.f32 %v5424_v5, %v1059_v63  ;;  %v5950_v18 = vmul.f32 %v5789_v29, %v1613_v59  ;;  %v7904_v22 = vld [vmem:[#allocation92_spill] sm:$0xff]  ;;  %v5963_v63 = vpop.permute.xlu1 %2310  ;;  %v5965_v47 = vpop.permute.xlu0 %2308 }
 0x2d9   :  { %v5953_v49 = vmul.f32 %v5804_v19, %v1613_v59  ;;  %v1086_v40 = vadd.f32 %v7901_v58, %v5747_v27  ;;  %v1085_v16 = vadd.f32 %v7902_v12, %v5755_v51  ;;  %v1110_v15 = vadd.f32 %v7903_v11, %v5759_v6  ;;  %7905 = vst [vmem:[#allocation53_spill] sm:$0xff] %v5963_v63  ;;  %v7907_v59 = vld [vmem:[#allocation93_spill] sm:$0xff] }
 0x2da   :  { %7899 = vst [vmem:[#allocation51_spill] sm:$0xff] %v5950_v18  ;;  %v1109_v5 = vadd.f32 %v7904_v22, %v5763_v43  ;;  %7906 = vst [vmem:[#allocation54_spill] sm:$0xff] %v5965_v47  ;;  %v5970_v18 = vadd.f32 %v5433_v20, %v1084_v61  ;;  %v5973_v27 = vmul.f32 %v5765_v37, %v1623_v45  ;;  %v7908_v6 = vld [vmem:[#allocation13_spill] sm:$0xff]  ;;  %2825 = vrot.lane.b32.xlu1 %v2816_v23, %s3761_s2  ;;  %v7909_v20 = vld [vmem:[#allocation94_spill] sm:$0xff] }
 0x2db   :  { %7900 = vst [vmem:[#allocation52_spill] sm:$0xff] %v5953_v49  ;;  %v1112_v49 = vadd.f32 %v7907_v59, %v5776_v28  ;;  %v5976_v51 = vmul.f32 %v5781_v31, %v1623_v45  ;;  %v5979_v58 = vadd.f32 %v7908_v6, %v1083_v32  ;;  %2823 = vrot.lane.b32.xlu0 %v2815_v33, %s3761_s2  ;;  %v2840_v12 = vstv %s5906_s10  ;;  %v7911_v32 = vld [vmem:[#allocation16_spill] sm:$0xff]  ;;  %v7912_v11 = vld [vmem:[#allocation17_spill] sm:$0xff]  ;;  %v7913_v22 = vld [vmem:[#allocation18_spill] sm:$0xff]  ;;  %s6945_s10 = sld [smem:[#allocation6 + $0x6a]] }
 0x2dc   :  { %v2818_v43 = vmul.f32 %v2814_v56, %v5749_v13  ;;  %v2817_v28 = vmul.f32 %v2814_v56, %v5751_v34  ;;  %v1111_v61 = vadd.f32 %v7909_v20, %v5779_v41  ;;  %v5988_v37 = vmul.f32 %v5789_v29, %v1623_v45  ;;  %v7914_v6 = vld [vmem:[#allocation19_spill] sm:$0xff]  ;;  %v6000_v47 = vpop.permute.xlu1 %2397  ;;  %v6002_v41 = vpop.permute.xlu0 %2395  ;;  %v7919_v63 = vld [vmem:[#allocation97_spill] sm:$0xff] }
 0x2dd   :  { %v5991_v31 = vmul.f32 %v5804_v19, %v1623_v45  ;;  %v1215_v23 = vadd.f32 %v7911_v32, %v1086_v40  ;;  %v1214_v33 = vadd.f32 %v7912_v11, %v1085_v16  ;;  %v1223_v59 = vadd.f32 %v7913_v22, %v1110_v15  ;;  %7915 = vst [vmem:[#allocation56_spill] sm:$0xff] %v6000_v47  ;;  %v7917_v29 = vld [vmem:[#allocation95_spill] sm:$0xff]  ;;  %v7918_v19 = vld [vmem:[#allocation96_spill] sm:$0xff]  ;;  %v7921_v15 = vld [vmem:[#allocation98_spill] sm:$0xff] }
 0x2de   :  { %v1222_v56 = vadd.f32 %v7914_v6, %v1109_v5  ;;  %7916 = vst [vmem:[#allocation57_spill] sm:$0xff] %v6002_v41  ;;  %v1136_v20 = vadd.f32 %v7917_v29, %v5799_v48  ;;  %v1135_v45 = vadd.f32 %v7918_v19, %v5802_v46  ;;  %v7920_v40 = vld [vmem:[#allocation20_spill] sm:$0xff]  ;;  %v1137_v16 = vadd.f32 %v7921_v15, %v5828_v62  ;;  %v7922_v46 = vld [vmem:[#allocation99_spill] sm:$0xff]  ;;  %v7925_v6 = vld [vmem:[#allocation21_spill] sm:$0xff] }
 0x2df   :  { %7910 = vst [vmem:[#allocation55_spill] sm:$0xff] %v5991_v31  ;;  %v1138_v31 = vadd.f32 %v7919_v63, %v5813_v44  ;;  %v1225_v32 = vadd.f32 %v7920_v40, %v1112_v49  ;;  %2829 = vrot.lane.b32.xlu1 %v2818_v43, %s3761_s2  ;;  %2827 = vrot.lane.b32.xlu0 %v2817_v28, %s3761_s2  ;;  %v7923_v44 = vld [vmem:[#allocation100_spill] sm:$0xff]  ;;  %v7924_v49 = vld [vmem:[#allocation101_spill] sm:$0xff]  ;;  %v7926_v62 = vld [vmem:[#allocation102_spill] sm:$0xff] }
 0x2e0   :  { %v2842_v5 = vmul.f32 %v2840_v12, %v5686_v36  ;;  %v2841_v48 = vmul.f32 %v2840_v12, %v5689_v26  ;;  %v1162_v11 = vadd.f32 %v7922_v46, %v5831_v17  ;;  %v1161_v63 = vadd.f32 %v7923_v44, %v5841_v53  ;;  %v7927_v28 = vld [vmem:[#allocation103_spill] sm:$0xff]  ;;  %v7928_v40 = vld [vmem:[#allocation104_spill] sm:$0xff]  ;;  %v7929_v41 = vld [vmem:[#allocation105_spill] sm:$0xff]  ;;  %v6034_v46 = vpop.permute.xlu1 %2401  ;;  %v6036_v53 = vpop.permute.xlu0 %2399 }
 0x2e1   :  { %v1164_v22 = vadd.f32 %v7924_v49, %v5852_v3  ;;  %v1224_v29 = vadd.f32 %v7925_v6, %v1111_v61  ;;  %v1163_v43 = vadd.f32 %v7926_v62, %v5856_v25  ;;  %v1188_v19 = vadd.f32 %v7927_v28, %v5866_v39  ;;  %7930 = vst [vmem:[#allocation58_spill] sm:$0xff] %v6034_v46  ;;  %v7932_v3 = vld [vmem:[#allocation106_spill] sm:$0xff]  ;;  %v7933_v44 = vld [vmem:[#allocation28_spill] sm:$0xff]  ;;  %v7934_v25 = vld [vmem:[#allocation29_spill] sm:$0xff] }
 0x2e2   :  { %v1187_v15 = vadd.f32 %v7928_v40, %v5870_v10  ;;  %v1190_v17 = vadd.f32 %v7929_v41, %v5899_v35  ;;  %7931 = vst [vmem:[#allocation228_spill] sm:$0xff] %v6036_v53  ;;  %v1189_v61 = vadd.f32 %v7932_v3, %v5910_v38  ;;  %v1233_v49 = vadd.f32 %v7933_v44, %v1136_v20  ;;  %v7935_v62 = vld [vmem:[#allocation23_spill] sm:$0xff]  ;;  %v7936_v10 = vld [vmem:[#allocation30_spill] sm:$0xff]  ;;  %v7937_v40 = vld [vmem:[#allocation24_spill] sm:$0xff] }
 0x2e3   :  { %v1232_v6 = vadd.f32 %v7934_v25, %v1135_v45  ;;  %v1235_v39 = vadd.f32 %v7935_v62, %v1138_v31  ;;  %v1234_v28 = vadd.f32 %v7936_v10, %v1137_v16  ;;  %2851 = vrot.lane.b32.xlu1 %v2842_v5, %s3761_s2  ;;  %2849 = vrot.lane.b32.xlu0 %v2841_v48, %s3761_s2  ;;  %v7938_v20 = vld [vmem:[#allocation32_spill] sm:$0xff]  ;;  %v7939_v45 = vld [vmem:[#allocation35_spill] sm:$0xff]  ;;  %v2866_v31 = vstv %s5994_s11  ;;  %v7965_v53 = vld [vmem:[#allocation122_spill] sm:$0xff]  ;;  %s7006_s11 = sld [smem:[#allocation6 + $0x85]] }
 0x2e4   :  { %v2844_v35 = vmul.f32 %v2840_v12, %v5749_v13  ;;  %v2843_v41 = vmul.f32 %v2840_v12, %v5751_v34  ;;  %v1243_v38 = vadd.f32 %v7937_v40, %v1162_v11  ;;  %v1242_v3 = vadd.f32 %v7938_v20, %v1161_v63  ;;  %v7940_v16 = vld [vmem:[#allocation36_spill] sm:$0xff]  ;;  %v6072_v11 = vpop.permute.xlu1 %2423  ;;  %v6074_v63 = vpop.permute.xlu0 %2421  ;;  %v7966_v46 = vld [vmem:[#allocation123_spill] sm:$0xff] }
 0x2e5   :  { %v6053_v44 = vadd.f32 %v7939_v45, %v1164_v22  ;;  %v6059_v25 = vadd.f32 %v7940_v16, %v1163_v43  ;;  %v6062_v5 = vadd.f32 %v5590_v50, %v1188_v19  ;;  %v6065_v48 = vadd.f32 %v5593_v9, %v1187_v15  ;;  %7941 = vst [vmem:[#allocation229_spill] sm:$0xff] %v6072_v11  ;;  %v7943_v22 = vld [vmem:[#allocation107_spill] sm:$0xff]  ;;  %v7944_v43 = vld [vmem:[#allocation108_spill] sm:$0xff] }
 0x2e6   :  { %v6068_v12 = vadd.f32 %v5605_v57, %v1190_v17  ;;  %7942 = vst [vmem:[#allocation230_spill] sm:$0xff] %v6074_v63  ;;  %v6078_v62 = vadd.f32 %v7943_v22, %v5928_v42  ;;  %v6082_v50 = vadd.f32 %v7944_v43, %v5931_v55  ;;  %v6085_v9 = vadd.f32 %v5608_v4, %v1189_v61  ;;  %v7945_v57 = vld [vmem:[#allocation109_spill] sm:$0xff]  ;;  %v7946_v55 = vld [vmem:[#allocation110_spill] sm:$0xff]  ;;  %v7947_v61 = vld [vmem:[#allocation111_spill] sm:$0xff] }
 0x2e7   :  { %v1949_v19 = vstv %s6011_s12  ;;  %v6090_v15 = vadd.f32 %v7945_v57, %v5944_v21  ;;  %2855 = vrot.lane.b32.xlu1 %v2844_v35, %s3761_s2  ;;  %2853 = vrot.lane.b32.xlu0 %v2843_v41, %s3761_s2  ;;  %v2868_v42 = vmul.f32 %v2866_v31, %v5686_v36  ;;  %v2867_v17 = vmul.f32 %v2866_v31, %v5689_v26  ;;  %v7948_v21 = vld [vmem:[#allocation112_spill] sm:$0xff]  ;;  %v7949_v35 = vld [vmem:[#allocation113_spill] sm:$0xff]  ;;  %v7950_v41 = vld [vmem:[#allocation114_spill] sm:$0xff]  ;;  %s7057_s12 = sld [smem:[#allocation6 + $0xa0]] }
 0x2e8   :  { %v6100_v4 = vadd.f32 %v7946_v55, %v5947_v0  ;;  %v6104_v10 = vadd.f32 %v7947_v61, %v5970_v18  ;;  %v6108_v40 = vadd.f32 %v7948_v21, %v5979_v58  ;;  %v6111_v20 = vadd.f32 %v7949_v35, %v1215_v23  ;;  %v7951_v16 = vld [vmem:[#allocation115_spill] sm:$0xff]  ;;  %v7952_v43 = vld [vmem:[#allocation116_spill] sm:$0xff]  ;;  %v6122_v57 = vld [vmem:[#allocation2 + $0x1a] sm:$0x3f]  ;;  %v6127_v55 = vpop.permute.xlu1 %2427  ;;  %v6129_v58 = vpop.permute.xlu0 %2425 }
 0x2e9   :  { %v6114_v45 = vadd.f32 %v7950_v41, %v1214_v33  ;;  %v6117_v22 = vadd.f32 %v7951_v16, %v1223_v59  ;;  %v6120_v0 = vadd.f32 %v7952_v43, %v1222_v56  ;;  %v6125_v18 = vmul.f32 %v6122_v57, %v1949_v19  ;;  %7953 = vst [vmem:[#allocation231_spill] sm:$0xff] %v6127_v55  ;;  %v7955_v23 = vld [vmem:[#allocation117_spill] sm:$0xff]  ;;  %v7956_v33 = vld [vmem:[#allocation118_spill] sm:$0xff]  ;;  %v6145_v41 = vld [vmem:[#allocation2 + $0x4a] sm:$0x3f] }
 0x2ea   :  { %7954 = vst [vmem:[#allocation232_spill] sm:$0xff] %v6129_v58  ;;  %v6132_v61 = vadd.f32 %v7955_v23, %v1225_v32  ;;  %v6135_v21 = vadd.f32 %v7956_v33, %v1224_v29  ;;  %v6137_v59 = vld [vmem:[#allocation2 + $0x12] sm:$0xff]  ;;  %v1959_v35 = vstv %s6043_s13  ;;  %v6148_v16 = vmul.f32 %v6145_v41, %v1949_v19  ;;  %v7957_v43 = vld [vmem:[#allocation119_spill] sm:$0xff]  ;;  %v7958_v33 = vld [vmem:[#allocation120_spill] sm:$0xff]  ;;  %s7071_s13 = sld [smem:[#allocation6 + $0x81]] }
 0x2eb   :  { %v6140_v56 = vmul.f32 %v6137_v59, %v1949_v19  ;;  %2877 = vrot.lane.b32.xlu1 %v2868_v42, %s3761_s2  ;;  %2875 = vrot.lane.b32.xlu0 %v2867_v17, %s3761_s2  ;;  %v2870_v32 = vmul.f32 %v2866_v31, %v5749_v13  ;;  %v2869_v29 = vmul.f32 %v2866_v31, %v5751_v34  ;;  %v6160_v55 = vld [vmem:[#allocation2 + $0x42] sm:$0xff]  ;;  %v2892_v11 = vstv %s6056_s14  ;;  %v7960_v42 = vld [vmem:[#allocation121_spill] sm:$0xff]  ;;  %s7110_s14 = sld [smem:[#allocation6 + $0x1a]] }
 0x2ec   :  { %v6155_v23 = vadd.f32 %v7957_v43, %v1233_v49  ;;  %v6158_v58 = vadd.f32 %v7958_v33, %v1232_v6  ;;  %v6163_v63 = vmul.f32 %v6160_v55, %v1949_v19  ;;  %v6169_v17 = vadd.f32 %v7960_v42, %v1235_v39  ;;  %v6178_v43 = vpop.permute.xlu1 %2449  ;;  %v6180_v33 = vpop.permute.xlu0 %2447 }
 0x2ed   :  { %v6172_v31 = vmul.f32 %v6122_v57, %v1959_v35  ;;  %v6175_v49 = vmul.f32 %v6137_v59, %v1959_v35  ;;  %v1969_v6 = vstv %s6070_s15  ;;  %7963 = vst [vmem:[#allocation62_spill] sm:$0xff] %v6178_v43  ;;  %7964 = vst [vmem:[#allocation63_spill] sm:$0xff] %v6180_v33  ;;  %v6183_v19 = vadd.f32 %v7965_v53, %v1234_v28  ;;  %v7969_v28 = vld [vmem:[#allocation125_spill] sm:$0xff]  ;;  %v7974_v43 = vld [vmem:[#allocation128_spill] sm:$0xff]  ;;  %s7143_s15 = sld [smem:[#allocation6 + $0x9c]] }
 0x2ee   :  { %7959 = vst [vmem:[#allocation59_spill] sm:$0xff] %v6163_v63  ;;  %v6186_v47 = vadd.f32 %v7966_v46, %v1243_v38  ;;  %v6189_v39 = vmul.f32 %v6145_v41, %v1959_v35  ;;  %v6192_v42 = vmul.f32 %v6160_v55, %v1959_v35  ;;  %v2894_v46 = vmul.f32 %v2892_v11, %v5686_v36  ;;  %v7970_v35 = vld [vmem:[#allocation126_spill] sm:$0xff] }
 0x2ef   :  { %7961 = vst [vmem:[#allocation60_spill] sm:$0xff] %v6172_v31  ;;  %7962 = vst [vmem:[#allocation61_spill] sm:$0xff] %v6175_v49  ;;  %v7968_v31 = vld [vmem:[#allocation124_spill] sm:$0xff]  ;;  %v1979_v49 = vstv %s6092_s16  ;;  %2881 = vrot.lane.b32.xlu1 %v2870_v32, %s3761_s2  ;;  %2879 = vrot.lane.b32.xlu0 %v2869_v29, %s3761_s2  ;;  %v2893_v53 = vmul.f32 %v2892_v11, %v5689_v26  ;;  %v6206_v38 = vadd.f32 %v7969_v28, %v6053_v44  ;;  %v7973_v29 = vld [vmem:[#allocation127_spill] sm:$0xff]  ;;  %s7157_s16 = sld [smem:[#allocation6 + $0x35]] }
 0x2f0   :  { %7967 = vst [vmem:[#allocation64_spill] sm:$0xff] %v6192_v42  ;;  %v6195_v63 = vadd.f32 %v7968_v31, %v1242_v3  ;;  %v6210_v3 = vadd.f32 %v7970_v35, %v6059_v25  ;;  %v6213_v31 = vmul.f32 %v6122_v57, %v1969_v6  ;;  %v6216_v32 = vmul.f32 %v6137_v59, %v1969_v6  ;;  %v6232_v28 = vpop.permute.xlu1 %2453  ;;  %v6234_v35 = vpop.permute.xlu0 %2451 }
 0x2f1   :  { %v6220_v33 = vadd.f32 %v7973_v29, %v6062_v5  ;;  %v6224_v42 = vadd.f32 %v7974_v43, %v6065_v48  ;;  %v6227_v44 = vmul.f32 %v6145_v41, %v1969_v6  ;;  %v6230_v25 = vmul.f32 %v6160_v55, %v1969_v6  ;;  %7977 = vst [vmem:[#allocation69_spill] sm:$0xff] %v6232_v28  ;;  %v7980_v5 = vld [vmem:[#allocation132_spill] sm:$0xff]  ;;  %v7985_v28 = vld [vmem:[#allocation134_spill] sm:$0xff] }
 0x2f2   :  { %7971 = vst [vmem:[#allocation65_spill] sm:$0xff] %v6213_v31  ;;  %7972 = vst [vmem:[#allocation66_spill] sm:$0xff] %v6216_v32  ;;  %v7979_v32 = vld [vmem:[#allocation131_spill] sm:$0xff]  ;;  %v1434_v29 = vadd.f32 %v7980_v5, %v6082_v50  ;;  %v6241_v48 = vmul.f32 %v6122_v57, %v1979_v49  ;;  %v1989_v43 = vstv %s6143_s17  ;;  %v2896_v6 = vmul.f32 %v2892_v11, %v5749_v13  ;;  %v7984_v50 = vld [vmem:[#allocation133_spill] sm:$0xff]  ;;  %s3650_s17 = sld [smem:[#allocation6 + $0x6b]] }
 0x2f3   :  { %7975 = vst [vmem:[#allocation67_spill] sm:$0xff] %v6227_v44  ;;  %7976 = vst [vmem:[#allocation68_spill] sm:$0xff] %v6230_v25  ;;  %v1435_v31 = vadd.f32 %v7979_v32, %v6078_v62  ;;  %v6245_v44 = vmul.f32 %v6137_v59, %v1979_v49  ;;  %2903 = vrot.lane.b32.xlu1 %v2894_v46, %s3761_s2  ;;  %2901 = vrot.lane.b32.xlu0 %v2893_v53, %s3761_s2  ;;  %v7983_v62 = vld [vmem:[#allocation129_spill] sm:$0xff]  ;;  %v7986_v46 = vld [vmem:[#allocation130_spill] sm:$0xff] }
 0x2f4   :  { %7978 = vst [vmem:[#allocation70_spill] sm:$0xff] %v6234_v35  ;;  %7981 = vst [vmem:[#allocation71_spill] sm:$0xff] %v6241_v48  ;;  %v2895_v35 = vmul.f32 %v2892_v11, %v5751_v34  ;;  %v6253_v32 = vadd.f32 %v7983_v62, %v6068_v12  ;;  %v1437_v5 = vadd.f32 %v7984_v50, %v6090_v15  ;;  %v6275_v15 = vpop.permute.xlu1 %2475  ;;  %v6277_v50 = vpop.permute.xlu0 %2473 }
 0x2f5   :  { %7982 = vst [vmem:[#allocation72_spill] sm:$0xff] %v6245_v44  ;;  %v1436_v48 = vadd.f32 %v7985_v28, %v6100_v4  ;;  %v2918_v44 = vstv %s6166_s18  ;;  %v6264_v53 = vadd.f32 %v7986_v46, %v6085_v9  ;;  %v6267_v11 = vmul.f32 %v6145_v41, %v1979_v49  ;;  %7989 = vst [vmem:[#allocation75_spill] sm:$0xff] %v6275_v15  ;;  %v7991_v4 = vld [vmem:[#allocation135_spill] sm:$0xff]  ;;  %s3651_s18 = sld [smem:[#allocation6 + $0x86]] }
 0x2f6   :  { %v6270_v12 = vmul.f32 %v6160_v55, %v1979_v49  ;;  %v6273_v62 = vmul.f32 %v6122_v57, %v1989_v43  ;;  %7990 = vst [vmem:[#allocation76_spill] sm:$0xff] %v6277_v50  ;;  %v1461_v28 = vadd.f32 %v7991_v4, %v6104_v10  ;;  %v6282_v25 = vadd.f32 %v5768_v60, %v1435_v31  ;;  %v7992_v49 = vld [vmem:[#allocation136_spill] sm:$0xff] }
 0x2f7   :  { %v6285_v9 = vadd.f32 %v5784_v30, %v1434_v29  ;;  %v6288_v46 = vmul.f32 %v6137_v59, %v1989_v43  ;;  %2907 = vrot.lane.b32.xlu1 %v2896_v6, %s3761_s2  ;;  %2905 = vrot.lane.b32.xlu0 %v2895_v35, %s3761_s2  ;;  %v2920_v50 = vmul.f32 %v2918_v44, %v5686_v36  ;;  %v7995_v29 = vld [vmem:[#allocation137_spill] sm:$0xff]  ;;  %v7996_v35 = vld [vmem:[#allocation138_spill] sm:$0xff] }
 0x2f8   :  { %7987 = vst [vmem:[#allocation73_spill] sm:$0xff] %v6270_v12  ;;  %7988 = vst [vmem:[#allocation74_spill] sm:$0xff] %v6273_v62  ;;  %v1460_v12 = vadd.f32 %v7992_v49, %v6108_v40  ;;  %v1999_v62 = vstv %s6198_s19  ;;  %v2919_v10 = vmul.f32 %v2918_v44, %v5689_v26  ;;  %v6298_v60 = vadd.f32 %v5792_v1, %v1437_v5  ;;  %v7997_v49 = vld [vmem:[#allocation139_spill] sm:$0xff]  ;;  %v7998_v1 = vld [vmem:[#allocation140_spill] sm:$0xff]  ;;  %v6319_v5 = vpop.permute.xlu0 %2477  ;;  %s3652_s19 = sld [smem:[#allocation6 + $0xa1]] }
 0x2f9   :  { %v6301_v30 = vadd.f32 %v5807_v52, %v1436_v48  ;;  %v6304_v31 = vmul.f32 %v6145_v41, %v1989_v43  ;;  %v6307_v40 = vmul.f32 %v6160_v55, %v1989_v43  ;;  %v1463_v6 = vadd.f32 %v7995_v29, %v6111_v20  ;;  %v6317_v48 = vpop.permute.xlu1 %2479  ;;  %8000 = vst [vmem:[#allocation80_spill] sm:$0xff] %v6319_v5  ;;  %v8001_v43 = vld [vmem:[#allocation141_spill] sm:$0xff] }
 0x2fa   :  { %v1462_v4 = vadd.f32 %v7996_v35, %v6114_v45  ;;  %v1487_v15 = vadd.f32 %v7997_v49, %v6117_v22  ;;  %v1486_v52 = vadd.f32 %v7998_v1, %v6120_v0  ;;  %7999 = vst [vmem:[#allocation79_spill] sm:$0xff] %v6317_v48  ;;  %v6327_v20 = vmul.f32 %v6122_v57, %v1999_v62  ;;  %v8004_v35 = vld [vmem:[#allocation220_spill] sm:$0xff] }
 0x2fb   :  { %7993 = vst [vmem:[#allocation77_spill] sm:$0xff] %v6304_v31  ;;  %7994 = vst [vmem:[#allocation78_spill] sm:$0xff] %v6307_v40  ;;  %v1489_v40 = vadd.f32 %v8001_v43, %v6132_v61  ;;  %v6324_v31 = vadd.f32 %v5816_v8, %v1461_v28  ;;  %v6330_v45 = vmul.f32 %v6137_v59, %v1999_v62  ;;  %2929 = vrot.lane.b32.xlu1 %v2920_v50, %s3762_s6  ;;  %v8002_v8 = vld [vmem:[#allocation142_spill] sm:$0xff]  ;;  %v8003_v50 = vld [vmem:[#allocation45_spill] sm:$0xff] }
 0x2fc   :  { %v6333_v22 = vadd.f32 %v5819_v7, %v1460_v12  ;;  %2927 = vrot.lane.b32.xlu0 %v2919_v10, %s3762_s6  ;;  %v2922_v0 = vmul.f32 %v2918_v44, %v5749_v13  ;;  %v2921_v61 = vmul.f32 %v2918_v44, %v5751_v34  ;;  %v1488_v28 = vadd.f32 %v8002_v8, %v6135_v21  ;;  %v6356_v21 = vpop.permute.xlu0 %2499  ;;  %v8009_v43 = vld [vmem:[#allocation145_spill] sm:$0xff]  ;;  %v8054_v48 = vld [vmem:[#allocation172_spill] sm:$0xff] }
 0x2fd   :  { %v6342_v57 = vmul.f32 %v6145_v41, %v1999_v62  ;;  %v6345_v59 = vmul.f32 %v6160_v55, %v1999_v62  ;;  %v2944_v29 = vstv %s6260_s20  ;;  %v1591_v7 = vadd.f32 %v5834_v2, %v1463_v6  ;;  %v6354_v49 = vpop.permute.xlu1 %2501  ;;  %8006 = vst [vmem:[#allocation84_spill] sm:$0xff] %v6356_v21  ;;  %v8007_v41 = vld [vmem:[#allocation143_spill] sm:$0xff]  ;;  %v8008_v55 = vld [vmem:[#allocation144_spill] sm:$0xff]  ;;  %v8010_v2 = vld [vmem:[#allocation221_spill] sm:$0xff]  ;;  %s3636_s20 = sld [smem:[#allocation6 + $0x33]] }
 0x2fe   :  { %v1590_v12 = vadd.f32 %v5837_v24, %v1462_v4  ;;  %v1599_v10 = vadd.f32 %v8003_v50, %v1487_v15  ;;  %v1598_v44 = vadd.f32 %v8004_v35, %v1486_v52  ;;  %8005 = vst [vmem:[#allocation83_spill] sm:$0xff] %v6354_v49  ;;  %v1513_v1 = vadd.f32 %v8007_v41, %v6155_v23  ;;  %v8011_v24 = vld [vmem:[#allocation146_spill] sm:$0xff]  ;;  %v8019_v21 = vld [vmem:[#allocation153_spill] sm:$0xff]  ;;  %v8051_v49 = vld [vmem:[#allocation171_spill] sm:$0xff] }
 0x2ff   :  { %v1512_v62 = vadd.f32 %v8008_v55, %v6158_v58  ;;  %v1515_v8 = vadd.f32 %v8009_v43, %v6169_v17  ;;  %v1601_v6 = vadd.f32 %v8010_v2, %v1489_v40  ;;  %v1514_v15 = vadd.f32 %v8011_v24, %v6183_v19  ;;  %2933 = vrot.lane.b32.xlu1 %v2922_v0, %s3762_s6  ;;  %v8012_v58 = vld [vmem:[#allocation147_spill] sm:$0xff]  ;;  %v8013_v17 = vld [vmem:[#allocation148_spill] sm:$0xff]  ;;  %v8014_v40 = vld [vmem:[#allocation149_spill] sm:$0xff] }
 0x300   :  { %2931 = vrot.lane.b32.xlu0 %v2921_v61, %s3762_s6  ;;  %v2946_v4 = vmul.f32 %v2944_v29, %v5686_v36  ;;  %v2945_v23 = vmul.f32 %v2944_v29, %v5689_v26  ;;  %v1539_v52 = vadd.f32 %v8012_v58, %v6186_v47  ;;  %v1538_v50 = vadd.f32 %v8013_v17, %v6195_v63  ;;  %v8015_v41 = vld [vmem:[#allocation46_spill] sm:$0xff]  ;;  %v8017_v61 = vld [vmem:[#allocation151_spill] sm:$0xff]  ;;  %v8018_v2 = vld [vmem:[#allocation152_spill] sm:$0xff]  ;;  %v6390_v63 = vpop.permute.xlu0 %2503 }
 0x301   :  { %v1541_v35 = vadd.f32 %v8014_v40, %v6206_v38  ;;  %v1600_v55 = vadd.f32 %v8015_v41, %v1488_v28  ;;  %v8016_v19 = vld [vmem:[#allocation150_spill] sm:$0xff]  ;;  %v1565_v43 = vadd.f32 %v8017_v61, %v6220_v33  ;;  %v1564_v24 = vadd.f32 %v8018_v2, %v6224_v42  ;;  %v6388_v58 = vpop.permute.xlu1 %2505  ;;  %8021 = vst [vmem:[#allocation85_spill] sm:$0xff] %v6390_v63  ;;  %v8023_v17 = vld [vmem:[#allocation224_spill] sm:$0xff]  ;;  %v8025_v42 = vld [vmem:[#allocation47_spill] sm:$0xff] }
 0x302   :  { %v1540_v0 = vadd.f32 %v8016_v19, %v6210_v3  ;;  %v1567_v47 = vadd.f32 %v8019_v21, %v6253_v32  ;;  %8020 = vst [vmem:[#allocation81_spill] sm:$0xff] %v6388_v58  ;;  %v8022_v38 = vld [vmem:[#allocation154_spill] sm:$0xff]  ;;  %v1609_v40 = vadd.f32 %v8023_v17, %v1513_v1  ;;  %v8024_v3 = vld [vmem:[#allocation225_spill] sm:$0xff]  ;;  %v1611_v33 = vadd.f32 %v5913_v14, %v1515_v8  ;;  %v8026_v61 = vld [vmem:[#allocation48_spill] sm:$0xff] }
 0x303   :  { %v1566_v28 = vadd.f32 %v8022_v38, %v6264_v53  ;;  %v1608_v41 = vadd.f32 %v8024_v3, %v1512_v62  ;;  %v1610_v19 = vadd.f32 %v8025_v42, %v1514_v15  ;;  %2955 = vrot.lane.b32.xlu1 %v2946_v4, %s3762_s6  ;;  %v2948_v32 = vmul.f32 %v2944_v29, %v5749_v13  ;;  %v8027_v62 = vld [vmem:[#allocation51_spill] sm:$0xff]  ;;  %v8028_v8 = vld [vmem:[#allocation52_spill] sm:$0xff]  ;;  %v8050_v58 = vld [vmem:[#allocation170_spill] sm:$0xff] }
 0x304   :  { %2953 = vrot.lane.b32.xlu0 %v2945_v23, %s3762_s6  ;;  %v2947_v21 = vmul.f32 %v2944_v29, %v5751_v34  ;;  %v1619_v53 = vadd.f32 %v8026_v61, %v1539_v52  ;;  %v1618_v1 = vadd.f32 %v5934_v54, %v1538_v50  ;;  %v6407_v2 = vadd.f32 %v8027_v62, %v1541_v35  ;;  %v6428_v52 = vpop.permute.xlu0 %2525  ;;  %v8031_v50 = vld [vmem:[#allocation155_spill] sm:$0xff] }
 0x305   :  { %v2970_v14 = vstv %s6348_s21  ;;  %v6413_v15 = vadd.f32 %v8028_v8, %v1540_v0  ;;  %v6416_v4 = vadd.f32 %v5973_v27, %v1565_v43  ;;  %v6419_v23 = vadd.f32 %v5976_v51, %v1564_v24  ;;  %v6426_v54 = vpop.permute.xlu1 %2527  ;;  %8030 = vst [vmem:[#allocation82_spill] sm:$0xff] %v6428_v52  ;;  %v8032_v0 = vld [vmem:[#allocation156_spill] sm:$0xff]  ;;  %v8033_v43 = vld [vmem:[#allocation55_spill] sm:$0xff]  ;;  %v6514_v52 = vld [vmem:[#allocation2 + $0x50] sm:$0xff]  ;;  %s3637_s21 = sld [smem:[#allocation6 + $0x4e]] }
 0x306   :  { %v6422_v29 = vadd.f32 %v5988_v37, %v1567_v47  ;;  %8029 = vst [vmem:[#allocation86_spill] sm:$0xff] %v6426_v54  ;;  %v6432_v35 = vadd.f32 %v8031_v50, %v6282_v25  ;;  %v6436_v27 = vadd.f32 %v8032_v0, %v6285_v9  ;;  %v6439_v51 = vadd.f32 %v8033_v43, %v1566_v28  ;;  %v8034_v37 = vld [vmem:[#allocation157_spill] sm:$0xff]  ;;  %v8035_v9 = vld [vmem:[#allocation158_spill] sm:$0xff]  ;;  %v8036_v17 = vld [vmem:[#allocation159_spill] sm:$0xff] }
 0x307   :  { %v2326_v24 = vstv %s6365_s22  ;;  %v6444_v47 = vadd.f32 %v8034_v37, %v6298_v60  ;;  %2959 = vrot.lane.b32.xlu1 %v2948_v32, %s3762_s6  ;;  %v2972_v25 = vmul.f32 %v2970_v14, %v5686_v36  ;;  %v2971_v38 = vmul.f32 %v2970_v14, %v5689_v26  ;;  %v8037_v60 = vld [vmem:[#allocation160_spill] sm:$0xff]  ;;  %v8038_v32 = vld [vmem:[#allocation161_spill] sm:$0xff]  ;;  %v8040_v8 = vld [vmem:[#allocation163_spill] sm:$0xff] }
 0x308   :  { %2957 = vrot.lane.b32.xlu0 %v2947_v21, %s3762_s6  ;;  %v6454_v28 = vadd.f32 %v8035_v9, %v6301_v30  ;;  %v6458_v3 = vadd.f32 %v8036_v17, %v6324_v31  ;;  %v6462_v42 = vadd.f32 %v8037_v60, %v6333_v22  ;;  %v6465_v61 = vadd.f32 %v8038_v32, %v1591_v7  ;;  %v8039_v21 = vld [vmem:[#allocation162_spill] sm:$0xff]  ;;  %v8041_v0 = vld [vmem:[#allocation164_spill] sm:$0xff]  ;;  %v6483_v22 = vpop.permute.xlu0 %2529  ;;  %v8042_v7 = vld [vmem:[#allocation165_spill] sm:$0xff] }
 0x309   :  { %v6468_v62 = vadd.f32 %v8039_v21, %v1590_v12  ;;  %v6471_v50 = vadd.f32 %v8040_v8, %v1599_v10  ;;  %v6474_v30 = vadd.f32 %v8041_v0, %v1598_v44  ;;  %v6476_v43 = vld [vmem:[#allocation2 + $0x28] sm:$0x3f]  ;;  %v6481_v37 = vpop.permute.xlu1 %2531  ;;  %v6486_v9 = vadd.f32 %v8042_v7, %v1601_v6  ;;  %v8043_v12 = vld [vmem:[#allocation166_spill] sm:$0xff]  ;;  %v6491_v10 = vld [vmem:[#allocation2 + $0x20] sm:$0xff] }
 0x30a   :  { %v6479_v31 = vmul.f32 %v6476_v43, %v2326_v24  ;;  %v6489_v17 = vadd.f32 %v8043_v12, %v1600_v55  ;;  %v6494_v44 = vmul.f32 %v6491_v10, %v2326_v24  ;;  %v2336_v60 = vstv %s6397_s23  ;;  %v6499_v32 = vld [vmem:[#allocation2 + $0x58] sm:$0x3f]  ;;  %v8044_v8 = vld [vmem:[#allocation167_spill] sm:$0xff]  ;;  %v8045_v7 = vld [vmem:[#allocation168_spill] sm:$0xff] }
 0x30b   :  { %v6502_v21 = vmul.f32 %v6499_v32, %v2326_v24  ;;  %2981 = vrot.lane.b32.xlu1 %v2972_v25, %s3762_s6  ;;  %v2974_v6 = vmul.f32 %v2970_v14, %v5749_v13  ;;  %v2973_v55 = vmul.f32 %v2970_v14, %v5751_v34  ;;  %v6509_v0 = vadd.f32 %v8044_v8, %v1609_v40  ;;  %v8046_v25 = vld [vmem:[#allocation169_spill] sm:$0xff] }
 0x30c   :  { %2979 = vrot.lane.b32.xlu0 %v2971_v38, %s3762_s6  ;;  %v6512_v12 = vadd.f32 %v8045_v7, %v1608_v41  ;;  %v6517_v54 = vmul.f32 %v6514_v52, %v2326_v24  ;;  %v2996_v63 = vstv %s6410_s24  ;;  %v6523_v38 = vadd.f32 %v8046_v25, %v1611_v33  ;;  %v6534_v7 = vpop.permute.xlu0 %2551 }
 0x30d   :  { %v6526_v14 = vmul.f32 %v6476_v43, %v2336_v60  ;;  %v6529_v40 = vmul.f32 %v6491_v10, %v2336_v60  ;;  %v2346_v41 = vstv %s6424_s25  ;;  %v6532_v8 = vpop.permute.xlu1 %2553  ;;  %8049 = vst [vmem:[#allocation89_spill] sm:$0xff] %v6534_v7  ;;  %v6537_v24 = vadd.f32 %v8050_v58, %v1610_v19  ;;  %v8055_v19 = vld [vmem:[#allocation173_spill] sm:$0xff] }
 0x30e   :  { %v6540_v5 = vadd.f32 %v8051_v49, %v1619_v53  ;;  %v6543_v33 = vmul.f32 %v6499_v32, %v2336_v60  ;;  %v6546_v25 = vmul.f32 %v6514_v52, %v2336_v60  ;;  %v2998_v49 = vmul.f32 %v2996_v63, %v5686_v36  ;;  %v8056_v60 = vld [vmem:[#allocation174_spill] sm:$0xff] }
 0x30f   :  { %8047 = vst [vmem:[#allocation87_spill] sm:$0xff] %v6526_v14  ;;  %8048 = vst [vmem:[#allocation88_spill] sm:$0xff] %v6529_v40  ;;  %v6549_v14 = vadd.f32 %v8054_v48, %v1618_v1  ;;  %v2356_v40 = vstv %s6446_s26  ;;  %2985 = vrot.lane.b32.xlu1 %v2974_v6, %s3762_s6  ;;  %v2997_v58 = vmul.f32 %v2996_v63, %v5689_v26  ;;  %s3638_s26 = sld [smem:[#allocation6 + $0x69]] }
 0x310   :  { %8052 = vst [vmem:[#allocation90_spill] sm:$0xff] %v6543_v33  ;;  %8053 = vst [vmem:[#allocation91_spill] sm:$0xff] %v6546_v25  ;;  %2983 = vrot.lane.b32.xlu0 %v2973_v55, %s3762_s6  ;;  %v6560_v53 = vadd.f32 %v8055_v19, %v6407_v2  ;;  %v6564_v48 = vadd.f32 %v8056_v60, %v6413_v15  ;;  %v6567_v1 = vmul.f32 %v6476_v43, %v2346_v41  ;;  %v8059_v55 = vld [vmem:[#allocation175_spill] sm:$0xff]  ;;  %v8060_v33 = vld [vmem:[#allocation176_spill] sm:$0xff]  ;;  %v6588_v60 = vpop.permute.xlu0 %2555 }
 0x311   :  { %v6570_v6 = vmul.f32 %v6491_v10, %v2346_v41  ;;  %v6574_v25 = vadd.f32 %v8059_v55, %v6416_v4  ;;  %v6578_v7 = vadd.f32 %v8060_v33, %v6419_v23  ;;  %v6581_v2 = vmul.f32 %v6499_v32, %v2346_v41  ;;  %v6586_v19 = vpop.permute.xlu1 %2557  ;;  %8064 = vst [vmem:[#allocation17_spill] sm:$0xff] %v6588_v60  ;;  %v8066_v4 = vld [vmem:[#allocation180_spill] sm:$0xff] }
 0x312   :  { %8057 = vst [vmem:[#allocation92_spill] sm:$0xff] %v6567_v1  ;;  %v6584_v15 = vmul.f32 %v6514_v52, %v2346_v41  ;;  %8063 = vst [vmem:[#allocation16_spill] sm:$0xff] %v6586_v19  ;;  %v1810_v55 = vadd.f32 %v8066_v4, %v6436_v27  ;;  %v6595_v23 = vmul.f32 %v6476_v43, %v2356_v40  ;;  %v2366_v33 = vstv %s6497_s0  ;;  %v8070_v27 = vld [vmem:[#allocation181_spill] sm:$0xff] }
 0x313   :  { %8058 = vst [vmem:[#allocation93_spill] sm:$0xff] %v6570_v6  ;;  %8061 = vst [vmem:[#allocation13_spill] sm:$0xff] %v6581_v2  ;;  %v8065_v6 = vld [vmem:[#allocation179_spill] sm:$0xff]  ;;  %v6599_v2 = vmul.f32 %v6491_v10, %v2356_v40  ;;  %3007 = vrot.lane.b32.xlu1 %v2998_v49, %s3762_s6  ;;  %v3000_v41 = vmul.f32 %v2996_v63, %v5749_v13  ;;  %v1813_v4 = vadd.f32 %v8070_v27, %v6444_v47  ;;  %v8072_v49 = vld [vmem:[#allocation178_spill] sm:$0xff] }
 0x314   :  { %8062 = vst [vmem:[#allocation94_spill] sm:$0xff] %v6584_v15  ;;  %v1811_v1 = vadd.f32 %v8065_v6, %v6432_v35  ;;  %8067 = vst [vmem:[#allocation18_spill] sm:$0xff] %v6595_v23  ;;  %3005 = vrot.lane.b32.xlu0 %v2997_v58, %s3762_s6  ;;  %v2999_v15 = vmul.f32 %v2996_v63, %v5751_v34  ;;  %v8069_v35 = vld [vmem:[#allocation177_spill] sm:$0xff]  ;;  %v8071_v23 = vld [vmem:[#allocation182_spill] sm:$0xff]  ;;  %v6618_v58 = vadd.f32 %v8072_v49, %v6439_v51  ;;  %v6631_v27 = vpop.permute.xlu0 %2577 }
 0x315   :  { %8068 = vst [vmem:[#allocation19_spill] sm:$0xff] %v6599_v2  ;;  %v6607_v6 = vadd.f32 %v8069_v35, %v6422_v29  ;;  %v1812_v60 = vadd.f32 %v8071_v23, %v6454_v28  ;;  %v3022_v2 = vstv %s6520_s1  ;;  %v6621_v63 = vmul.f32 %v6499_v32, %v2356_v40  ;;  %v6629_v47 = vpop.permute.xlu1 %2579  ;;  %8077 = vst [vmem:[#allocation98_spill] sm:$0xff] %v6631_v27  ;;  %v8078_v28 = vld [vmem:[#allocation183_spill] sm:$0xff] }
 0x316   :  { %v6624_v29 = vmul.f32 %v6514_v52, %v2356_v40  ;;  %v6627_v35 = vmul.f32 %v6476_v43, %v2366_v33  ;;  %8076 = vst [vmem:[#allocation20_spill] sm:$0xff] %v6629_v47  ;;  %v1837_v23 = vadd.f32 %v8078_v28, %v6458_v3  ;;  %v6636_v19 = vadd.f32 %v6125_v18, %v1811_v1  ;;  %v8080_v40 = vld [vmem:[#allocation184_spill] sm:$0xff] }
 0x317   :  { %8073 = vst [vmem:[#allocation95_spill] sm:$0xff] %v6621_v63  ;;  %v6639_v51 = vadd.f32 %v6140_v56, %v1810_v55  ;;  %v6642_v49 = vmul.f32 %v6491_v10, %v2366_v33  ;;  %3011 = vrot.lane.b32.xlu1 %v3000_v41, %s3762_s6  ;;  %v3024_v63 = vmul.f32 %v3022_v2, %v5686_v36  ;;  %v8081_v56 = vld [vmem:[#allocation59_spill] sm:$0xff]  ;;  %v8084_v41 = vld [vmem:[#allocation185_spill] sm:$0xff] }
 0x318   :  { %8074 = vst [vmem:[#allocation96_spill] sm:$0xff] %v6624_v29  ;;  %8075 = vst [vmem:[#allocation97_spill] sm:$0xff] %v6627_v35  ;;  %v1836_v29 = vadd.f32 %v8080_v40, %v6462_v42  ;;  %v2376_v35 = vstv %s6552_s27  ;;  %3009 = vrot.lane.b32.xlu0 %v2999_v15, %s3762_s6  ;;  %v3023_v3 = vmul.f32 %v3022_v2, %v5689_v26  ;;  %v8085_v15 = vld [vmem:[#allocation186_spill] sm:$0xff] }
 0x319   :  { %8079 = vst [vmem:[#allocation99_spill] sm:$0xff] %v6642_v49  ;;  %v6652_v18 = vadd.f32 %v6148_v16, %v1813_v4  ;;  %v6655_v1 = vadd.f32 %v8081_v56, %v1812_v60  ;;  %v6658_v55 = vmul.f32 %v6499_v32, %v2366_v33  ;;  %v6661_v42 = vmul.f32 %v6514_v52, %v2366_v33  ;;  %v8086_v49 = vld [vmem:[#allocation187_spill] sm:$0xff]  ;;  %v8087_v16 = vld [vmem:[#allocation188_spill] sm:$0xff]  ;;  %v6671_v4 = vpop.permute.xlu1 %2583  ;;  %v6673_v56 = vpop.permute.xlu0 %2581  ;;  %v8088_v33 = vld [vmem:[#allocation189_spill] sm:$0xff] }
 0x31a   :  { %v1839_v28 = vadd.f32 %v8084_v41, %v6465_v61  ;;  %v1838_v40 = vadd.f32 %v8085_v15, %v6468_v62  ;;  %v1863_v27 = vadd.f32 %v8086_v49, %v6471_v50  ;;  %v1862_v60 = vadd.f32 %v8087_v16, %v6474_v30  ;;  %v8092_v50 = vld [vmem:[#allocation61_spill] sm:$0xff] }
 0x31b   :  { %8082 = vst [vmem:[#allocation100_spill] sm:$0xff] %v6658_v55  ;;  %8083 = vst [vmem:[#allocation101_spill] sm:$0xff] %v6661_v42  ;;  %v1865_v42 = vadd.f32 %v8088_v33, %v6486_v9  ;;  %v8089_v55 = vld [vmem:[#allocation60_spill] sm:$0xff]  ;;  %v6681_v61 = vmul.f32 %v6476_v43, %v2376_v35  ;;  %v6684_v62 = vmul.f32 %v6491_v10, %v2376_v35  ;;  %3033 = vrot.lane.b32.xlu1 %v3024_v63, %s3762_s6  ;;  %v8095_v15 = vld [vmem:[#allocation65_spill] sm:$0xff] }
 0x31c   :  { %v6678_v47 = vadd.f32 %v8089_v55, %v1837_v23  ;;  %v6687_v49 = vadd.f32 %v8092_v50, %v1836_v29  ;;  %3031 = vrot.lane.b32.xlu0 %v3023_v3, %s3762_s6  ;;  %v3026_v30 = vmul.f32 %v3022_v2, %v5749_v13  ;;  %v3025_v9 = vmul.f32 %v3022_v2, %v5751_v34  ;;  %v8093_v23 = vld [vmem:[#allocation190_spill] sm:$0xff]  ;;  %v8094_v29 = vld [vmem:[#allocation64_spill] sm:$0xff] }
 0x31d   :  { %8090 = vst [vmem:[#allocation21_spill] sm:$0xff] %v6681_v61  ;;  %8091 = vst [vmem:[#allocation102_spill] sm:$0xff] %v6684_v62  ;;  %v1864_v55 = vadd.f32 %v8093_v23, %v6489_v17  ;;  %v6696_v43 = vmul.f32 %v6499_v32, %v2376_v35  ;;  %v6699_v10 = vmul.f32 %v6514_v52, %v2376_v35  ;;  %v3048_v41 = vstv %s6614_s28  ;;  %v8096_v2 = vld [vmem:[#allocation66_spill] sm:$0xff]  ;;  %v6714_v17 = vpop.permute.xlu1 %2605  ;;  %v6716_v32 = vpop.permute.xlu0 %2603  ;;  %v8099_v52 = vld [vmem:[#allocation191_spill] sm:$0xff] }
 0x31e   :  { %v1967_v63 = vadd.f32 %v6189_v39, %v1839_v28  ;;  %v6706_v3 = vadd.f32 %v8094_v29, %v1838_v40  ;;  %v6709_v16 = vadd.f32 %v8095_v15, %v1863_v27  ;;  %v6712_v33 = vadd.f32 %v8096_v2, %v1862_v60  ;;  %8097 = vst [vmem:[#allocation103_spill] sm:$0xff] %v6714_v17  ;;  %v8100_v50 = vld [vmem:[#allocation192_spill] sm:$0xff]  ;;  %v8101_v39 = vld [vmem:[#allocation193_spill] sm:$0xff]  ;;  %v8102_v40 = vld [vmem:[#allocation67_spill] sm:$0xff] }
 0x31f   :  { %8098 = vst [vmem:[#allocation104_spill] sm:$0xff] %v6716_v32  ;;  %v1889_v35 = vadd.f32 %v8099_v52, %v6509_v0  ;;  %v1888_v23 = vadd.f32 %v8100_v50, %v6512_v12  ;;  %v1891_v28 = vadd.f32 %v8101_v39, %v6523_v38  ;;  %v6725_v29 = vadd.f32 %v8102_v40, %v1865_v42  ;;  %v8103_v27 = vld [vmem:[#allocation194_spill] sm:$0xff]  ;;  %v8104_v12 = vld [vmem:[#allocation195_spill] sm:$0xff]  ;;  %v8105_v38 = vld [vmem:[#allocation196_spill] sm:$0xff] }
 0x320   :  { %v1890_v60 = vadd.f32 %v8103_v27, %v6537_v24  ;;  %3037 = vrot.lane.b32.xlu1 %v3026_v30, %s3762_s6  ;;  %3035 = vrot.lane.b32.xlu0 %v3025_v9, %s3762_s6  ;;  %v3050_v0 = vmul.f32 %v3048_v41, %v5686_v36  ;;  %v3049_v15 = vmul.f32 %v3048_v41, %v5689_v26  ;;  %v8106_v52 = vld [vmem:[#allocation197_spill] sm:$0xff]  ;;  %v8107_v39 = vld [vmem:[#allocation68_spill] sm:$0xff]  ;;  %v8108_v24 = vld [vmem:[#allocation198_spill] sm:$0xff] }
 0x321   :  { %v1915_v2 = vadd.f32 %v8104_v12, %v6540_v5  ;;  %v1914_v42 = vadd.f32 %v8105_v38, %v6549_v14  ;;  %v1917_v50 = vadd.f32 %v8106_v52, %v6560_v53  ;;  %v1976_v40 = vadd.f32 %v8107_v39, %v1864_v55  ;;  %v8109_v9 = vld [vmem:[#allocation199_spill] sm:$0xff]  ;;  %v8110_v36 = vld [vmem:[#allocation200_spill] sm:$0xff]  ;;  %v8111_v62 = vld [vmem:[#allocation201_spill] sm:$0xff]  ;;  %v6750_v12 = vpop.permute.xlu1 %2609  ;;  %v6752_v14 = vpop.permute.xlu0 %2607 }
 0x322   :  { %v1916_v30 = vadd.f32 %v8108_v24, %v6564_v48  ;;  %v1941_v27 = vadd.f32 %v8109_v9, %v6574_v25  ;;  %v1940_v26 = vadd.f32 %v8110_v36, %v6578_v7  ;;  %v1943_v5 = vadd.f32 %v8111_v62, %v6607_v6  ;;  %8112 = vst [vmem:[#allocation105_spill] sm:$0xff] %v6750_v12  ;;  %v8114_v53 = vld [vmem:[#allocation202_spill] sm:$0xff]  ;;  %v8115_v38 = vld [vmem:[#allocation71_spill] sm:$0xff]  ;;  %v8116_v48 = vld [vmem:[#allocation72_spill] sm:$0xff] }
 0x323   :  { %8113 = vst [vmem:[#allocation106_spill] sm:$0xff] %v6752_v14  ;;  %v1942_v55 = vadd.f32 %v8114_v53, %v6618_v58  ;;  %v1985_v52 = vadd.f32 %v8115_v38, %v1889_v35  ;;  %v1984_v39 = vadd.f32 %v8116_v48, %v1888_v23  ;;  %v1987_v25 = vadd.f32 %v6267_v11, %v1891_v28  ;;  %v8117_v7 = vld [vmem:[#allocation73_spill] sm:$0xff]  ;;  %v8118_v9 = vld [vmem:[#allocation74_spill] sm:$0xff]  ;;  %v6771_v11 = vld [vmem:[#allocation2 + $0x2a] sm:$0x3f] }
 0x324   :  { %v1986_v24 = vadd.f32 %v8117_v7, %v1890_v60  ;;  %3059 = vrot.lane.b32.xlu1 %v3050_v0, %s3762_s6  ;;  %3057 = vrot.lane.b32.xlu0 %v3049_v15, %s3762_s6  ;;  %v3052_v6 = vmul.f32 %v3048_v41, %v5749_v13  ;;  %v3051_v62 = vmul.f32 %v3048_v41, %v5751_v34  ;;  %v8119_v23 = vld [vmem:[#allocation77_spill] sm:$0xff]  ;;  %v3138_v28 = vstv %s6702_s29  ;;  %v6774_v60 = vld [vmem:[#allocation2 + $0x22] sm:$0xff]  ;;  %v8120_v0 = vld [vmem:[#allocation78_spill] sm:$0xff] }
 0x325   :  { %v1995_v58 = vadd.f32 %v8118_v9, %v1915_v2  ;;  %v1994_v35 = vadd.f32 %v6288_v46, %v1914_v42  ;;  %v6769_v36 = vadd.f32 %v8119_v23, %v1917_v50  ;;  %v6779_v15 = vadd.f32 %v8120_v0, %v1916_v30  ;;  %v6788_v2 = vpop.permute.xlu1 %2631  ;;  %v6790_v42 = vpop.permute.xlu0 %2629  ;;  %v8123_v50 = vld [vmem:[#allocation203_spill] sm:$0xff]  ;;  %v8124_v38 = vld [vmem:[#allocation204_spill] sm:$0xff]  ;;  %v6821_v9 = vld [vmem:[#allocation2 + $0x52] sm:$0xff] }
 0x326   :  { %v6782_v34 = vadd.f32 %v6327_v20, %v1941_v27  ;;  %v6785_v41 = vadd.f32 %v6330_v45, %v1940_v26  ;;  %v2007_v46 = vadd.f32 %v6342_v57, %v1943_v5  ;;  %8121 = vst [vmem:[#allocation28_spill] sm:$0xff] %v6788_v2  ;;  %8122 = vst [vmem:[#allocation29_spill] sm:$0xff] %v6790_v42  ;;  %v2702_v7 = vstv %s6727_s30  ;;  %v8125_v20 = vld [vmem:[#allocation205_spill] sm:$0xff]  ;;  %v8128_v5 = vld [vmem:[#allocation208_spill] sm:$0xff] }
 0x327   :  { %v2031_v53 = vadd.f32 %v8123_v50, %v6636_v19  ;;  %v2030_v48 = vadd.f32 %v8124_v38, %v6639_v51  ;;  %v2006_v30 = vadd.f32 %v6345_v59, %v1942_v55  ;;  %v2033_v45 = vadd.f32 %v8125_v20, %v6652_v18  ;;  %v8126_v19 = vld [vmem:[#allocation206_spill] sm:$0xff]  ;;  %v8127_v51 = vld [vmem:[#allocation207_spill] sm:$0xff]  ;;  %v8129_v18 = vld [vmem:[#allocation209_spill] sm:$0xff] }
 0x328   :  { %3063 = vrot.lane.b32.xlu1 %v3052_v6, %s3762_s6  ;;  %3061 = vrot.lane.b32.xlu0 %v3051_v62, %s3762_s6  ;;  %v3140_v57 = vmul.f32 %v3138_v28, %v6771_v11  ;;  %v3139_v27 = vmul.f32 %v3138_v28, %v6774_v60  ;;  %v2032_v26 = vadd.f32 %v8126_v19, %v6655_v1  ;;  %v6819_v62 = vld [vmem:[#allocation2 + $0x5a] sm:$0x3f]  ;;  %v8131_v1 = vld [vmem:[#allocation211_spill] sm:$0xff]  ;;  %v8132_v50 = vld [vmem:[#allocation212_spill] sm:$0xff] }
 0x329   :  { %v6810_v59 = vadd.f32 %v8127_v51, %v6678_v47  ;;  %v6814_v55 = vadd.f32 %v8128_v5, %v6687_v49  ;;  %v6817_v6 = vadd.f32 %v8129_v18, %v1967_v63  ;;  %v8130_v23 = vld [vmem:[#allocation210_spill] sm:$0xff]  ;;  %v6829_v47 = vadd.f32 %v8131_v1, %v6709_v16  ;;  %v6835_v49 = vpop.permute.xlu1 %2635  ;;  %v6837_v63 = vpop.permute.xlu0 %2633  ;;  %v6839_v20 = vld [vmem:[#allocation2 + $0x29] sm:$0x3f]  ;;  %v6851_v18 = vld [vmem:[#allocation2 + $0x21] sm:$0xff] }
 0x32a   :  { %v6825_v0 = vadd.f32 %v8130_v23, %v6706_v3  ;;  %v6833_v38 = vadd.f32 %v8132_v50, %v6712_v33  ;;  %8133 = vst [vmem:[#allocation23_spill] sm:$0xff] %v6835_v49  ;;  %8134 = vst [vmem:[#allocation30_spill] sm:$0xff] %v6837_v63  ;;  %v6842_v19 = vmul.f32 %v6839_v20, %v2702_v7  ;;  %v8135_v3 = vld [vmem:[#allocation213_spill] sm:$0xff]  ;;  %v8136_v16 = vld [vmem:[#allocation214_spill] sm:$0xff]  ;;  %v2712_v23 = vstv %s6759_s4 }
 0x32b   :  { %v6846_v51 = vadd.f32 %v8135_v3, %v6725_v29  ;;  %v6849_v5 = vadd.f32 %v8136_v16, %v1976_v40  ;;  %v6854_v33 = vmul.f32 %v6851_v18, %v2702_v7  ;;  %v3142_v1 = vmul.f32 %v3138_v28, %v6819_v62  ;;  %v8137_v3 = vld [vmem:[#allocation215_spill] sm:$0xff]  ;;  %v8138_v16 = vld [vmem:[#allocation216_spill] sm:$0xff]  ;;  %v8139_v49 = vld [vmem:[#allocation217_spill] sm:$0xff] }
 0x32c   :  { %3149 = vrot.lane.b32.xlu1 %v3140_v57, %s3761_s2  ;;  %3147 = vrot.lane.b32.xlu0 %v3139_v27, %s3761_s2  ;;  %v3141_v50 = vmul.f32 %v3138_v28, %v6821_v9  ;;  %v6862_v29 = vmul.f32 %v2702_v7, %v5749_v13  ;;  %v6865_v40 = vadd.f32 %v8137_v3, %v1985_v52  ;;  %v3164_v63 = vstv %s6776_s5  ;;  %v6873_v57 = vld [vmem:[#allocation2 + $0x51] sm:$0xff]  ;;  %v8152_v12 = vld [vmem:[#allocation12_spill] sm:$0xff] }
 0x32d   :  { %v6868_v61 = vadd.f32 %v8138_v16, %v1984_v39  ;;  %v6876_v27 = vmul.f32 %v6873_v57, %v2702_v7  ;;  %v6879_v28 = vadd.f32 %v8139_v49, %v1987_v25  ;;  %v8141_v13 = vld [vmem:[#allocation218_spill] sm:$0xff]  ;;  %v6884_v52 = vpop.permute.xlu1 %2657  ;;  %v6886_v3 = vpop.permute.xlu0 %2655  ;;  %v6889_v39 = vmul.f32 %v6839_v20, %v2712_v23 }
 0x32e   :  { %v6882_v42 = vadd.f32 %v8141_v13, %v1986_v24  ;;  %8143 = vst [vmem:[#allocation35_spill] sm:$0xff] %v6884_v52  ;;  %8144 = vst [vmem:[#allocation36_spill] sm:$0xff] %v6886_v3  ;;  %v6892_v16 = vmul.f32 %v6851_v18, %v2712_v23  ;;  %v8145_v2 = vld [vmem:[#allocation226_spill] sm:$0xff]  ;;  %v6903_v24 = vmul.f32 %v6873_v57, %v2712_v23  ;;  %v2722_v49 = vstv %s6798_s7  ;;  %v8149_v13 = vld [vmem:[#allocation227_spill] sm:$0xff]  ;;  %s3639_s7 = sld [smem:[#allocation6 + $0x84]] }
 0x32f   :  { %8140 = vst [vmem:[#allocation24_spill] sm:$0xff] %v6879_v28  ;;  %v6895_v14 = vadd.f32 %v8145_v2, %v1995_v58  ;;  %v6897_v7 = vld [vmem:[#allocation2 + $0x59] sm:$0x3f]  ;;  %v6907_v3 = vadd.f32 %v8149_v13, %v1994_v35  ;;  %v3166_v52 = vmul.f32 %v3164_v63, %v6771_v11  ;;  %v3165_v58 = vmul.f32 %v3164_v63, %v6774_v60  ;;  %v8151_v2 = vld [vmem:[#allocation11_spill] sm:$0xff] }
 0x330   :  { %8142 = vst [vmem:[#allocation32_spill] sm:$0xff] %v6882_v42  ;;  %v6900_v25 = vmul.f32 %v6897_v7, %v2712_v23  ;;  %8148 = vst [vmem:[#allocation109_spill] sm:$0xff] %v6903_v24  ;;  %3153 = vrot.lane.b32.xlu1 %v3142_v1, %s3761_s2  ;;  %3151 = vrot.lane.b32.xlu0 %v3141_v50, %s3761_s2  ;;  %v2162_v42 = vadd.f32 %v8152_v12, %v2006_v30  ;;  %v8153_v23 = vld [vmem:[#allocation14_spill] sm:$0xff]  ;;  %v8154_v24 = vld [vmem:[#allocation15_spill] sm:$0xff] }
 0x331   :  { %8146 = vst [vmem:[#allocation107_spill] sm:$0xff] %v6895_v14  ;;  %8150 = vst [vmem:[#allocation110_spill] sm:$0xff] %v6907_v3  ;;  %v2163_v14 = vadd.f32 %v8151_v2, %v2007_v46  ;;  %v2187_v28 = vadd.f32 %v8153_v23, %v2031_v53  ;;  %v8155_v35 = vld [vmem:[#allocation27_spill] sm:$0xff]  ;;  %v8156_v3 = vld [vmem:[#allocation22_spill] sm:$0xff]  ;;  %v6921_v32 = vpop.permute.xlu1 %2661  ;;  %v6923_v50 = vpop.permute.xlu0 %2659  ;;  %v6926_v17 = vmul.f32 %v6839_v20, %v2722_v49 }
 0x332   :  { %8147 = vst [vmem:[#allocation108_spill] sm:$0xff] %v6900_v25  ;;  %v2186_v25 = vadd.f32 %v8154_v24, %v2030_v48  ;;  %v2189_v13 = vadd.f32 %v8155_v35, %v2033_v45  ;;  %v2188_v1 = vadd.f32 %v8156_v3, %v2032_v26  ;;  %8157 = vst [vmem:[#allocation111_spill] sm:$0xff] %v6921_v32  ;;  %v8159_v12 = vld [vmem:[#allocation233_spill] sm:$0xff]  ;;  %v8160_v48 = vld [vmem:[#allocation234_spill] sm:$0xff] }
 0x333   :  { %8158 = vst [vmem:[#allocation112_spill] sm:$0xff] %v6923_v50  ;;  %v6929_v46 = vmul.f32 %v6851_v18, %v2722_v49  ;;  %v6933_v53 = vadd.f32 %v8159_v12, %v6769_v36  ;;  %v6937_v30 = vadd.f32 %v8160_v48, %v6779_v15  ;;  %v8161_v45 = vld [vmem:[#allocation53_spill] sm:$0xff]  ;;  %v8162_v3 = vld [vmem:[#allocation54_spill] sm:$0xff]  ;;  %v3168_v2 = vmul.f32 %v3164_v63, %v6819_v62 }
 0x334   :  { %v2319_v26 = vadd.f32 %v8161_v45, %v2163_v14  ;;  %v2318_v24 = vadd.f32 %v8162_v3, %v2162_v42  ;;  %3175 = vrot.lane.b32.xlu1 %v3166_v52, %s3761_s2  ;;  %3173 = vrot.lane.b32.xlu0 %v3165_v58, %s3761_s2  ;;  %v3167_v23 = vmul.f32 %v3164_v63, %v6821_v9  ;;  %v3190_v14 = vstv %s6871_s8  ;;  %v8163_v52 = vld [vmem:[#allocation235_spill] sm:$0xff] }
 0x335   :  { %v6948_v36 = vmul.f32 %v6897_v7, %v2722_v49  ;;  %v2332_v15 = vadd.f32 %v6479_v31, %v2187_v28  ;;  %v2331_v35 = vadd.f32 %v6494_v44, %v2186_v25  ;;  %v6954_v42 = vmul.f32 %v6873_v57, %v2722_v49  ;;  %v8164_v63 = vld [vmem:[#allocation31_spill] sm:$0xff]  ;;  %v6964_v3 = vpop.permute.xlu1 %2683  ;;  %v6966_v31 = vpop.permute.xlu0 %2681  ;;  %v8165_v44 = vld [vmem:[#allocation56_spill] sm:$0xff]  ;;  %v8166_v25 = vld [vmem:[#allocation57_spill] sm:$0xff] }
 0x336   :  { %v6958_v58 = vadd.f32 %v8163_v52, %v6782_v34  ;;  %v2213_v12 = vadd.f32 %v8164_v63, %v6810_v59  ;;  %v2334_v48 = vadd.f32 %v6502_v21, %v2189_v13  ;;  %v2333_v45 = vadd.f32 %v6517_v54, %v2188_v1  ;;  %v8167_v52 = vld [vmem:[#allocation25_spill] sm:$0xff]  ;;  %v8172_v63 = vld [vmem:[#allocation87_spill] sm:$0xff] }
 0x337   :  { %v2408_v28 = vadd.f32 %v8165_v44, %v2332_v15  ;;  %v2407_v49 = vadd.f32 %v8166_v25, %v2331_v35  ;;  %v2384_v50 = vadd.f32 %v6696_v43, %v2319_v26  ;;  %v2383_v34 = vadd.f32 %v6699_v10, %v2318_v24  ;;  %v8168_v10 = vld [vmem:[#allocation89_spill] sm:$0xff] }
 0x338   :  { %v2212_v32 = vadd.f32 %v8167_v52, %v6814_v55  ;;  %3179 = vrot.lane.b32.xlu1 %v3168_v2, %s3761_s2  ;;  %3177 = vrot.lane.b32.xlu0 %v3167_v23, %s3761_s2  ;;  %v3192_v54 = vmul.f32 %v3190_v14, %v6771_v11  ;;  %v3191_v21 = vmul.f32 %v3190_v14, %v6774_v60  ;;  %v6979_v59 = vstv %s6913_s9  ;;  %v8169_v55 = vld [vmem:[#allocation236_spill] sm:$0xff]  ;;  %v8170_v2 = vld [vmem:[#allocation33_spill] sm:$0xff] }
 0x339   :  { %v2540_v13 = vadd.f32 %v6481_v37, %v2384_v50  ;;  %v2539_v1 = vadd.f32 %v6483_v22, %v2383_v34  ;;  %v2564_v43 = vadd.f32 %v6532_v8, %v2408_v28  ;;  %v2563_v26 = vadd.f32 %v8168_v10, %v2407_v49  ;;  %v8171_v15 = vld [vmem:[#allocation37_spill] sm:$0xff]  ;;  %v2688_v37 = vpop.permute.xlu1 %2687  ;;  %v2686_v50 = vpop.permute.xlu0 %2685  ;;  %v8173_v22 = vld [vmem:[#allocation58_spill] sm:$0xff]  ;;  %v8174_v8 = vld [vmem:[#allocation228_spill] sm:$0xff] }
 0x33a   :  { %v6987_v24 = vadd.f32 %v8169_v55, %v6785_v41  ;;  %v2215_v23 = vadd.f32 %v8170_v2, %v6817_v6  ;;  %v2214_v35 = vadd.f32 %v8171_v15, %v6825_v0  ;;  %v2342_v44 = vadd.f32 %v8172_v63, %v2213_v12  ;;  %v8175_v41 = vld [vmem:[#allocation88_spill] sm:$0xff]  ;;  %v8179_v2 = vld [vmem:[#allocation90_spill] sm:$0xff]  ;;  %v8180_v15 = vld [vmem:[#allocation91_spill] sm:$0xff] }
 0x33b   :  { %v2410_v25 = vadd.f32 %v8173_v22, %v2334_v48  ;;  %v2409_v28 = vadd.f32 %v8174_v8, %v2333_v45  ;;  %v6996_v49 = vadd.f32 %v2688_v37, %v2540_v13  ;;  %v6998_v34 = vadd.f32 %v2686_v50, %v2539_v1  ;;  %v8176_v48 = vld [vmem:[#allocation16_spill] sm:$0xff]  ;;  %v8177_v45 = vld [vmem:[#allocation17_spill] sm:$0xff]  ;;  %v8182_v8 = vld [vmem:[#allocation230_spill] sm:$0xff] }
 0x33c   :  { %v2341_v52 = vadd.f32 %v8175_v41, %v2212_v32  ;;  %3201 = vrot.lane.b32.xlu1 %v3192_v54, %s3761_s2  ;;  %3199 = vrot.lane.b32.xlu0 %v3191_v21, %s3761_s2  ;;  %v3194_v6 = vmul.f32 %v3190_v14, %v6819_v62  ;;  %v3193_v0 = vmul.f32 %v3190_v14, %v6821_v9  ;;  %v3216_v12 = vstv %s6945_s10  ;;  %v8178_v32 = vld [vmem:[#allocation38_spill] sm:$0xff]  ;;  %v8181_v22 = vld [vmem:[#allocation229_spill] sm:$0xff] }
 0x33d   :  { %v2566_v10 = vadd.f32 %v8176_v48, %v2410_v25  ;;  %v2565_v13 = vadd.f32 %v8177_v45, %v2409_v28  ;;  %v2708_v1 = vadd.f32 %v6842_v19, %v2564_v43  ;;  %v2707_v55 = vadd.f32 %v6854_v33, %v2563_v26  ;;  %v2774_v37 = vpop.permute.xlu1 %2773  ;;  %v2772_v14 = vpop.permute.xlu0 %2771 }
 0x33e   :  { %v2239_v54 = vadd.f32 %v8178_v32, %v6829_v47  ;;  %v2344_v21 = vadd.f32 %v8179_v2, %v2215_v23  ;;  %v2343_v63 = vadd.f32 %v8180_v15, %v2214_v35  ;;  %v7018_v50 = vmul.f32 %v6839_v20, %v6979_v59  ;;  %v8183_v47 = vld [vmem:[#allocation26_spill] sm:$0xff]  ;;  %v8184_v35 = vld [vmem:[#allocation20_spill] sm:$0xff] }
 0x33f   :  { %v2434_v25 = vadd.f32 %v8181_v22, %v2342_v44  ;;  %v2433_v28 = vadd.f32 %v8182_v8, %v2341_v52  ;;  %v7022_v19 = vadd.f32 %v2774_v37, %v2708_v1  ;;  %v7024_v33 = vadd.f32 %v2772_v14, %v2707_v55  ;;  %v8185_v44 = vld [vmem:[#allocation98_spill] sm:$0xff]  ;;  %v8189_v14 = vld [vmem:[#allocation231_spill] sm:$0xff] }
 0x340   :  { %v2238_v43 = vadd.f32 %v8183_v47, %v6833_v38  ;;  %3205 = vrot.lane.b32.xlu1 %v3194_v6, %s3761_s2  ;;  %3203 = vrot.lane.b32.xlu0 %v3193_v0, %s3761_s2  ;;  %v3218_v26 = vmul.f32 %v3216_v12, %v6771_v11  ;;  %v3217_v23 = vmul.f32 %v3216_v12, %v6774_v60  ;;  %v8186_v1 = vld [vmem:[#allocation34_spill] sm:$0xff]  ;;  %v8187_v6 = vld [vmem:[#allocation39_spill] sm:$0xff]  ;;  %v8188_v0 = vld [vmem:[#allocation92_spill] sm:$0xff]  ;;  %v3242_v8 = vstv %s7006_s11 }
 0x341   :  { %v2590_v41 = vadd.f32 %v8184_v35, %v2434_v25  ;;  %v2589_v48 = vadd.f32 %v8185_v44, %v2433_v28  ;;  %v2710_v52 = vadd.f32 %v6862_v29, %v2566_v10  ;;  %v2709_v45 = vadd.f32 %v6876_v27, %v2565_v13  ;;  %v2778_v2 = vpop.permute.xlu1 %2777  ;;  %v2776_v15 = vpop.permute.xlu0 %2775  ;;  %v8190_v29 = vld [vmem:[#allocation232_spill] sm:$0xff]  ;;  %v8193_v35 = vld [vmem:[#allocation13_spill] sm:$0xff]  ;;  %v8194_v44 = vld [vmem:[#allocation94_spill] sm:$0xff] }
 0x342   :  { %v2241_v38 = vadd.f32 %v8186_v1, %v6846_v51  ;;  %v2240_v55 = vadd.f32 %v8187_v6, %v6849_v5  ;;  %v2352_v32 = vadd.f32 %v8188_v0, %v2239_v54  ;;  %v7043_v37 = vmul.f32 %v6851_v18, %v6979_v59  ;;  %v8191_v51 = vld [vmem:[#allocation93_spill] sm:$0xff]  ;;  %v8198_v0 = vld [vmem:[#allocation103_spill] sm:$0xff] }
 0x343   :  { %v2436_v22 = vadd.f32 %v8189_v14, %v2344_v21  ;;  %v2435_v10 = vadd.f32 %v8190_v29, %v2343_v63  ;;  %v7047_v27 = vadd.f32 %v2778_v2, %v2710_v52  ;;  %v7049_v13 = vadd.f32 %v2776_v15, %v2709_v45  ;;  %v8200_v14 = vld [vmem:[#allocation108_spill] sm:$0xff]  ;;  %v8201_v29 = vld [vmem:[#allocation109_spill] sm:$0xff] }
 0x344   :  { %v2351_v25 = vadd.f32 %v8191_v51, %v2238_v43  ;;  %3227 = vrot.lane.b32.xlu1 %v3218_v26, %s3761_s2  ;;  %3225 = vrot.lane.b32.xlu0 %v3217_v23, %s3761_s2  ;;  %v3220_v5 = vmul.f32 %v3216_v12, %v6819_v62  ;;  %v3219_v54 = vmul.f32 %v3216_v12, %v6821_v9  ;;  %v8192_v43 = vld [vmem:[#allocation40_spill] sm:$0xff] }
 0x345   :  { %v2592_v21 = vadd.f32 %v6671_v4, %v2436_v22  ;;  %v2591_v63 = vadd.f32 %v6673_v56, %v2435_v10  ;;  %v2718_v28 = vadd.f32 %v6889_v39, %v2590_v41  ;;  %v2717_v47 = vadd.f32 %v6892_v16, %v2589_v48  ;;  %v2800_v45 = vpop.permute.xlu1 %2799  ;;  %v2798_v12 = vpop.permute.xlu0 %2797  ;;  %v8195_v4 = vld [vmem:[#allocation62_spill] sm:$0xff]  ;;  %v8196_v39 = vld [vmem:[#allocation63_spill] sm:$0xff]  ;;  %v8202_v51 = vld [vmem:[#allocation24_spill] sm:$0xff] }
 0x346   :  { %v2265_v26 = vadd.f32 %v8192_v43, %v6865_v40  ;;  %v2354_v23 = vadd.f32 %v8193_v35, %v2241_v38  ;;  %v2353_v52 = vadd.f32 %v8194_v44, %v2240_v55  ;;  %v7069_v1 = vmul.f32 %v6897_v7, %v6979_v59  ;;  %v8197_v40 = vld [vmem:[#allocation219_spill] sm:$0xff] }
 0x347   :  { %v2460_v56 = vadd.f32 %v8195_v4, %v2352_v32  ;;  %v2459_v41 = vadd.f32 %v8196_v39, %v2351_v25  ;;  %v7075_v16 = vadd.f32 %v2800_v45, %v2718_v28  ;;  %v7077_v48 = vadd.f32 %v2798_v12, %v2717_v47  ;;  %v8199_v32 = vld [vmem:[#allocation104_spill] sm:$0xff]  ;;  %v8203_v25 = vld [vmem:[#allocation41_spill] sm:$0xff] }
 0x348   :  { %v2264_v38 = vadd.f32 %v8197_v40, %v6868_v61  ;;  %3231 = vrot.lane.b32.xlu1 %v3220_v5, %s3761_s2  ;;  %3229 = vrot.lane.b32.xlu0 %v3219_v54, %s3761_s2  ;;  %v3244_v6 = vmul.f32 %v3242_v8, %v6771_v11  ;;  %v3243_v55 = vmul.f32 %v3242_v8, %v6774_v60  ;;  %v8204_v28 = vld [vmem:[#allocation32_spill] sm:$0xff]  ;;  %v8205_v5 = vld [vmem:[#allocation42_spill] sm:$0xff]  ;;  %v8207_v12 = vld [vmem:[#allocation69_spill] sm:$0xff] }
 0x349   :  { %v2616_v2 = vadd.f32 %v8198_v0, %v2460_v56  ;;  %v2615_v15 = vadd.f32 %v8199_v32, %v2459_v41  ;;  %v2720_v22 = vadd.f32 %v8200_v14, %v2592_v21  ;;  %v2719_v10 = vadd.f32 %v8201_v29, %v2591_v63  ;;  %v8206_v54 = vld [vmem:[#allocation18_spill] sm:$0xff]  ;;  %v2804_v35 = vpop.permute.xlu1 %2803  ;;  %v2802_v44 = vpop.permute.xlu0 %2801  ;;  %v8209_v41 = vld [vmem:[#allocation19_spill] sm:$0xff] }
 0x34a   :  { %v2267_v61 = vadd.f32 %v8203_v25, %v8202_v51  ;;  %v2266_v47 = vadd.f32 %v8205_v5, %v8204_v28  ;;  %v2362_v43 = vadd.f32 %v8206_v54, %v2265_v26  ;;  %v7096_v45 = vmul.f32 %v6873_v57, %v6979_v59  ;;  %v8208_v21 = vld [vmem:[#allocation70_spill] sm:$0xff]  ;;  %v8212_v29 = vld [vmem:[#allocation107_spill] sm:$0xff]  ;;  %v8215_v25 = vld [vmem:[#allocation96_spill] sm:$0xff] }
 0x34b   :  { %v2462_v4 = vadd.f32 %v8207_v12, %v2354_v23  ;;  %v2461_v56 = vadd.f32 %v8208_v21, %v2353_v52  ;;  %v7100_v63 = vadd.f32 %v2804_v35, %v2720_v22  ;;  %v7102_v39 = vadd.f32 %v2802_v44, %v2719_v10  ;;  %v8210_v23 = vld [vmem:[#allocation105_spill] sm:$0xff]  ;;  %v8211_v32 = vld [vmem:[#allocation106_spill] sm:$0xff]  ;;  %v8213_v10 = vld [vmem:[#allocation43_spill] sm:$0xff] }
 0x34c   :  { %v2361_v40 = vadd.f32 %v8209_v41, %v2264_v38  ;;  %3253 = vrot.lane.b32.xlu1 %v3244_v6, %s3761_s2  ;;  %3251 = vrot.lane.b32.xlu0 %v3243_v55, %s3761_s2  ;;  %v3246_v26 = vmul.f32 %v3242_v8, %v6819_v62  ;;  %v3245_v59 = vmul.f32 %v3242_v8, %v6821_v9  ;;  %v3268_v0 = vstv %s7057_s12  ;;  %v8214_v51 = vld [vmem:[#allocation95_spill] sm:$0xff]  ;;  %v8217_v12 = vld [vmem:[#allocation76_spill] sm:$0xff] }
 0x34d   :  { %v2618_v52 = vadd.f32 %v8210_v23, %v2462_v4  ;;  %v2617_v14 = vadd.f32 %v8211_v32, %v2461_v56  ;;  %v2728_v22 = vadd.f32 %v6926_v17, %v2616_v2  ;;  %v2727_v38 = vadd.f32 %v6929_v46, %v2615_v15  ;;  %v2826_v5 = vpop.permute.xlu1 %2825  ;;  %v2824_v8 = vpop.permute.xlu0 %2823  ;;  %v8216_v35 = vld [vmem:[#allocation75_spill] sm:$0xff]  ;;  %v8218_v17 = vld [vmem:[#allocation110_spill] sm:$0xff]  ;;  %v8219_v46 = vld [vmem:[#allocation44_spill] sm:$0xff] }
 0x34e   :  { %v2291_v6 = vadd.f32 %v8213_v10, %v8212_v29  ;;  %v2364_v55 = vadd.f32 %v8214_v51, %v2267_v61  ;;  %v2363_v28 = vadd.f32 %v8215_v25, %v2266_v47  ;;  %v2742_v54 = vstv %s7071_s13  ;;  %v8220_v47 = vld [vmem:[#allocation28_spill] sm:$0xff]  ;;  %v8223_v29 = vld [vmem:[#allocation223_spill] sm:$0xff] }
 0x34f   :  { %v2486_v44 = vadd.f32 %v8216_v35, %v2362_v43  ;;  %v2485_v4 = vadd.f32 %v8217_v12, %v2361_v40  ;;  %v7123_v21 = vadd.f32 %v2826_v5, %v2728_v22  ;;  %v7125_v56 = vadd.f32 %v2824_v8, %v2727_v38  ;;  %v8221_v43 = vld [vmem:[#allocation29_spill] sm:$0xff]  ;;  %v8222_v22 = vld [vmem:[#allocation222_spill] sm:$0xff]  ;;  %v8225_v8 = vld [vmem:[#allocation79_spill] sm:$0xff] }
 0x350   :  { %v2290_v2 = vadd.f32 %v8219_v46, %v8218_v17  ;;  %3257 = vrot.lane.b32.xlu1 %v3246_v26, %s3761_s2  ;;  %3255 = vrot.lane.b32.xlu0 %v3245_v59, %s3761_s2  ;;  %v3270_v15 = vmul.f32 %v3268_v0, %v6771_v11  ;;  %v3269_v61 = vmul.f32 %v3268_v0, %v6774_v60  ;;  %v8224_v59 = vld [vmem:[#allocation97_spill] sm:$0xff]  ;;  %v3294_v12 = vstv %s7110_s14 }
 0x351   :  { %v2642_v41 = vadd.f32 %v8220_v47, %v2486_v44  ;;  %v2641_v23 = vadd.f32 %v8221_v43, %v2485_v4  ;;  %v2730_v40 = vadd.f32 %v6948_v36, %v2618_v52  ;;  %v2729_v32 = vadd.f32 %v6954_v42, %v2617_v14  ;;  %v2830_v51 = vpop.permute.xlu1 %2829  ;;  %v2828_v25 = vpop.permute.xlu0 %2827  ;;  %v8226_v36 = vld [vmem:[#allocation80_spill] sm:$0xff] }
 0x352   :  { %v2293_v38 = vadd.f32 %v8222_v22, %v6933_v53  ;;  %v2292_v26 = vadd.f32 %v8223_v29, %v6937_v30  ;;  %v2372_v10 = vadd.f32 %v8224_v59, %v2291_v6  ;;  %v2744_v5 = vmul.f32 %v6839_v20, %v2742_v54  ;;  %v8227_v53 = vld [vmem:[#allocation99_spill] sm:$0xff]  ;;  %v8231_v43 = vld [vmem:[#allocation100_spill] sm:$0xff] }
 0x353   :  { %v2488_v35 = vadd.f32 %v8225_v8, %v2364_v55  ;;  %v2487_v52 = vadd.f32 %v8226_v36, %v2363_v28  ;;  %v7147_v42 = vadd.f32 %v2830_v51, %v2730_v40  ;;  %v7149_v14 = vadd.f32 %v2828_v25, %v2729_v32  ;;  %v8228_v55 = vld [vmem:[#allocation23_spill] sm:$0xff]  ;;  %v8229_v28 = vld [vmem:[#allocation30_spill] sm:$0xff]  ;;  %v8232_v40 = vld [vmem:[#allocation101_spill] sm:$0xff] }
 0x354   :  { %v2371_v44 = vadd.f32 %v8227_v53, %v2290_v2  ;;  %3279 = vrot.lane.b32.xlu1 %v3270_v15, %s3761_s2  ;;  %3277 = vrot.lane.b32.xlu0 %v3269_v61, %s3761_s2  ;;  %v3272_v30 = vmul.f32 %v3268_v0, %v6819_v62  ;;  %v3271_v6 = vmul.f32 %v3268_v0, %v6821_v9  ;;  %v8230_v2 = vld [vmem:[#allocation49_spill] sm:$0xff]  ;;  %v8233_v59 = vld [vmem:[#allocation83_spill] sm:$0xff]  ;;  %v8234_v25 = vld [vmem:[#allocation84_spill] sm:$0xff] }
 0x355   :  { %v2644_v4 = vadd.f32 %v8228_v55, %v2488_v35  ;;  %v2643_v17 = vadd.f32 %v8229_v28, %v2487_v52  ;;  %v2738_v46 = vadd.f32 %v7018_v50, %v2642_v41  ;;  %v2737_v47 = vadd.f32 %v7043_v37, %v2641_v23  ;;  %v2852_v22 = vpop.permute.xlu1 %2851  ;;  %v2850_v0 = vpop.permute.xlu0 %2849  ;;  %v8235_v37 = vld [vmem:[#allocation50_spill] sm:$0xff] }
 0x356   :  { %v2317_v15 = vadd.f32 %v8230_v2, %v6958_v58  ;;  %v2374_v61 = vadd.f32 %v8231_v43, %v2293_v38  ;;  %v2373_v32 = vadd.f32 %v8232_v40, %v2292_v26  ;;  %v2743_v29 = vmul.f32 %v6851_v18, %v2742_v54  ;;  %v8236_v38 = vld [vmem:[#allocation35_spill] sm:$0xff]  ;;  %v8240_v43 = vld [vmem:[#allocation85_spill] sm:$0xff] }
 0x357   :  { %v2512_v51 = vadd.f32 %v8233_v59, %v2372_v10  ;;  %v2511_v8 = vadd.f32 %v8234_v25, %v2371_v44  ;;  %v7170_v35 = vadd.f32 %v2852_v22, %v2738_v46  ;;  %v7172_v50 = vadd.f32 %v2850_v0, %v2737_v47  ;;  %v8237_v10 = vld [vmem:[#allocation36_spill] sm:$0xff]  ;;  %v8238_v44 = vld [vmem:[#allocation21_spill] sm:$0xff] }
 0x358   :  { %v2316_v58 = vadd.f32 %v8235_v37, %v6987_v24  ;;  %3283 = vrot.lane.b32.xlu1 %v3272_v30, %s3761_s2  ;;  %3281 = vrot.lane.b32.xlu0 %v3271_v6, %s3761_s2  ;;  %v3296_v41 = vmul.f32 %v3294_v12, %v6771_v11  ;;  %v3295_v23 = vmul.f32 %v3294_v12, %v6774_v60  ;;  %v2752_v46 = vstv %s7143_s15  ;;  %v8239_v47 = vld [vmem:[#allocation81_spill] sm:$0xff]  ;;  %s3649_s2 = sld [smem:[#allocation6 + $0x50]] }
 0x359   :  { %v2668_v26 = vadd.f32 %v8236_v38, %v2512_v51  ;;  %v2667_v36 = vadd.f32 %v8237_v10, %v2511_v8  ;;  %v2740_v52 = vadd.f32 %v7069_v1, %v2644_v4  ;;  %v2739_v53 = vadd.f32 %v7096_v45, %v2643_v17  ;;  %v2856_v24 = vpop.permute.xlu1 %2855  ;;  %v2854_v28 = vpop.permute.xlu0 %2853  ;;  %v8241_v1 = vld [vmem:[#allocation102_spill] sm:$0xff] }
 0x35a   :  { %v2382_v55 = vadd.f32 %v8238_v44, %v2317_v15  ;;  %v2746_v30 = vmul.f32 %v6897_v7, %v2742_v54  ;;  %v2745_v6 = vmul.f32 %v6873_v57, %v2742_v54  ;;  %v2514_v2 = vadd.f32 %v8239_v47, %v2374_v61  ;;  %v8242_v15 = vld [vmem:[#allocation111_spill] sm:$0xff]  ;;  %v8243_v61 = vld [vmem:[#allocation112_spill] sm:$0xff]  ;;  %v8244_v38 = vld [vmem:[#allocation86_spill] sm:$0xff] }
 0x35b   :  { %v2513_v40 = vadd.f32 %v8240_v43, %v2373_v32  ;;  %v7190_v22 = vadd.f32 %v2856_v24, %v2740_v52  ;;  %v7192_v0 = vadd.f32 %v2854_v28, %v2739_v53  ;;  %v2381_v45 = vadd.f32 %v8241_v1, %v2316_v58  ;;  %v8245_v10 = vld [vmem:[#allocation82_spill] sm:$0xff] }
 0x35c   :  { %3305 = vrot.lane.b32.xlu1 %v3296_v41, %s3762_s6  ;;  %3303 = vrot.lane.b32.xlu0 %v3295_v23, %s3762_s6  ;;  %v3298_v4 = vmul.f32 %v3294_v12, %v6819_v62  ;;  %v3297_v17 = vmul.f32 %v3294_v12, %v6821_v9  ;;  %v3320_v54 = vstv %s7157_s16  ;;  %v2670_v59 = vadd.f32 %v8242_v15, %v2514_v2  ;;  %s3640_s16 = sld [smem:[#allocation6 + $0x9f]] }
 0x35d   :  { %v2669_v51 = vadd.f32 %v8243_v61, %v2513_v40  ;;  %v2748_v32 = vadd.f32 %v2744_v5, %v2668_v26  ;;  %v2747_v25 = vadd.f32 %v2743_v29, %v2667_v36  ;;  %v2878_v8 = vpop.permute.xlu1 %2877  ;;  %v2876_v37 = vpop.permute.xlu0 %2875  ;;  %v2754_v58 = vmul.f32 %v6839_v20, %v2752_v46 }
 0x35e   :  { %v2538_v41 = vadd.f32 %v8244_v38, %v2382_v55  ;;  %v2537_v23 = vadd.f32 %v8245_v10, %v2381_v45  ;;  %v3322_v5 = vmul.f32 %v3320_v54, %v6771_v11  ;;  %v3321_v12 = vmul.f32 %v3320_v54, %v6774_v60 }
 0x35f   :  { %v7205_v52 = vadd.f32 %v2878_v8, %v2748_v32  ;;  %v7207_v53 = vadd.f32 %v2876_v37, %v2747_v25  ;;  %v2753_v29 = vmul.f32 %v6851_v18, %v2752_v46  ;;  %v2750_v36 = vadd.f32 %v2746_v30, %v2670_v59 }
 0x360   :  { %3309 = vrot.lane.b32.xlu1 %v3298_v4, %s3762_s6  ;;  %3307 = vrot.lane.b32.xlu0 %v3297_v17, %s3762_s6  ;;  %v2694_v20 = vadd.f32 %v6964_v3, %v2538_v41  ;;  %v2693_v26 = vadd.f32 %v6966_v31, %v2537_v23  ;;  %v2749_v44 = vadd.f32 %v2745_v6, %v2669_v51  ;;  %v3346_v6 = vstv %s3649_s2 }
 0x361   :  { %v2882_v55 = vpop.permute.xlu1 %2881  ;;  %v2880_v24 = vpop.permute.xlu0 %2879  ;;  %v3324_v2 = vmul.f32 %v3320_v54, %v6819_v62  ;;  %v3323_v18 = vmul.f32 %v3320_v54, %v6821_v9  ;;  %v2756_v3 = vmul.f32 %v6897_v7, %v2752_v46  ;;  %v2755_v30 = vmul.f32 %v6873_v57, %v2752_v46 }
 0x362   :  { %v7216_v28 = vadd.f32 %v2882_v55, %v2750_v36  ;;  %v7218_v47 = vadd.f32 %v2880_v24, %v2749_v44  ;;  %v2758_v43 = vadd.f32 %v2754_v58, %v2694_v20  ;;  %v2757_v31 = vadd.f32 %v2753_v29, %v2693_v26 }
 0x363   :  { %v3348_v17 = vmul.f32 %v3346_v6, %v6771_v11  ;;  %v3347_v7 = vmul.f32 %v3346_v6, %v6774_v60  ;;  %v2760_v54 = vadd.f32 %v2756_v3, %v6996_v49  ;;  %v2759_v57 = vadd.f32 %v2755_v30, %v6998_v34 }
 0x364   :  { %3331 = vrot.lane.b32.xlu1 %v3322_v5, %s3762_s6  ;;  %3329 = vrot.lane.b32.xlu0 %v3321_v12, %s3762_s6  ;;  %v3350_v51 = vmul.f32 %v3346_v6, %v6819_v62  ;;  %v3349_v32 = vmul.f32 %v3346_v6, %v6821_v9  ;;  %v3372_v25 = vstv %s3650_s17  ;;  %v3398_v12 = vstv %s3651_s18 }
 0x365   :  { %v2904_v40 = vpop.permute.xlu1 %2903  ;;  %v2902_v1 = vpop.permute.xlu0 %2901  ;;  %v3374_v58 = vmul.f32 %v3372_v25, %v6771_v11  ;;  %v3373_v38 = vmul.f32 %v3372_v25, %v6774_v60  ;;  %v3399_v36 = vmul.f32 %v3398_v12, %v6774_v60 }
 0x366   :  { %v7226_v45 = vadd.f32 %v2904_v40, %v2758_v43  ;;  %v7228_v4 = vadd.f32 %v2902_v1, %v2757_v31 }
 0x368   :  { %3335 = vrot.lane.b32.xlu1 %v3324_v2, %s3762_s6  ;;  %3333 = vrot.lane.b32.xlu0 %v3323_v18, %s3762_s6  ;;  %v3424_v18 = vstv %s3652_s19 }
 0x369   :  { %v2908_v46 = vpop.permute.xlu1 %2907  ;;  %v2906_v15 = vpop.permute.xlu0 %2905  ;;  %v3425_v30 = vmul.f32 %v3424_v18, %v6774_v60 }
 0x36a   :  { %v7236_v59 = vadd.f32 %v2908_v46, %v2760_v54  ;;  %v7238_v61 = vadd.f32 %v2906_v15, %v2759_v57 }
 0x36c   :  { %3357 = vrot.lane.b32.xlu1 %v3348_v17, %s3762_s6  ;;  %3355 = vrot.lane.b32.xlu0 %v3347_v7, %s3762_s6 }
 0x36d   :  { %v2930_v8 = vpop.permute.xlu1 %2929 }
 0x36e   :  { %v2928_v49 = vpop.permute.xlu0 %2927  ;;  %v7245_v34 = vadd.f32 %v2930_v8, %v7022_v19  ;;  %v3376_v19 = vmul.f32 %v3372_v25, %v6819_v62 }
 0x36f   :  { %v7248_v37 = vadd.f32 %v2928_v49, %v7024_v33  ;;  %v3375_v33 = vmul.f32 %v3372_v25, %v6821_v9 }
 0x370   :  { %3361 = vrot.lane.b32.xlu1 %v3350_v51, %s3762_s6  ;;  %3359 = vrot.lane.b32.xlu0 %v3349_v32, %s3762_s6 }
 0x371   :  { %v2934_v41 = vpop.permute.xlu1 %2933 }
 0x372   :  { %v2932_v10 = vpop.permute.xlu0 %2931  ;;  %v7255_v23 = vadd.f32 %v2934_v41, %v7047_v27 }
 0x373   :  { %v7258_v5 = vadd.f32 %v2932_v10, %v7049_v13  ;;  %v3400_v13 = vmul.f32 %v3398_v12, %v6771_v11 }
 0x374   :  { %3383 = vrot.lane.b32.xlu1 %v3374_v58, %s3762_s6  ;;  %3381 = vrot.lane.b32.xlu0 %v3373_v38, %s3762_s6 }
 0x375   :  { %v2956_v29 = vpop.permute.xlu1 %2955 }
 0x376   :  { %v2954_v20 = vpop.permute.xlu0 %2953  ;;  %v7265_v26 = vadd.f32 %v2956_v29, %v7075_v16  ;;  %v3402_v16 = vmul.f32 %v3398_v12, %v6819_v62 }
 0x377   :  { %v7268_v27 = vadd.f32 %v2954_v20, %v7077_v48  ;;  %v3401_v48 = vmul.f32 %v3398_v12, %v6821_v9 }
 0x378   :  { %3387 = vrot.lane.b32.xlu1 %v3376_v19, %s3762_s6  ;;  %3385 = vrot.lane.b32.xlu0 %v3375_v33, %s3762_s6 }
 0x379   :  { %v2960_v44 = vpop.permute.xlu1 %2959 }
 0x37a   :  { %v2958_v55 = vpop.permute.xlu0 %2957  ;;  %v7275_v24 = vadd.f32 %v2960_v44, %v7100_v63 }
 0x37b   :  { %v7278_v2 = vadd.f32 %v2958_v55, %v7102_v39  ;;  %v3426_v39 = vmul.f32 %v3424_v18, %v6771_v11 }
 0x37c   :  { %3409 = vrot.lane.b32.xlu1 %v3400_v13, %s3762_s6  ;;  %3407 = vrot.lane.b32.xlu0 %v3399_v36, %s3762_s6 }
 0x37d   :  { %v2982_v3 = vpop.permute.xlu1 %2981 }
 0x37e   :  { %v2980_v43 = vpop.permute.xlu0 %2979  ;;  %v7285_v31 = vadd.f32 %v2982_v3, %v7123_v21  ;;  %v3428_v21 = vmul.f32 %v3424_v18, %v6819_v62 }
 0x37f   :  { %v7288_v63 = vadd.f32 %v2980_v43, %v7125_v56  ;;  %v3427_v56 = vmul.f32 %v3424_v18, %v6821_v9 }
 0x380   :  { %3413 = vrot.lane.b32.xlu1 %v3402_v16, %s3762_s6  ;;  %3411 = vrot.lane.b32.xlu0 %v3401_v48, %s3762_s6 }
 0x381   :  { %v2986_v6 = vpop.permute.xlu1 %2985 }
 0x382   :  { %v2984_v40 = vpop.permute.xlu0 %2983  ;;  %v7295_v1 = vadd.f32 %v2986_v6, %v7147_v42 }
 0x383   :  { %v7298_v17 = vadd.f32 %v2984_v40, %v7149_v14 }
 0x384   :  { %3435 = vrot.lane.b32.xlu1 %v3426_v39, %s3762_s6  ;;  %3433 = vrot.lane.b32.xlu0 %v3425_v30, %s3762_s6 }
 0x385   :  { %v3008_v7 = vpop.permute.xlu1 %3007 }
 0x386   :  { %v3006_v54 = vpop.permute.xlu0 %3005  ;;  %v7305_v57 = vadd.f32 %v3008_v7, %v7170_v35 }
 0x387   :  { %v7308_v46 = vadd.f32 %v3006_v54, %v7172_v50 }
 0x388   :  { %3439 = vrot.lane.b32.xlu1 %v3428_v21, %s3762_s6  ;;  %3437 = vrot.lane.b32.xlu0 %v3427_v56, %s3762_s6  ;;  %s3635_s6 = sld [smem:[#allocation6 + $0x18]] }
 0x389   :  { %v3012_v42 = vpop.permute.xlu1 %3011 }
 0x38a   :  { %v3010_v14 = vpop.permute.xlu0 %3009  ;;  %v7313_v15 = vadd.f32 %v3012_v42, %v7190_v22 }
 0x38b   :  { %v7316_v51 = vadd.f32 %v3010_v14, %v7192_v0 }
 0x38d   :  { %v3034_v32 = vpop.permute.xlu1 %3033 }
 0x38e   :  { %v3032_v25 = vpop.permute.xlu0 %3031  ;;  %v7319_v35 = vadd.f32 %v3034_v32, %v7205_v52  ;;  %v3078_v6 = vstv %s3635_s6 }
 0x38f   :  { %v7322_v50 = vadd.f32 %v3032_v25, %v7207_v53  ;;  %v3080_v56 = vmul.f32 %v3078_v6, %v6771_v11  ;;  %v3079_v7 = vmul.f32 %v3078_v6, %v6774_v60  ;;  %v3082_v54 = vmul.f32 %v3078_v6, %v6819_v62 }
 0x391   :  { %v3084_v32 = vadd.f32 %v3080_v56, %v7245_v34  ;;  %v3083_v25 = vadd.f32 %v3079_v7, %v7248_v37 }
 0x392   :  { %v3038_v8 = vpop.permute.xlu1 %3037  ;;  %v3036_v49 = vpop.permute.xlu0 %3035 }
 0x393   :  { %v7325_v58 = vadd.f32 %v3038_v8, %v7216_v28  ;;  %v7328_v38 = vadd.f32 %v3036_v49, %v7218_v47  ;;  %v3081_v8 = vmul.f32 %v3078_v6, %v6821_v9  ;;  %v3088_v49 = vstv %s3636_s20 }
 0x396   :  { %v3060_v22 = vpop.permute.xlu1 %3059  ;;  %v3058_v41 = vpop.permute.xlu0 %3057 }
 0x397   :  { %v7331_v0 = vadd.f32 %v3060_v22, %v7226_v45  ;;  %v7334_v10 = vadd.f32 %v3058_v41, %v7228_v4 }
 0x39a   :  { %v3064_v52 = vpop.permute.xlu1 %3063  ;;  %v3062_v19 = vpop.permute.xlu0 %3061 }
 0x39b   :  { %v7337_v53 = vadd.f32 %v3064_v52, %v7236_v59  ;;  %v7340_v33 = vadd.f32 %v3062_v19, %v7238_v61  ;;  %v3090_v52 = vmul.f32 %v3088_v49, %v6771_v11  ;;  %v3089_v19 = vmul.f32 %v3088_v49, %v6774_v60 }
 0x39d   :  { %8246 = vst [vmem:[#allocation113_spill] sm:$0xff] %v7337_v53  ;;  %8247 = vst [vmem:[#allocation114_spill] sm:$0xff] %v7340_v33 }
 0x39e   :  { %v3150_v28 = vpop.permute.xlu1 %3149  ;;  %v3148_v12 = vpop.permute.xlu0 %3147 }
 0x39f   :  { %v3160_v22 = vadd.f32 %v3150_v28, %v3084_v32  ;;  %v3159_v41 = vadd.f32 %v3148_v12, %v3083_v25  ;;  %v3092_v28 = vmul.f32 %v3088_v49, %v6819_v62  ;;  %v3098_v12 = vstv %s3637_s21 }
 0x3a1   :  { %v3096_v25 = vadd.f32 %v3092_v28, %v7275_v24  ;;  %v3102_v24 = vmul.f32 %v3098_v12, %v6819_v62 }
 0x3a2   :  { %v3154_v47 = vpop.permute.xlu1 %3153  ;;  %v3152_v29 = vpop.permute.xlu0 %3151 }
 0x3a6   :  { %v3176_v20 = vpop.permute.xlu1 %3175  ;;  %v3174_v13 = vpop.permute.xlu0 %3173 }
 0x3aa   :  { %v7342_v36 = vpop.permute.xlu1 %3179  ;;  %v7344_v45 = vpop.permute.xlu0 %3177 }
 0x3ae   :  { %v7346_v4 = vpop.permute.xlu1 %3201  ;;  %v7348_v44 = vpop.permute.xlu0 %3199 }
 0x3b2   :  { %v7350_v55 = vpop.permute.xlu1 %3205  ;;  %v7352_v59 = vpop.permute.xlu0 %3203 }
 0x3b6   :  { %v7354_v61 = vpop.permute.xlu1 %3227  ;;  %v7356_v16 = vpop.permute.xlu0 %3225 }
 0x3ba   :  { %v7358_v48 = vpop.permute.xlu1 %3231  ;;  %v7360_v18 = vpop.permute.xlu0 %3229 }
 0x3be   :  { %v7362_v3 = vpop.permute.xlu1 %3253  ;;  %v7364_v43 = vpop.permute.xlu0 %3251 }
 0x3c2   :  { %v7366_v39 = vpop.permute.xlu1 %3257  ;;  %v7368_v30 = vpop.permute.xlu0 %3255 }
 0x3c6   :  { %v7370_v40 = vpop.permute.xlu1 %3279  ;;  %v7372_v21 = vpop.permute.xlu0 %3277 }
 0x3ca   :  { %v7377_v42 = vpop.permute.xlu1 %3283  ;;  %v7379_v14 = vpop.permute.xlu0 %3281 }
 0x3cb   :  { %8248 = vst [vmem:[#allocation115_spill] sm:$0xff] %v7377_v42  ;;  %8249 = vst [vmem:[#allocation116_spill] sm:$0xff] %v7379_v14  ;;  %v3086_v42 = vadd.f32 %v3082_v54, %v7255_v23  ;;  %v3085_v14 = vadd.f32 %v3081_v8, %v7258_v5  ;;  %v3091_v23 = vmul.f32 %v3088_v49, %v6821_v9 }
 0x3cc   :  { %v3188_v49 = vadd.f32 %v7342_v36, %v3096_v25 }
 0x3cd   :  { %v3162_v37 = vadd.f32 %v3154_v47, %v3086_v42  ;;  %v3161_v7 = vadd.f32 %v3152_v29, %v3085_v14  ;;  %v3093_v47 = vadd.f32 %v3089_v19, %v7268_v27  ;;  %v3100_v14 = vmul.f32 %v3098_v12, %v6771_v11 }
 0x3ce   :  { %v3306_v33 = vpop.permute.xlu1 %3305  ;;  %v3304_v53 = vpop.permute.xlu0 %3303 }
 0x3cf   :  { %v3316_v34 = vadd.f32 %v3306_v33, %v3160_v22  ;;  %v3315_v56 = vadd.f32 %v3304_v53, %v3159_v41  ;;  %v3094_v33 = vadd.f32 %v3090_v52, %v7265_v26  ;;  %v3185_v42 = vadd.f32 %v3174_v13, %v3093_v47 }
 0x3d0   :  { %v3099_v26 = vmul.f32 %v3098_v12, %v6774_v60  ;;  %v3108_v41 = vstv %s3638_s26 }
 0x3d1   :  { %3452 = vst.msk [vmem:[%s7535_s3 + $0x8] sm:$0x3f] %vm3451_vm0, %v3316_v34  ;;  %v3186_v54 = vadd.f32 %v3176_v20, %v3094_v33  ;;  %v3095_v20 = vadd.f32 %v3091_v23, %v7278_v2  ;;  %v3101_v2 = vmul.f32 %v3098_v12, %v6821_v9 }
 0x3d2   :  { %3450 = vst.msk [vmem:[%s7535_s3] sm:$0xff] %vm3449_vm1, %v3315_v56  ;;  %v3310_v5 = vpop.permute.xlu1 %3309  ;;  %v3308_v53 = vpop.permute.xlu0 %3307  ;;  %v3103_v19 = vadd.f32 %v3099_v26, %v7288_v63  ;;  %v3109_v63 = vmul.f32 %v3108_v41, %v6774_v60  ;;  %v3111_v60 = vmul.f32 %v3108_v41, %v6821_v9 }
 0x3d3   :  { %v3318_v29 = vadd.f32 %v3310_v5, %v3162_v37  ;;  %v3317_v6 = vadd.f32 %v3308_v53, %v3161_v7  ;;  %v3187_v22 = vadd.f32 %v7344_v45, %v3095_v20  ;;  %v3104_v45 = vadd.f32 %v3100_v14, %v7285_v31 }
 0x3d4   :  { %v3211_v7 = vadd.f32 %v7348_v44, %v3103_v19  ;;  %v3110_v31 = vmul.f32 %v3108_v41, %v6771_v11  ;;  %v3105_v44 = vadd.f32 %v3101_v2, %v7298_v17  ;;  %v3112_v11 = vmul.f32 %v3108_v41, %v6819_v62  ;;  %v3706_v62 = vld [vmem:[#allocation2 + $0x2a] sm:$0x3f] }
 0x3d5   :  { %3454 = vst.msk [vmem:[%s7535_s3 + $0x68] sm:$0x3f] %vm3451_vm0, %v3318_v29  ;;  %v3212_v37 = vadd.f32 %v7346_v4, %v3104_v45  ;;  %v3106_v4 = vadd.f32 %v3102_v24, %v7295_v1  ;;  %v3118_v1 = vstv %s3639_s7  ;;  %v3113_v47 = vadd.f32 %v3109_v63, %v7308_v46 }
 0x3d6   :  { %3453 = vst.msk [vmem:[%s7535_s3 + $0x60] sm:$0xff] %vm3449_vm1, %v3317_v6  ;;  %v3332_v32 = vpop.permute.xlu1 %3331  ;;  %v3330_v27 = vpop.permute.xlu0 %3329  ;;  %v3213_v33 = vadd.f32 %v7352_v59, %v3105_v44  ;;  %v3114_v59 = vadd.f32 %v3110_v31, %v7305_v57  ;;  %v3120_v9 = vmul.f32 %v3706_v62, %v3118_v1  ;;  %v3707_v57 = vld [vmem:[#allocation2 + $0x22] sm:$0xff] }
 0x3d7   :  { %v3342_v13 = vadd.f32 %v3332_v32, %v3186_v54  ;;  %v3341_v8 = vadd.f32 %v3330_v27, %v3185_v42  ;;  %v3214_v53 = vadd.f32 %v7350_v55, %v3106_v4  ;;  %v3237_v42 = vadd.f32 %v7356_v16, %v3113_v47 }
 0x3d8   :  { %v3238_v54 = vadd.f32 %v7354_v61, %v3114_v59  ;;  %v3119_v46 = vmul.f32 %v3707_v57, %v3118_v1  ;;  %v3116_v61 = vadd.f32 %v3112_v11, %v7313_v15  ;;  %v3115_v16 = vadd.f32 %v3111_v60, %v7316_v51  ;;  %v8252_v60 = vld [vmem:[#allocation115_spill] sm:$0xff] }
 0x3d9   :  { %3654 = vst.msk [vmem:[%s7535_s3 + $0x18] sm:$0x3f] %vm3451_vm0, %v3342_v13  ;;  %v3708_v13 = vld [vmem:[#allocation2 + $0x5a] sm:$0x3f] }
 0x3da   :  { %3653 = vst.msk [vmem:[%s7535_s3 + $0x10] sm:$0xff] %vm3449_vm1, %v3341_v8  ;;  %v3336_v52 = vpop.permute.xlu1 %3335  ;;  %v3334_v36 = vpop.permute.xlu0 %3333  ;;  %v3240_v25 = vadd.f32 %v7358_v48, %v3116_v61  ;;  %v3239_v20 = vadd.f32 %v7360_v18, %v3115_v16  ;;  %v3122_v15 = vmul.f32 %v3708_v13, %v3118_v1  ;;  %v3709_v8 = vld [vmem:[#allocation2 + $0x52] sm:$0xff]  ;;  %v3124_v48 = vadd.f32 %v3120_v9, %v7319_v35 }
 0x3db   :  { %v3344_v34 = vadd.f32 %v3336_v52, %v3188_v49  ;;  %v3343_v56 = vadd.f32 %v3334_v36, %v3187_v22  ;;  %v3121_v51 = vmul.f32 %v3709_v8, %v3118_v1  ;;  %v3128_v49 = vstv %s3640_s16  ;;  %v8253_v1 = vld [vmem:[#allocation116_spill] sm:$0xff] }
 0x3dc   :  { %v3123_v18 = vadd.f32 %v3119_v46, %v7322_v50  ;;  %v3264_v52 = vadd.f32 %v7362_v3, %v3124_v48  ;;  %v3130_v45 = vmul.f32 %v3706_v62, %v3128_v49  ;;  %v3129_v35 = vmul.f32 %v3707_v57, %v3128_v49 }
 0x3dd   :  { %3656 = vst.msk [vmem:[%s7535_s3 + $0x78] sm:$0x3f] %vm3451_vm0, %v3344_v34  ;;  %v3126_v34 = vadd.f32 %v3122_v15, %v7325_v58  ;;  %v3125_v3 = vadd.f32 %v3121_v51, %v7328_v38  ;;  %v3132_v31 = vmul.f32 %v3708_v13, %v3128_v49  ;;  %v3131_v58 = vmul.f32 %v3709_v8, %v3128_v49 }
 0x3de   :  { %3655 = vst.msk [vmem:[%s7535_s3 + $0x70] sm:$0xff] %vm3449_vm1, %v3343_v56  ;;  %v3358_v28 = vpop.permute.xlu1 %3357  ;;  %v3356_v23 = vpop.permute.xlu0 %3355  ;;  %v3263_v36 = vadd.f32 %v7364_v43, %v3123_v18 }
 0x3df   :  { %v3368_v12 = vadd.f32 %v3358_v28, %v3212_v37  ;;  %v3367_v5 = vadd.f32 %v3356_v23, %v3211_v7  ;;  %v3266_v37 = vadd.f32 %v7366_v39, %v3126_v34  ;;  %v3265_v7 = vadd.f32 %v7368_v30, %v3125_v3 }
 0x3e0   :  { %v3134_v28 = vadd.f32 %v3130_v45, %v7331_v0  ;;  %v3133_v39 = vadd.f32 %v3129_v35, %v7334_v10 }
 0x3e1   :  { %3658 = vst.msk [vmem:[%s7535_s3 + $0x28] sm:$0x3f] %vm3451_vm0, %v3368_v12 }
 0x3e2   :  { %3657 = vst.msk [vmem:[%s7535_s3 + $0x20] sm:$0xff] %vm3449_vm1, %v3367_v5  ;;  %v3362_v17 = vpop.permute.xlu1 %3361  ;;  %v3360_v55 = vpop.permute.xlu0 %3359  ;;  %v3290_v4 = vadd.f32 %v7370_v40, %v3134_v28  ;;  %v3289_v44 = vadd.f32 %v7372_v21, %v3133_v39  ;;  %v8250_v5 = vld [vmem:[#allocation113_spill] sm:$0xff] }
 0x3e3   :  { %v3370_v29 = vadd.f32 %v3362_v17, %v3214_v53  ;;  %v3369_v6 = vadd.f32 %v3360_v55, %v3213_v33  ;;  %v3136_v10 = vadd.f32 %v3132_v31, %v8250_v5  ;;  %v8251_v53 = vld [vmem:[#allocation114_spill] sm:$0xff] }
 0x3e4   :  { %v3135_v33 = vadd.f32 %v3131_v58, %v8251_v53 }
 0x3e5   :  { %3660 = vst.msk [vmem:[%s7535_s3 + $0x88] sm:$0x3f] %vm3451_vm0, %v3370_v29  ;;  %v3292_v21 = vadd.f32 %v8252_v60, %v3136_v10 }
 0x3e6   :  { %3659 = vst.msk [vmem:[%s7535_s3 + $0x80] sm:$0xff] %vm3449_vm1, %v3369_v6  ;;  %v3384_v14 = vpop.permute.xlu1 %3383  ;;  %v3382_v26 = vpop.permute.xlu0 %3381  ;;  %v3291_v17 = vadd.f32 %v8253_v1, %v3135_v33 }
 0x3e7   :  { %v3394_v32 = vadd.f32 %v3384_v14, %v3238_v54  ;;  %v3393_v27 = vadd.f32 %v3382_v26, %v3237_v42 }
 0x3e9   :  { %3662 = vst.msk [vmem:[%s7535_s3 + $0x38] sm:$0x3f] %vm3451_vm0, %v3394_v32 }
 0x3ea   :  { %3661 = vst.msk [vmem:[%s7535_s3 + $0x30] sm:$0xff] %vm3449_vm1, %v3393_v27  ;;  %v3388_v22 = vpop.permute.xlu1 %3387  ;;  %v3386_v24 = vpop.permute.xlu0 %3385 }
 0x3eb   :  { %v3396_v2 = vadd.f32 %v3388_v22, %v3240_v25  ;;  %v3395_v41 = vadd.f32 %v3386_v24, %v3239_v20 }
 0x3ed   :  { %3664 = vst.msk [vmem:[%s7535_s3 + $0x98] sm:$0x3f] %vm3451_vm0, %v3396_v2 }
 0x3ee   :  { %3663 = vst.msk [vmem:[%s7535_s3 + $0x90] sm:$0xff] %vm3449_vm1, %v3395_v41  ;;  %v3410_v19 = vpop.permute.xlu1 %3409  ;;  %v3408_v50 = vpop.permute.xlu0 %3407 }
 0x3ef   :  { %v3420_v56 = vadd.f32 %v3410_v19, %v3264_v52  ;;  %v3419_v43 = vadd.f32 %v3408_v50, %v3263_v36 }
 0x3f1   :  { %3666 = vst.msk [vmem:[%s7535_s3 + $0x48] sm:$0x3f] %vm3451_vm0, %v3420_v56 }
 0x3f2   :  { %3665 = vst.msk [vmem:[%s7535_s3 + $0x40] sm:$0xff] %vm3449_vm1, %v3419_v43  ;;  %v3414_v63 = vpop.permute.xlu1 %3413  ;;  %v3412_v38 = vpop.permute.xlu0 %3411 }
 0x3f3   :  { %v3422_v23 = vadd.f32 %v3414_v63, %v3266_v37  ;;  %v3421_v30 = vadd.f32 %v3412_v38, %v3265_v7 }
 0x3f5   :  { %3668 = vst.msk [vmem:[%s7535_s3 + $0xa8] sm:$0x3f] %vm3451_vm0, %v3422_v23 }
 0x3f6   :  { %3667 = vst.msk [vmem:[%s7535_s3 + $0xa0] sm:$0xff] %vm3449_vm1, %v3421_v30  ;;  %v3436_v12 = vpop.permute.xlu1 %3435  ;;  %v3434_v0 = vpop.permute.xlu0 %3433 }
 0x3f7   :  { %v3446_v11 = vadd.f32 %v3436_v12, %v3290_v4  ;;  %v3445_v40 = vadd.f32 %v3434_v0, %v3289_v44 }
 0x3f9   :  { %3670 = vst.msk [vmem:[%s7535_s3 + $0x58] sm:$0x3f] %vm3451_vm0, %v3446_v11 }
 0x3fa   :  { %3669 = vst.msk [vmem:[%s7535_s3 + $0x50] sm:$0xff] %vm3449_vm1, %v3445_v40  ;;  %v3440_v55 = vpop.permute.xlu1 %3439  ;;  %v3438_v59 = vpop.permute.xlu0 %3437 }
 0x3fb   :  { %v3448_v47 = vadd.f32 %v3440_v55, %v3292_v21  ;;  %v3447_v29 = vadd.f32 %v3438_v59, %v3291_v17 }
 0x3fd   :  { %3672 = vst.msk [vmem:[%s7535_s3 + $0xb8] sm:$0x3f] %vm3451_vm0, %v3448_v47 }
 0x3fe   :  { %3671 = vst.msk [vmem:[%s7535_s3 + $0xb0] sm:$0xff] %vm3449_vm1, %v3447_v29 }
 0x3ff   :  { %3484 = vsyncpa [#allocation3], 1 }
 0x400   :  { %3485 = vsyncpa [#allocation4], 1 }
 0x401   :  { %3486 = vsyncpa [#allocation5], 1 }

</bundles_post_ra>
